<compile_context>
chip_gen: v6e
topology: v6e:2x2x1
jax: 0.10.0
libtpu: 0.0.40
codegen_flags: <defaults>
</compile_context>

<pallas_src>
import functools

import jax
import jax.numpy as jnp
from jax.experimental import pallas as pl
from jax.experimental.pallas import tpu as pltpu

NEG_SLOPE = 0.01          # F.leaky_relu default negative_slope
CPAD = 128                # lane-dense output width (Cout / n_out padded to this)
C1, C2, C3 = 32, 64, 64   # SimpleCNN channel sizes
K1_PAD = 32               # conv1 K = 5*5*1 = 25 -> pad to 32


# ----------------------------- helpers --------------------------------------

def _round_up(x, m):
    return (x + m - 1) // m * m


def _choose_tm(mp, cap=1024):
    """Row-tile size: multiple of 8, divides mp, <= cap, and >=2 grid steps
    whenever possible (so both TensorCores get work on v7x)."""
    if mp <= cap:
        half = mp // 2
        if mp >= 16 and half % 8 == 0:
            return half
        return mp
    best = 8
    for d in range(8, cap + 1, 8):
        if mp % d == 0:
            best = d
    return best


def _pad_rows(x, mp):
    m = x.shape[0]
    return x if m == mp else jnp.pad(x, ((0, mp - m), (0, 0)))


# ----------------------------- Pallas kernels -------------------------------

def _conv_pool_kernel(a_ref, b_ref, c_ref, d_ref, w_ref, bias_ref, o_ref):
    """Fused conv(matmul) + bias + leaky_relu + 2x2 max-pool.
    a..d are the im2col matrices of the four pool-window taps."""
    w = w_ref[...]
    bias = bias_ref[...]

    def branch(x_ref):
        y = jnp.dot(x_ref[...], w, preferred_element_type=jnp.float32) + bias
        return jnp.where(y >= 0.0, y, NEG_SLOPE * y)

    m = jnp.maximum(jnp.maximum(branch(a_ref), branch(b_ref)),
                    jnp.maximum(branch(c_ref), branch(d_ref)))
    o_ref[...] = m.astype(o_ref.dtype)


def _matmul_bias_kernel(x_ref, w_ref, b_ref, o_ref, *, neg_slope):
    """y = (optional leaky_relu)(x @ w + b), f32 accumulation."""
    y = jnp.dot(x_ref[...], w_ref[...], preferred_element_type=jnp.float32)
    y = y + b_ref[...]
    if neg_slope is not None:
        y = jnp.where(y >= 0.0, y, neg_slope * y)
    o_ref[...] = y.astype(o_ref.dtype)


# ----------------------------- kernel wrappers -------------------------------

def fused_conv_pool(taps, w_mat, bias):
    """taps: 4 x (M, K) bf16; w_mat: (K, CPAD) bf16; bias: (1, CPAD) f32.
    Returns the pooled activation, (M, CPAD) bf16, rows ordered (n, ho, wo)."""
    M, K = taps[0].shape
    Mp = _round_up(M, 8)
    taps = [_pad_rows(t, Mp) for t in taps]
    TM = _choose_tm(Mp)
    x_spec = pl.BlockSpec((TM, K), lambda i: (i, 0))
    out = pl.pallas_call(
        _conv_pool_kernel,
        out_shape=jax.ShapeDtypeStruct((Mp, CPAD), jnp.bfloat16),
        grid=(Mp // TM,),
        in_specs=[x_spec, x_spec, x_spec, x_spec,
                  pl.BlockSpec((K, CPAD), lambda i: (0, 0)),
                  pl.BlockSpec((1, CPAD), lambda i: (0, 0))],
        out_specs=pl.BlockSpec((TM, CPAD), lambda i: (i, 0)),
        compiler_params=pltpu.CompilerParams(dimension_semantics=("parallel",)),
    )(*taps, w_mat, bias)
    return out[:M] if Mp != M else out


def matmul_bias_act(x, w_mat, bias, *, neg_slope, out_dtype):
    """x: (M, K) bf16; w_mat: (K, CPAD) bf16; bias: (1, CPAD) f32."""
    M, K = x.shape
    Mp = _round_up(M, 8)
    x = _pad_rows(x, Mp)
    TM = _choose_tm(Mp)
    kernel = functools.partial(_matmul_bias_kernel, neg_slope=neg_slope)
    out = pl.pallas_call(
        kernel,
        out_shape=jax.ShapeDtypeStruct((Mp, CPAD), out_dtype),
        grid=(Mp // TM,),
        in_specs=[pl.BlockSpec((TM, K), lambda i: (i, 0)),
                  pl.BlockSpec((K, CPAD), lambda i: (0, 0)),
                  pl.BlockSpec((1, CPAD), lambda i: (0, 0))],
        out_specs=pl.BlockSpec((TM, CPAD), lambda i: (i, 0)),
        compiler_params=pltpu.CompilerParams(dimension_semantics=("parallel",)),
    )(x, w_mat, bias)
    return out[:M] if Mp != M else out


# ------------------------------- XLA glue ------------------------------------

def _im2col(x, k, pad, kpad=None):
    """Full-resolution patch matrix (N*H*W, k*k*C); column order (kh, kw, cin)."""
    N, H, W, C = x.shape
    xp = jnp.pad(x, ((0, 0), (pad, pad), (pad, pad), (0, 0)))
    cols = [xp[:, dh:dh + H, dw:dw + W, :] for dh in range(k) for dw in range(k)]
    out = jnp.concatenate(cols, axis=-1).reshape(N * H * W, k * k * C)
    if kpad is not None and kpad != k * k * C:
        out = jnp.pad(out, ((0, 0), (0, kpad - k * k * C)))
    return out


def _pool_tap_patches(x, k, pad, kpad=None):
    """Four im2col matrices, one per 2x2 pool-window tap (dy, dx).
    Row order (n, ho, wo); column order (kh, kw, cin) — matches packed weights."""
    N, H, W, C = x.shape
    Ho, Wo = H // 2, W // 2
    xp = jnp.pad(x, ((0, 0), (pad, pad), (pad, pad), (0, 0)))
    K = k * k * C
    taps = []
    for dy in range(2):
        for dx in range(2):
            cols = [xp[:, dy + dh: dy + dh + 2 * Ho: 2,
                        dx + dw: dx + dw + 2 * Wo: 2, :]
                    for dh in range(k) for dw in range(k)]
            t = jnp.concatenate(cols, axis=-1).reshape(N * Ho * Wo, K)
            if kpad is not None and kpad != K:
                t = jnp.pad(t, ((0, 0), (0, kpad - K)))
            taps.append(t)
    return taps


# --------------------------- parameter handling ------------------------------

def init_params(key, n_out=10, n_in=1):
    """PyTorch-layout parameters (Conv2d: (Cout, Cin, kh, kw); Linear: (out, in))."""
    ks = jax.random.split(key, 8)

    def conv_w(k_, cout, cin, ksz):
        fan_in = cin * ksz * ksz
        return jax.random.normal(k_, (cout, cin, ksz, ksz), jnp.float32) / jnp.sqrt(fan_in)

    return {
        "conv1_w": conv_w(ks[0], C1, n_in, 5),
        "conv1_b": jax.random.normal(ks[1], (C1,), jnp.float32) * 0.01,
        "conv2_w": conv_w(ks[2], C2, C1, 3),
        "conv2_b": jax.random.normal(ks[3], (C2,), jnp.float32) * 0.01,
        "conv3_w": conv_w(ks[4], C3, C2, 3),
        "conv3_b": jax.random.normal(ks[5], (C3,), jnp.float32) * 0.01,
        "fc_w": jax.random.normal(ks[6], (n_out, 4096), jnp.float32) / 64.0,
        "fc_b": jax.random.normal(ks[7], (n_out,), jnp.float32) * 0.01,
    }


def _pack_conv_weight(w, kpad=None):
    """(Cout, Cin, kh, kw) -> ((k*k*Cin padded), CPAD) bf16; column pad is zeros."""
    cout, cin, k, _ = w.shape
    wm = jnp.transpose(w, (2, 3, 1, 0)).reshape(k * k * cin, cout)
    kp = kpad if kpad is not None else wm.shape[0]
    wm = jnp.pad(wm, ((0, kp - wm.shape[0]), (0, CPAD - cout)))
    return wm.astype(jnp.bfloat16)


def _pack_bias(b):
    return jnp.pad(b, (0, CPAD - b.shape[0])).reshape(1, CPAD).astype(jnp.float32)


def _pack_fc_weight(w_fc):
    """PyTorch (n_out, 4096) over CHW-flattened input -> (4096, CPAD) bf16 over the
    HWC-flattened input, so the NHWC activation reshapes directly (no transpose)."""
    n_out, k_in = w_fc.shape
    hw = k_in // C3
    side = int(round(hw ** 0.5))
    w = w_fc.reshape(n_out, C3, side, side)                 # (out, c, h, w)
    w = jnp.transpose(w, (0, 2, 3, 1)).reshape(n_out, k_in)  # (out, h*w*c)
    w = jnp.transpose(w, (1, 0))                             # (k_in, out)
    return jnp.pad(w, ((0, 0), (0, CPAD - n_out))).astype(jnp.bfloat16)


def prepare_params(params):
    """One-time packing of PyTorch-layout params into kernel-ready layouts."""
    return {
        "w1": _pack_conv_weight(params["conv1_w"], kpad=K1_PAD),
        "b1": _pack_bias(params["conv1_b"]),
        "w2": _pack_conv_weight(params["conv2_w"]),
        "b2": _pack_bias(params["conv2_b"]),
        "w3": _pack_conv_weight(params["conv3_w"]),
        "b3": _pack_bias(params["conv3_b"]),
        "w_fc": _pack_fc_weight(params["fc_w"]),
        "b_fc": _pack_bias(params["fc_b"]),
    }


# ------------------------------- forward -------------------------------------

def simple_cnn_forward(prep, x_nchw, n_out=10):
    """Matches SimpleCNN.forward for 32x32 inputs (fc expects 64*8*8 = 4096)."""
    x = jnp.transpose(x_nchw, (0, 2, 3, 1)).astype(jnp.bfloat16)   # NHWC, bf16
    N, H, W = x.shape[0], x.shape[1], x.shape[2]

    # conv1(5x5, pad 2) + leaky_relu + 2x2 max-pool  -> (N, H/2, W/2, C1 [pad 128])
    taps = _pool_tap_patches(x, k=5, pad=2, kpad=K1_PAD)
    H, W = H // 2, W // 2
    y = fused_conv_pool(taps, prep["w1"], prep["b1"]).reshape(N, H, W, CPAD)

    # conv2(3x3, pad 1) + leaky_relu + 2x2 max-pool  -> (N, H/4, W/4, C2 [pad 128])
    taps = _pool_tap_patches(y[..., :C1], k=3, pad=1)
    H, W = H // 2, W // 2
    y = fused_conv_pool(taps, prep["w2"], prep["b2"]).reshape(N, H, W, CPAD)

    # conv3(3x3, pad 1) + leaky_relu                 -> (N, H/4, W/4, C3 [pad 128])
    cols = _im2col(y[..., :C2], k=3, pad=1)
    y = matmul_bias_act(cols, prep["w3"], prep["b3"],
                        neg_slope=NEG_SLOPE, out_dtype=jnp.bfloat16)
    y = y.reshape(N, H, W, CPAD)[..., :C3].reshape(N, H * W * C3)   # HWC flatten

    # fc (weights pre-permuted to HWC flatten order, padded to 128 outputs)
    out = matmul_bias_act(y, prep["w_fc"], prep["b_fc"],
                          neg_slope=None, out_dtype=jnp.float32)
    return out[:, :n_out]


if __name__ == "__main__":
    key = jax.random.PRNGKey(0)
    pkey, xkey = jax.random.split(key)
    params = init_params(pkey)
    prep = prepare_params(params)

    # fc expects 4096 = 64 * 8 * 8 -> spatial 32x32; n_in = 1, batch = 2 (NCHW).
    x = jax.random.normal(xkey, (2, 1, 32, 32), jnp.float32)

    fwd = jax.jit(simple_cnn_forward)
    out = fwd(prep, x)
    jax.block_until_ready(out)

    assert out.shape == (2, 10) and out.dtype == jnp.float32
    assert bool(jnp.all(jnp.isfinite(out)))
    print("KERNEL_OK")
</pallas_src>

<mosaic_0001>
module attributes {stable_mosaic.version = 11 : i64} {
  func.func @_conv_pool_kernel(%arg0: i32, %arg1: memref<256x32xbf16, #tpu.memory_space<vmem>>, %arg2: memref<256x32xbf16, #tpu.memory_space<vmem>>, %arg3: memref<256x32xbf16, #tpu.memory_space<vmem>>, %arg4: memref<256x32xbf16, #tpu.memory_space<vmem>>, %arg5: memref<32x128xbf16, #tpu.memory_space<vmem>>, %arg6: memref<1x128xf32, #tpu.memory_space<vmem>>, %arg7: memref<256x128xbf16, #tpu.memory_space<vmem>>) attributes {dimension_semantics = [#tpu.dimension_semantics<parallel>], iteration_bounds = array<i64: 2>, scalar_prefetch = 0 : i64, scratch_operands = 0 : i64, tpu.core_type = #tpu.core_type<tc>, window_params = [{transform_indices = @transform_0, window_bounds = array<i64: 256, 32>}, {transform_indices = @transform_1, window_bounds = array<i64: 256, 32>}, {transform_indices = @transform_2, window_bounds = array<i64: 256, 32>}, {transform_indices = @transform_3, window_bounds = array<i64: 256, 32>}, {pipeline_mode = #tpu.pipeline_mode<synchronous>, transform_indices = @transform_4, window_bounds = array<i64: 32, 128>}, {pipeline_mode = #tpu.pipeline_mode<synchronous>, transform_indices = @transform_5, window_bounds = array<i64: 1, 128>}, {transform_indices = @transform_6, window_bounds = array<i64: 256, 128>}]} {
    %c0 = arith.constant 0 : index
    %c0_0 = arith.constant 0 : index
    %0 = vector.load %arg5[%c0, %c0_0] : memref<32x128xbf16, #tpu.memory_space<vmem>>, vector<32x128xbf16>
    %c0_1 = arith.constant 0 : index
    %c0_2 = arith.constant 0 : index
    %1 = vector.load %arg6[%c0_1, %c0_2] : memref<1x128xf32, #tpu.memory_space<vmem>>, vector<1x128xf32>
    %c0_3 = arith.constant 0 : index
    %c0_4 = arith.constant 0 : index
    %2 = vector.load %arg1[%c0_3, %c0_4] : memref<256x32xbf16, #tpu.memory_space<vmem>>, vector<256x32xbf16>
    %cst = arith.constant dense<0.000000e+00> : vector<256x128xf32>
    %3 = tpu.matmul %2, %0, %cst {dimension_numbers = #tpu.dot_dimension_numbers<[1], [0], [0], [1], [0, 0, 1, 1], [], []>} : vector<256x32xbf16>, vector<32x128xbf16>, vector<256x128xf32> -> vector<256x128xf32>
    %4 = vector.broadcast %1 : vector<1x128xf32> to vector<256x128xf32>
    %5 = arith.addf %3, %4 : vector<256x128xf32>
    %cst_5 = arith.constant 0.000000e+00 : f32
    %6 = vector.broadcast %cst_5 : f32 to vector<256x128xf32>
    %7 = arith.cmpf oge, %5, %6 : vector<256x128xf32>
    %cst_6 = arith.constant 0.00999999977 : f32
    %8 = vector.broadcast %cst_6 : f32 to vector<256x128xf32>
    %9 = arith.mulf %8, %5 : vector<256x128xf32>
    %10 = arith.select %7, %5, %9 : vector<256x128xi1>, vector<256x128xf32>
    %c0_7 = arith.constant 0 : index
    %c0_8 = arith.constant 0 : index
    %11 = vector.load %arg2[%c0_7, %c0_8] : memref<256x32xbf16, #tpu.memory_space<vmem>>, vector<256x32xbf16>
    %cst_9 = arith.constant dense<0.000000e+00> : vector<256x128xf32>
    %12 = tpu.matmul %11, %0, %cst_9 {dimension_numbers = #tpu.dot_dimension_numbers<[1], [0], [0], [1], [0, 0, 1, 1], [], []>} : vector<256x32xbf16>, vector<32x128xbf16>, vector<256x128xf32> -> vector<256x128xf32>
    %13 = vector.broadcast %1 : vector<1x128xf32> to vector<256x128xf32>
    %14 = arith.addf %12, %13 : vector<256x128xf32>
    %cst_10 = arith.constant 0.000000e+00 : f32
    %15 = vector.broadcast %cst_10 : f32 to vector<256x128xf32>
    %16 = arith.cmpf oge, %14, %15 : vector<256x128xf32>
    %cst_11 = arith.constant 0.00999999977 : f32
    %17 = vector.broadcast %cst_11 : f32 to vector<256x128xf32>
    %18 = arith.mulf %17, %14 : vector<256x128xf32>
    %19 = arith.select %16, %14, %18 : vector<256x128xi1>, vector<256x128xf32>
    %20 = arith.maximumf %10, %19 : vector<256x128xf32>
    %c0_12 = arith.constant 0 : index
    %c0_13 = arith.constant 0 : index
    %21 = vector.load %arg3[%c0_12, %c0_13] : memref<256x32xbf16, #tpu.memory_space<vmem>>, vector<256x32xbf16>
    %cst_14 = arith.constant dense<0.000000e+00> : vector<256x128xf32>
    %22 = tpu.matmul %21, %0, %cst_14 {dimension_numbers = #tpu.dot_dimension_numbers<[1], [0], [0], [1], [0, 0, 1, 1], [], []>} : vector<256x32xbf16>, vector<32x128xbf16>, vector<256x128xf32> -> vector<256x128xf32>
    %23 = vector.broadcast %1 : vector<1x128xf32> to vector<256x128xf32>
    %24 = arith.addf %22, %23 : vector<256x128xf32>
    %cst_15 = arith.constant 0.000000e+00 : f32
    %25 = vector.broadcast %cst_15 : f32 to vector<256x128xf32>
    %26 = arith.cmpf oge, %24, %25 : vector<256x128xf32>
    %cst_16 = arith.constant 0.00999999977 : f32
    %27 = vector.broadcast %cst_16 : f32 to vector<256x128xf32>
    %28 = arith.mulf %27, %24 : vector<256x128xf32>
    %29 = arith.select %26, %24, %28 : vector<256x128xi1>, vector<256x128xf32>
    %c0_17 = arith.constant 0 : index
    %c0_18 = arith.constant 0 : index
    %30 = vector.load %arg4[%c0_17, %c0_18] : memref<256x32xbf16, #tpu.memory_space<vmem>>, vector<256x32xbf16>
    %cst_19 = arith.constant dense<0.000000e+00> : vector<256x128xf32>
    %31 = tpu.matmul %30, %0, %cst_19 {dimension_numbers = #tpu.dot_dimension_numbers<[1], [0], [0], [1], [0, 0, 1, 1], [], []>} : vector<256x32xbf16>, vector<32x128xbf16>, vector<256x128xf32> -> vector<256x128xf32>
    %32 = vector.broadcast %1 : vector<1x128xf32> to vector<256x128xf32>
    %33 = arith.addf %31, %32 : vector<256x128xf32>
    %cst_20 = arith.constant 0.000000e+00 : f32
    %34 = vector.broadcast %cst_20 : f32 to vector<256x128xf32>
    %35 = arith.cmpf oge, %33, %34 : vector<256x128xf32>
    %cst_21 = arith.constant 0.00999999977 : f32
    %36 = vector.broadcast %cst_21 : f32 to vector<256x128xf32>
    %37 = arith.mulf %36, %33 : vector<256x128xf32>
    %38 = arith.select %35, %33, %37 : vector<256x128xi1>, vector<256x128xf32>
    %39 = arith.maximumf %29, %38 : vector<256x128xf32>
    %40 = arith.maximumf %20, %39 : vector<256x128xf32>
    %41 = arith.truncf %40 : vector<256x128xf32> to vector<256x128xbf16>
    %c0_22 = arith.constant 0 : index
    %c0_23 = arith.constant 0 : index
    %42 = vector.load %arg7[%c0_22, %c0_23] : memref<256x128xbf16, #tpu.memory_space<vmem>>, vector<256x128xbf16>
    tpu.vector_store %arg7[%c0_22, %c0_23], %41 {strides = array<i32>} : memref<256x128xbf16, #tpu.memory_space<vmem>>, vector<256x128xbf16>,
    return
  }
  func.func @transform_0(%arg0: i32) -> (i32, i32) {
    %c0_i32 = arith.constant 0 : i32
    %c0_i32_0 = arith.constant 0 : i32
    return %arg0, %c0_i32 : i32, i32
  }
  func.func @transform_1(%arg0: i32) -> (i32, i32) {
    %c0_i32 = arith.constant 0 : i32
    %c0_i32_0 = arith.constant 0 : i32
    return %arg0, %c0_i32 : i32, i32
  }
  func.func @transform_2(%arg0: i32) -> (i32, i32) {
    %c0_i32 = arith.constant 0 : i32
    %c0_i32_0 = arith.constant 0 : i32
    return %arg0, %c0_i32 : i32, i32
  }
  func.func @transform_3(%arg0: i32) -> (i32, i32) {
    %c0_i32 = arith.constant 0 : i32
    %c0_i32_0 = arith.constant 0 : i32
    return %arg0, %c0_i32 : i32, i32
  }
  func.func @transform_4(%arg0: i32) -> (i32, i32) {
    %c0_i32 = arith.constant 0 : i32
    %c0_i32_0 = arith.constant 0 : i32
    %c0_i32_1 = arith.constant 0 : i32
    return %c0_i32, %c0_i32_0 : i32, i32
  }
  func.func @transform_5(%arg0: i32) -> (i32, i32) {
    %c0_i32 = arith.constant 0 : i32
    %c0_i32_0 = arith.constant 0 : i32
    %c0_i32_1 = arith.constant 0 : i32
    return %c0_i32, %c0_i32_0 : i32, i32
  }
  func.func @transform_6(%arg0: i32) -> (i32, i32) {
    %c0_i32 = arith.constant 0 : i32
    %c0_i32_0 = arith.constant 0 : i32
    return %arg0, %c0_i32 : i32, i32
  }
}

module attributes {stable_mosaic.version = 11 : i64} {
  func.func @_conv_pool_kernel(%arg0: i32, %arg1: memref<64x288xbf16, #tpu.memory_space<vmem>>, %arg2: memref<64x288xbf16, #tpu.memory_space<vmem>>, %arg3: memref<64x288xbf16, #tpu.memory_space<vmem>>, %arg4: memref<64x288xbf16, #tpu.memory_space<vmem>>, %arg5: memref<288x128xbf16, #tpu.memory_space<vmem>>, %arg6: memref<1x128xf32, #tpu.memory_space<vmem>>, %arg7: memref<64x128xbf16, #tpu.memory_space<vmem>>) attributes {dimension_semantics = [#tpu.dimension_semantics<parallel>], iteration_bounds = array<i64: 2>, scalar_prefetch = 0 : i64, scratch_operands = 0 : i64, tpu.core_type = #tpu.core_type<tc>, window_params = [{transform_indices = @transform_0, window_bounds = array<i64: 64, 288>}, {transform_indices = @transform_1, window_bounds = array<i64: 64, 288>}, {transform_indices = @transform_2, window_bounds = array<i64: 64, 288>}, {transform_indices = @transform_3, window_bounds = array<i64: 64, 288>}, {pipeline_mode = #tpu.pipeline_mode<synchronous>, transform_indices = @transform_4, window_bounds = array<i64: 288, 128>}, {pipeline_mode = #tpu.pipeline_mode<synchronous>, transform_indices = @transform_5, window_bounds = array<i64: 1, 128>}, {transform_indices = @transform_6, window_bounds = array<i64: 64, 128>}]} {
    %c0 = arith.constant 0 : index
    %c0_0 = arith.constant 0 : index
    %0 = vector.load %arg5[%c0, %c0_0] : memref<288x128xbf16, #tpu.memory_space<vmem>>, vector<288x128xbf16>
    %c0_1 = arith.constant 0 : index
    %c0_2 = arith.constant 0 : index
    %1 = vector.load %arg6[%c0_1, %c0_2] : memref<1x128xf32, #tpu.memory_space<vmem>>, vector<1x128xf32>
    %c0_3 = arith.constant 0 : index
    %c0_4 = arith.constant 0 : index
    %2 = vector.load %arg1[%c0_3, %c0_4] : memref<64x288xbf16, #tpu.memory_space<vmem>>, vector<64x288xbf16>
    %cst = arith.constant dense<0.000000e+00> : vector<64x128xf32>
    %3 = tpu.matmul %2, %0, %cst {dimension_numbers = #tpu.dot_dimension_numbers<[1], [0], [0], [1], [0, 0, 1, 1], [], []>} : vector<64x288xbf16>, vector<288x128xbf16>, vector<64x128xf32> -> vector<64x128xf32>
    %4 = vector.broadcast %1 : vector<1x128xf32> to vector<64x128xf32>
    %5 = arith.addf %3, %4 : vector<64x128xf32>
    %cst_5 = arith.constant 0.000000e+00 : f32
    %6 = vector.broadcast %cst_5 : f32 to vector<64x128xf32>
    %7 = arith.cmpf oge, %5, %6 : vector<64x128xf32>
    %cst_6 = arith.constant 0.00999999977 : f32
    %8 = vector.broadcast %cst_6 : f32 to vector<64x128xf32>
    %9 = arith.mulf %8, %5 : vector<64x128xf32>
    %10 = arith.select %7, %5, %9 : vector<64x128xi1>, vector<64x128xf32>
    %c0_7 = arith.constant 0 : index
    %c0_8 = arith.constant 0 : index
    %11 = vector.load %arg2[%c0_7, %c0_8] : memref<64x288xbf16, #tpu.memory_space<vmem>>, vector<64x288xbf16>
    %cst_9 = arith.constant dense<0.000000e+00> : vector<64x128xf32>
    %12 = tpu.matmul %11, %0, %cst_9 {dimension_numbers = #tpu.dot_dimension_numbers<[1], [0], [0], [1], [0, 0, 1, 1], [], []>} : vector<64x288xbf16>, vector<288x128xbf16>, vector<64x128xf32> -> vector<64x128xf32>
    %13 = vector.broadcast %1 : vector<1x128xf32> to vector<64x128xf32>
    %14 = arith.addf %12, %13 : vector<64x128xf32>
    %cst_10 = arith.constant 0.000000e+00 : f32
    %15 = vector.broadcast %cst_10 : f32 to vector<64x128xf32>
    %16 = arith.cmpf oge, %14, %15 : vector<64x128xf32>
    %cst_11 = arith.constant 0.00999999977 : f32
    %17 = vector.broadcast %cst_11 : f32 to vector<64x128xf32>
    %18 = arith.mulf %17, %14 : vector<64x128xf32>
    %19 = arith.select %16, %14, %18 : vector<64x128xi1>, vector<64x128xf32>
    %20 = arith.maximumf %10, %19 : vector<64x128xf32>
    %c0_12 = arith.constant 0 : index
    %c0_13 = arith.constant 0 : index
    %21 = vector.load %arg3[%c0_12, %c0_13] : memref<64x288xbf16, #tpu.memory_space<vmem>>, vector<64x288xbf16>
    %cst_14 = arith.constant dense<0.000000e+00> : vector<64x128xf32>
    %22 = tpu.matmul %21, %0, %cst_14 {dimension_numbers = #tpu.dot_dimension_numbers<[1], [0], [0], [1], [0, 0, 1, 1], [], []>} : vector<64x288xbf16>, vector<288x128xbf16>, vector<64x128xf32> -> vector<64x128xf32>
    %23 = vector.broadcast %1 : vector<1x128xf32> to vector<64x128xf32>
    %24 = arith.addf %22, %23 : vector<64x128xf32>
    %cst_15 = arith.constant 0.000000e+00 : f32
    %25 = vector.broadcast %cst_15 : f32 to vector<64x128xf32>
    %26 = arith.cmpf oge, %24, %25 : vector<64x128xf32>
    %cst_16 = arith.constant 0.00999999977 : f32
    %27 = vector.broadcast %cst_16 : f32 to vector<64x128xf32>
    %28 = arith.mulf %27, %24 : vector<64x128xf32>
    %29 = arith.select %26, %24, %28 : vector<64x128xi1>, vector<64x128xf32>
    %c0_17 = arith.constant 0 : index
    %c0_18 = arith.constant 0 : index
    %30 = vector.load %arg4[%c0_17, %c0_18] : memref<64x288xbf16, #tpu.memory_space<vmem>>, vector<64x288xbf16>
    %cst_19 = arith.constant dense<0.000000e+00> : vector<64x128xf32>
    %31 = tpu.matmul %30, %0, %cst_19 {dimension_numbers = #tpu.dot_dimension_numbers<[1], [0], [0], [1], [0, 0, 1, 1], [], []>} : vector<64x288xbf16>, vector<288x128xbf16>, vector<64x128xf32> -> vector<64x128xf32>
    %32 = vector.broadcast %1 : vector<1x128xf32> to vector<64x128xf32>
    %33 = arith.addf %31, %32 : vector<64x128xf32>
    %cst_20 = arith.constant 0.000000e+00 : f32
    %34 = vector.broadcast %cst_20 : f32 to vector<64x128xf32>
    %35 = arith.cmpf oge, %33, %34 : vector<64x128xf32>
    %cst_21 = arith.constant 0.00999999977 : f32
    %36 = vector.broadcast %cst_21 : f32 to vector<64x128xf32>
    %37 = arith.mulf %36, %33 : vector<64x128xf32>
    %38 = arith.select %35, %33, %37 : vector<64x128xi1>, vector<64x128xf32>
    %39 = arith.maximumf %29, %38 : vector<64x128xf32>
    %40 = arith.maximumf %20, %39 : vector<64x128xf32>
    %41 = arith.truncf %40 : vector<64x128xf32> to vector<64x128xbf16>
    %c0_22 = arith.constant 0 : index
    %c0_23 = arith.constant 0 : index
    %42 = vector.load %arg7[%c0_22, %c0_23] : memref<64x128xbf16, #tpu.memory_space<vmem>>, vector<64x128xbf16>
    tpu.vector_store %arg7[%c0_22, %c0_23], %41 {strides = array<i32>} : memref<64x128xbf16, #tpu.memory_space<vmem>>, vector<64x128xbf16>,
    return
  }
  func.func @transform_0(%arg0: i32) -> (i32, i32) {
    %c0_i32 = arith.constant 0 : i32
    %c0_i32_0 = arith.constant 0 : i32
    return %arg0, %c0_i32 : i32, i32
  }
  func.func @transform_1(%arg0: i32) -> (i32, i32) {
    %c0_i32 = arith.constant 0 : i32
    %c0_i32_0 = arith.constant 0 : i32
    return %arg0, %c0_i32 : i32, i32
  }
  func.func @transform_2(%arg0: i32) -> (i32, i32) {
    %c0_i32 = arith.constant 0 : i32
    %c0_i32_0 = arith.constant 0 : i32
    return %arg0, %c0_i32 : i32, i32
  }
  func.func @transform_3(%arg0: i32) -> (i32, i32) {
    %c0_i32 = arith.constant 0 : i32
    %c0_i32_0 = arith.constant 0 : i32
    return %arg0, %c0_i32 : i32, i32
  }
  func.func @transform_4(%arg0: i32) -> (i32, i32) {
    %c0_i32 = arith.constant 0 : i32
    %c0_i32_0 = arith.constant 0 : i32
    %c0_i32_1 = arith.constant 0 : i32
    return %c0_i32, %c0_i32_0 : i32, i32
  }
  func.func @transform_5(%arg0: i32) -> (i32, i32) {
    %c0_i32 = arith.constant 0 : i32
    %c0_i32_0 = arith.constant 0 : i32
    %c0_i32_1 = arith.constant 0 : i32
    return %c0_i32, %c0_i32_0 : i32, i32
  }
  func.func @transform_6(%arg0: i32) -> (i32, i32) {
    %c0_i32 = arith.constant 0 : i32
    %c0_i32_0 = arith.constant 0 : i32
    return %arg0, %c0_i32 : i32, i32
  }
}

module attributes {stable_mosaic.version = 11 : i64} {
  func.func @_matmul_bias_kernel(%arg0: i32, %arg1: memref<64x576xbf16, #tpu.memory_space<vmem>>, %arg2: memref<576x128xbf16, #tpu.memory_space<vmem>>, %arg3: memref<1x128xf32, #tpu.memory_space<vmem>>, %arg4: memref<64x128xbf16, #tpu.memory_space<vmem>>) attributes {dimension_semantics = [#tpu.dimension_semantics<parallel>], iteration_bounds = array<i64: 2>, scalar_prefetch = 0 : i64, scratch_operands = 0 : i64, tpu.core_type = #tpu.core_type<tc>, window_params = [{transform_indices = @transform_0, window_bounds = array<i64: 64, 576>}, {pipeline_mode = #tpu.pipeline_mode<synchronous>, transform_indices = @transform_1, window_bounds = array<i64: 576, 128>}, {pipeline_mode = #tpu.pipeline_mode<synchronous>, transform_indices = @transform_2, window_bounds = array<i64: 1, 128>}, {transform_indices = @transform_3, window_bounds = array<i64: 64, 128>}]} {
    %c0 = arith.constant 0 : index
    %c0_0 = arith.constant 0 : index
    %0 = vector.load %arg1[%c0, %c0_0] : memref<64x576xbf16, #tpu.memory_space<vmem>>, vector<64x576xbf16>
    %c0_1 = arith.constant 0 : index
    %c0_2 = arith.constant 0 : index
    %1 = vector.load %arg2[%c0_1, %c0_2] : memref<576x128xbf16, #tpu.memory_space<vmem>>, vector<576x128xbf16>
    %cst = arith.constant dense<0.000000e+00> : vector<64x128xf32>
    %2 = tpu.matmul %0, %1, %cst {dimension_numbers = #tpu.dot_dimension_numbers<[1], [0], [0], [1], [0, 0, 1, 1], [], []>} : vector<64x576xbf16>, vector<576x128xbf16>, vector<64x128xf32> -> vector<64x128xf32>
    %c0_3 = arith.constant 0 : index
    %c0_4 = arith.constant 0 : index
    %3 = vector.load %arg3[%c0_3, %c0_4] : memref<1x128xf32, #tpu.memory_space<vmem>>, vector<1x128xf32>
    %4 = vector.broadcast %3 : vector<1x128xf32> to vector<64x128xf32>
    %5 = arith.addf %2, %4 : vector<64x128xf32>
    %cst_5 = arith.constant 0.000000e+00 : f32
    %6 = vector.broadcast %cst_5 : f32 to vector<64x128xf32>
    %7 = arith.cmpf oge, %5, %6 : vector<64x128xf32>
    %cst_6 = arith.constant 0.00999999977 : f32
    %8 = vector.broadcast %cst_6 : f32 to vector<64x128xf32>
    %9 = arith.mulf %8, %5 : vector<64x128xf32>
    %10 = arith.select %7, %5, %9 : vector<64x128xi1>, vector<64x128xf32>
    %11 = arith.truncf %10 : vector<64x128xf32> to vector<64x128xbf16>
    %c0_7 = arith.constant 0 : index
    %c0_8 = arith.constant 0 : index
    %12 = vector.load %arg4[%c0_7, %c0_8] : memref<64x128xbf16, #tpu.memory_space<vmem>>, vector<64x128xbf16>
    tpu.vector_store %arg4[%c0_7, %c0_8], %11 {strides = array<i32>} : memref<64x128xbf16, #tpu.memory_space<vmem>>, vector<64x128xbf16>,
    return
  }
  func.func @transform_0(%arg0: i32) -> (i32, i32) {
    %c0_i32 = arith.constant 0 : i32
    %c0_i32_0 = arith.constant 0 : i32
    return %arg0, %c0_i32 : i32, i32
  }
  func.func @transform_1(%arg0: i32) -> (i32, i32) {
    %c0_i32 = arith.constant 0 : i32
    %c0_i32_0 = arith.constant 0 : i32
    %c0_i32_1 = arith.constant 0 : i32
    return %c0_i32, %c0_i32_0 : i32, i32
  }
  func.func @transform_2(%arg0: i32) -> (i32, i32) {
    %c0_i32 = arith.constant 0 : i32
    %c0_i32_0 = arith.constant 0 : i32
    %c0_i32_1 = arith.constant 0 : i32
    return %c0_i32, %c0_i32_0 : i32, i32
  }
  func.func @transform_3(%arg0: i32) -> (i32, i32) {
    %c0_i32 = arith.constant 0 : i32
    %c0_i32_0 = arith.constant 0 : i32
    return %arg0, %c0_i32 : i32, i32
  }
}

module attributes {stable_mosaic.version = 11 : i64} {
  func.func @_matmul_bias_kernel(%arg0: i32, %arg1: memref<8x4096xbf16, #tpu.memory_space<vmem>>, %arg2: memref<4096x128xbf16, #tpu.memory_space<vmem>>, %arg3: memref<1x128xf32, #tpu.memory_space<vmem>>, %arg4: memref<8x128xf32, #tpu.memory_space<vmem>>) attributes {dimension_semantics = [#tpu.dimension_semantics<parallel>], iteration_bounds = array<i64: 1>, scalar_prefetch = 0 : i64, scratch_operands = 0 : i64, tpu.core_type = #tpu.core_type<tc>, window_params = [{transform_indices = @transform_0, window_bounds = array<i64: 8, 4096>}, {pipeline_mode = #tpu.pipeline_mode<synchronous>, transform_indices = @transform_1, window_bounds = array<i64: 4096, 128>}, {pipeline_mode = #tpu.pipeline_mode<synchronous>, transform_indices = @transform_2, window_bounds = array<i64: 1, 128>}, {transform_indices = @transform_3, window_bounds = array<i64: 8, 128>}]} {
    %c0 = arith.constant 0 : index
    %c0_0 = arith.constant 0 : index
    %0 = vector.load %arg1[%c0, %c0_0] : memref<8x4096xbf16, #tpu.memory_space<vmem>>, vector<8x4096xbf16>
    %c0_1 = arith.constant 0 : index
    %c0_2 = arith.constant 0 : index
    %1 = vector.load %arg2[%c0_1, %c0_2] : memref<4096x128xbf16, #tpu.memory_space<vmem>>, vector<4096x128xbf16>
    %cst = arith.constant dense<0.000000e+00> : vector<8x128xf32>
    %2 = tpu.matmul %0, %1, %cst {dimension_numbers = #tpu.dot_dimension_numbers<[1], [0], [0], [1], [0, 0, 1, 1], [], []>} : vector<8x4096xbf16>, vector<4096x128xbf16>, vector<8x128xf32> -> vector<8x128xf32>
    %c0_3 = arith.constant 0 : index
    %c0_4 = arith.constant 0 : index
    %3 = vector.load %arg3[%c0_3, %c0_4] : memref<1x128xf32, #tpu.memory_space<vmem>>, vector<1x128xf32>
    %4 = vector.broadcast %3 : vector<1x128xf32> to vector<8x128xf32>
    %5 = arith.addf %2, %4 : vector<8x128xf32>
    %c0_5 = arith.constant 0 : index
    %c0_6 = arith.constant 0 : index
    %6 = vector.load %arg4[%c0_5, %c0_6] : memref<8x128xf32, #tpu.memory_space<vmem>>, vector<8x128xf32>
    tpu.vector_store %arg4[%c0_5, %c0_6], %5 {strides = array<i32>} : memref<8x128xf32, #tpu.memory_space<vmem>>, vector<8x128xf32>,
    return
  }
  func.func @transform_0(%arg0: i32) -> (i32, i32) {
    %c0_i32 = arith.constant 0 : i32
    %c0_i32_0 = arith.constant 0 : i32
    return %arg0, %c0_i32 : i32, i32
  }
  func.func @transform_1(%arg0: i32) -> (i32, i32) {
    %c0_i32 = arith.constant 0 : i32
    %c0_i32_0 = arith.constant 0 : i32
    %c0_i32_1 = arith.constant 0 : i32
    return %c0_i32, %c0_i32_0 : i32, i32
  }
  func.func @transform_2(%arg0: i32) -> (i32, i32) {
    %c0_i32 = arith.constant 0 : i32
    %c0_i32_0 = arith.constant 0 : i32
    %c0_i32_1 = arith.constant 0 : i32
    return %c0_i32, %c0_i32_0 : i32, i32
  }
  func.func @transform_3(%arg0: i32) -> (i32, i32) {
    %c0_i32 = arith.constant 0 : i32
    %c0_i32_0 = arith.constant 0 : i32
    return %arg0, %c0_i32 : i32, i32
  }
}

</mosaic_0001>

<bundles_post_ra>
// kernel: simple_cnn_forward.4
= control target key start
LH: loop header
LB: loop body
LE: loop exit
PB: predicated region body
PF: predicated region fallthrough
CT: control target
= control target key end

     0   :  { %s3003_s21 = smov 0   ;;  %s3715_s0 = inlined_call_operand.vmem [shape: bf16[512,32], index: 0, kind: input, shape index: {}]   ;;  %s3716_s1 = inlined_call_operand.vmem [shape: bf16[512,32], index: 1, kind: input, shape index: {}]   ;;  %s3717_s2 = inlined_call_operand.vmem [shape: bf16[512,32], index: 2, kind: input, shape index: {}]   ;;  %s3718_s3 = inlined_call_operand.vmem [shape: bf16[512,32], index: 3, kind: input, shape index: {}]   ;;  %s3719_s4 = inlined_call_operand.vmem [shape: bf16[32,128], index: 4, kind: input, shape index: {}]   ;;  %s3720_s5 = inlined_call_operand.vmem [shape: f32[1,128], index: 5, kind: input, shape index: {}]   ;;  %s3721_s6 = inlined_call_operand.vmem [shape: bf16[512,128], index: 6, kind: output, shape index: {}]  }
   0x1 LB: > { %s2362_s22 = sadd.s32 4294967295, %s2966_s21   ;;  %p2366_p0 = scmp.ge.s32.totalorder %s2966_s21, 1  ;;  %s2966_s21 = sphi %s3003_s21, %s16_s21  }
   0x2   : > { %p246_p1 = scmp.lt.s32.totalorder %s2966_s21, 3 }
   0x4   : > { %p247_p2 = pnand %p2366_p0, %p246_p1 }
   0x6   : > { %250 = sbr.rel (%p247_p2) target bundleno = 378 (0x17a), region = 44 }
   0xb   : > { %v2893_v0 = vld [vmem:[%s3719_s4 + $0x8] sm:$0xff]   ;;  %s2367_s25 = sshll.u32 %s2362_s22, 5  ;;  %v2894_v1 = vld [vmem:[%s3719_s4] sm:$0xff]   ;;  %vm457_vm0 = vcmask 261120  }
   0xc   : > { %p292_p3 = scmp.lt.s32.totalorder %s2367_s25, 63  ;;  %2741 = vmatprep.subr.bf16.mxu0 %v2893_v0  ;;  %2777 = vmatprep.subr.bf16.mxu1 %v2893_v0 }
   0xd   : > { %2742 = vmatpush3.bf16.msra.mxu0 %v2893_v0  ;;  %2778 = vmatpush3.bf16.msra.mxu1 %v2893_v0 }
   0xe   : > { %s3857_s25 = smov (!%p292_p3, %s2367_s25), 63  ;;  %2743 = vmatprep.subr.bf16.mxu0 %v2894_v1  ;;  %2779 = vmatprep.subr.bf16.mxu1 %v2894_v1 }
   0xf   : > { %s3017_s28 = sshll.u32 %s3857_s25, 2 }
  0x10   : > { %s3023_s7 = scalar_lea.vmem %s3715_s0, %s3017_s28  ;;  %s3029_s10 = scalar_lea.vmem %s3716_s1, %s3017_s28 }
  0x11   : > { %2744 = vmatpush3.bf16.msra.mxu0 %v2894_v1  ;;  %2780 = vmatpush3.bf16.msra.mxu1 %v2894_v1  ;;  %v2895_v2 = vld [vmem:[%s3023_s7] sm:$0xff]   ;;  %v2897_v4 = vld [vmem:[%s3023_s7 + $0x8] sm:$0xff]   ;;  %v2899_v6 = vld [vmem:[%s3023_s7 + $0x10] sm:$0xff]   ;;  %s3072_s13 = scalar_lea.vmem %s3717_s2, %s3017_s28  ;;  %s3079_s16 = scalar_lea.vmem %s3718_s3, %s3017_s28 }
  0x12   : > { %v2896_v3 = vld [vmem:[%s3029_s10] sm:$0xff]   ;;  %2813 = vmatprep.subr.bf16.mxu0 %v2893_v0  ;;  %2849 = vmatprep.subr.bf16.mxu1 %v2893_v0  ;;  %v2898_v5 = vld [vmem:[%s3029_s10 + $0x8] sm:$0xff]   ;;  %v2900_v7 = vld [vmem:[%s3029_s10 + $0x10] sm:$0xff]   ;;  %s3469_s22 = scalar_lea.vmem %s3721_s6, %s3017_s28 }
  0x13   : > { %2745 = vmatprep.mubr.msk.bf16.mxu0 %vm457_vm0, %v2895_v2  ;;  %2781 = vmatprep.mubr.msk.bf16.mxu1 %vm457_vm0, %v2896_v3  ;;  %v2901_v8 = vld [vmem:[%s3023_s7 + $0x18] sm:$0xff]   ;;  %v2903_v10 = vld [vmem:[%s3023_s7 + $0x20] sm:$0xff]   ;;  %v2905_v12 = vld [vmem:[%s3023_s7 + $0x28] sm:$0xff]  }
  0x14   : > { %2746 = vmatmul.mubr.msk.bf16.vlgmr.msra.gmra.mxu0 %vm457_vm0, %v2897_v4  ;;  %2782 = vmatmul.mubr.msk.bf16.vlgmr.msra.gmra.mxu1 %vm457_vm0, %v2898_v5  ;;  %v2902_v9 = vld [vmem:[%s3029_s10 + $0x18] sm:$0xff]   ;;  %v2904_v11 = vld [vmem:[%s3029_s10 + $0x20] sm:$0xff]   ;;  %v2906_v13 = vld [vmem:[%s3029_s10 + $0x28] sm:$0xff]  }
  0x15   : > { %2814 = vmatpush3.bf16.msra.mxu0 %v2893_v0  ;;  %2850 = vmatpush3.bf16.msra.mxu1 %v2893_v0  ;;  %v2907_v14 = vld [vmem:[%s3023_s7 + $0x30] sm:$0xff]   ;;  %v2909_v16 = vld [vmem:[%s3023_s7 + $0x38] sm:$0xff]   ;;  %v2911_v18 = vld [vmem:[%s3023_s7 + $0x40] sm:$0xff]  }
  0x16   : > { %2749 = vmatprep.mubr.msk.bf16.mxu0 %vm457_vm0, %v2899_v6  ;;  %2785 = vmatprep.mubr.msk.bf16.mxu1 %vm457_vm0, %v2900_v7  ;;  %v2908_v15 = vld [vmem:[%s3029_s10 + $0x30] sm:$0xff]   ;;  %v2910_v17 = vld [vmem:[%s3029_s10 + $0x38] sm:$0xff]   ;;  %v2912_v19 = vld [vmem:[%s3029_s10 + $0x40] sm:$0xff]  }
  0x17   : > { %2815 = vmatprep.subr.bf16.mxu0 %v2894_v1  ;;  %2851 = vmatprep.subr.bf16.mxu1 %v2894_v1  ;;  %v2913_v20 = vld [vmem:[%s3023_s7 + $0x48] sm:$0xff]   ;;  %v2915_v22 = vld [vmem:[%s3023_s7 + $0x50] sm:$0xff]   ;;  %v2917_v24 = vld [vmem:[%s3023_s7 + $0x58] sm:$0xff]  }
  0x18   : > { %v2914_v21 = vld [vmem:[%s3029_s10 + $0x48] sm:$0xff]   ;;  %v2916_v23 = vld [vmem:[%s3029_s10 + $0x50] sm:$0xff]   ;;  %v2918_v25 = vld [vmem:[%s3029_s10 + $0x58] sm:$0xff]  }
  0x19   : > { %2816 = vmatpush3.bf16.msra.mxu0 %v2894_v1  ;;  %2852 = vmatpush3.bf16.msra.mxu1 %v2894_v1  ;;  %v2919_v26 = vld [vmem:[%s3023_s7 + $0x60] sm:$0xff]   ;;  %v2921_v28 = vld [vmem:[%s3023_s7 + $0x68] sm:$0xff]   ;;  %v2923_v30 = vld [vmem:[%s3023_s7 + $0x70] sm:$0xff]  }
  0x1a   : > { %v2920_v27 = vld [vmem:[%s3029_s10 + $0x60] sm:$0xff]   ;;  %v2922_v29 = vld [vmem:[%s3029_s10 + $0x68] sm:$0xff]   ;;  %v2924_v31 = vld [vmem:[%s3029_s10 + $0x70] sm:$0xff]  }
  0x1b   : > { %v2925_v32 = vld [vmem:[%s3023_s7 + $0x78] sm:$0xff]   ;;  %v2927_v34 = vld [vmem:[%s3072_s13] sm:$0xff]   ;;  %v2929_v36 = vld [vmem:[%s3072_s13 + $0x8] sm:$0xff]  }
  0x1c   : > { %2750 = vmatmul.mubr.msk.bf16.gmra.mxu0 %vm457_vm0, %v2901_v8  ;;  %2786 = vmatmul.mubr.msk.bf16.gmra.mxu1 %vm457_vm0, %v2902_v9  ;;  %v2926_v33 = vld [vmem:[%s3029_s10 + $0x78] sm:$0xff]   ;;  %v2928_v35 = vld [vmem:[%s3079_s16] sm:$0xff]   ;;  %v2930_v37 = vld [vmem:[%s3079_s16 + $0x8] sm:$0xff]  }
  0x1d   : > { %2753 = vmatprep.mubr.msk.bf16.mxu0 %vm457_vm0, %v2903_v10  ;;  %2789 = vmatprep.mubr.msk.bf16.mxu1 %vm457_vm0, %v2904_v11  ;;  %v2931_v38 = vld [vmem:[%s3072_s13 + $0x10] sm:$0xff]   ;;  %v2933_v40 = vld [vmem:[%s3072_s13 + $0x18] sm:$0xff]   ;;  %v2935_v42 = vld [vmem:[%s3072_s13 + $0x20] sm:$0xff]  }
  0x1e   : > { %v2932_v39 = vld [vmem:[%s3079_s16 + $0x10] sm:$0xff]   ;;  %v2934_v41 = vld [vmem:[%s3079_s16 + $0x18] sm:$0xff]   ;;  %v2936_v43 = vld [vmem:[%s3079_s16 + $0x20] sm:$0xff]  }
  0x1f   : > { %v2937_v44 = vld [vmem:[%s3072_s13 + $0x28] sm:$0xff]   ;;  %v2939_v46 = vld [vmem:[%s3072_s13 + $0x30] sm:$0xff]   ;;  %v2941_v48 = vld [vmem:[%s3072_s13 + $0x38] sm:$0xff]  }
  0x20   : > { %v2938_v45 = vld [vmem:[%s3079_s16 + $0x28] sm:$0xff]   ;;  %v2940_v47 = vld [vmem:[%s3079_s16 + $0x30] sm:$0xff]   ;;  %v2942_v49 = vld [vmem:[%s3079_s16 + $0x38] sm:$0xff]  }
  0x21   : > { %v2943_v50 = vld [vmem:[%s3072_s13 + $0x40] sm:$0xff]   ;;  %v2945_v52 = vld [vmem:[%s3072_s13 + $0x48] sm:$0xff]   ;;  %v2947_v54 = vld [vmem:[%s3072_s13 + $0x50] sm:$0xff]  }
  0x22   : > { %v2944_v51 = vld [vmem:[%s3079_s16 + $0x40] sm:$0xff]   ;;  %v2946_v53 = vld [vmem:[%s3079_s16 + $0x48] sm:$0xff]   ;;  %v2948_v55 = vld [vmem:[%s3079_s16 + $0x50] sm:$0xff]  }
  0x23   : > { %v2949_v56 = vld [vmem:[%s3072_s13 + $0x58] sm:$0xff]   ;;  %v2951_v58 = vld [vmem:[%s3072_s13 + $0x60] sm:$0xff]   ;;  %v2953_v60 = vld [vmem:[%s3072_s13 + $0x68] sm:$0xff]  }
  0x24   : > { %2754 = vmatmul.mubr.msk.bf16.gmra.mxu0 %vm457_vm0, %v2905_v12  ;;  %2790 = vmatmul.mubr.msk.bf16.gmra.mxu1 %vm457_vm0, %v2906_v13  ;;  %v2950_v57 = vld [vmem:[%s3079_s16 + $0x58] sm:$0xff]   ;;  %v2952_v59 = vld [vmem:[%s3079_s16 + $0x60] sm:$0xff]   ;;  %v2954_v61 = vld [vmem:[%s3079_s16 + $0x68] sm:$0xff]  }
  0x25   : > { %2757 = vmatprep.mubr.msk.bf16.mxu0 %vm457_vm0, %v2907_v14  ;;  %2793 = vmatprep.mubr.msk.bf16.mxu1 %vm457_vm0, %v2908_v15  ;;  %v2955_v62 = vld [vmem:[%s3072_s13 + $0x70] sm:$0xff]   ;;  %v2957_v0 = vld [vmem:[%s3072_s13 + $0x78] sm:$0xff]   ;;  %v3174_v2 = vld [vmem:[%s3720_s5] ss:$0 sm:$0xff] }
  0x26   : > { %v2956_v63 = vld [vmem:[%s3079_s16 + $0x70] sm:$0xff]   ;;  %v2958_v1 = vld [vmem:[%s3079_s16 + $0x78] sm:$0xff]  }
  0x2c   : > { %2758 = vmatmul.mubr.msk.bf16.gmra.mxu0 %vm457_vm0, %v2909_v16  ;;  %2794 = vmatmul.mubr.msk.bf16.gmra.mxu1 %vm457_vm0, %v2910_v17 }
  0x2d   : > { %2761 = vmatprep.mubr.msk.bf16.mxu0 %vm457_vm0, %v2911_v18  ;;  %2797 = vmatprep.mubr.msk.bf16.mxu1 %vm457_vm0, %v2912_v19 }
  0x34   : > { %2762 = vmatmul.mubr.msk.bf16.gmra.mxu0 %vm457_vm0, %v2913_v20  ;;  %2798 = vmatmul.mubr.msk.bf16.gmra.mxu1 %vm457_vm0, %v2914_v21 }
  0x35   : > { %2765 = vmatprep.mubr.msk.bf16.mxu0 %vm457_vm0, %v2915_v22  ;;  %2801 = vmatprep.mubr.msk.bf16.mxu1 %vm457_vm0, %v2916_v23 }
  0x3c   : > { %2766 = vmatmul.mubr.msk.bf16.gmra.mxu0 %vm457_vm0, %v2917_v24  ;;  %2802 = vmatmul.mubr.msk.bf16.gmra.mxu1 %vm457_vm0, %v2918_v25 }
  0x3d   : > { %2769 = vmatprep.mubr.msk.bf16.mxu0 %vm457_vm0, %v2919_v26  ;;  %2805 = vmatprep.mubr.msk.bf16.mxu1 %vm457_vm0, %v2920_v27 }
  0x44   : > { %2770 = vmatmul.mubr.msk.bf16.gmra.mxu0 %vm457_vm0, %v2921_v28  ;;  %2806 = vmatmul.mubr.msk.bf16.gmra.mxu1 %vm457_vm0, %v2922_v29 }
  0x45   : > { %2773 = vmatprep.mubr.msk.bf16.mxu0 %vm457_vm0, %v2923_v30  ;;  %2809 = vmatprep.mubr.msk.bf16.mxu1 %vm457_vm0, %v2924_v31 }
  0x4c   : > { %2774 = vmatmul.mubr.msk.bf16.gmra.mxu0 %vm457_vm0, %v2925_v32  ;;  %2810 = vmatmul.mubr.msk.bf16.gmra.mxu1 %vm457_vm0, %v2926_v33 }
  0x4d   : > { %2817 = vmatprep.mubr.msk.bf16.mxu0 %vm457_vm0, %v2927_v34  ;;  %2853 = vmatprep.mubr.msk.bf16.mxu1 %vm457_vm0, %v2928_v35 }
  0x54   : > { %2818 = vmatmul.mubr.msk.bf16.vlgmr.msra.gmra.mxu0 %vm457_vm0, %v2929_v36  ;;  %2854 = vmatmul.mubr.msk.bf16.vlgmr.msra.gmra.mxu1 %vm457_vm0, %v2930_v37 }
  0x55   : > { %2821 = vmatprep.mubr.msk.bf16.mxu0 %vm457_vm0, %v2931_v38  ;;  %2857 = vmatprep.mubr.msk.bf16.mxu1 %vm457_vm0, %v2932_v39 }
  0x5c   : > { %2822 = vmatmul.mubr.msk.bf16.gmra.mxu0 %vm457_vm0, %v2933_v40  ;;  %2858 = vmatmul.mubr.msk.bf16.gmra.mxu1 %vm457_vm0, %v2934_v41 }
  0x5d   : > { %2825 = vmatprep.mubr.msk.bf16.mxu0 %vm457_vm0, %v2935_v42  ;;  %2861 = vmatprep.mubr.msk.bf16.mxu1 %vm457_vm0, %v2936_v43 }
  0x64   : > { %2826 = vmatmul.mubr.msk.bf16.gmra.mxu0 %vm457_vm0, %v2937_v44  ;;  %2862 = vmatmul.mubr.msk.bf16.gmra.mxu1 %vm457_vm0, %v2938_v45 }
  0x65   : > { %2829 = vmatprep.mubr.msk.bf16.mxu0 %vm457_vm0, %v2939_v46  ;;  %2865 = vmatprep.mubr.msk.bf16.mxu1 %vm457_vm0, %v2940_v47 }
  0x6c   : > { %2830 = vmatmul.mubr.msk.bf16.gmra.mxu0 %vm457_vm0, %v2941_v48  ;;  %2866 = vmatmul.mubr.msk.bf16.gmra.mxu1 %vm457_vm0, %v2942_v49 }
  0x6d   : > { %2833 = vmatprep.mubr.msk.bf16.mxu0 %vm457_vm0, %v2943_v50  ;;  %2869 = vmatprep.mubr.msk.bf16.mxu1 %vm457_vm0, %v2944_v51 }
  0x74   : > { %2834 = vmatmul.mubr.msk.bf16.gmra.mxu0 %vm457_vm0, %v2945_v52  ;;  %2870 = vmatmul.mubr.msk.bf16.gmra.mxu1 %vm457_vm0, %v2946_v53 }
  0x75   : > { %2837 = vmatprep.mubr.msk.bf16.mxu0 %vm457_vm0, %v2947_v54  ;;  %2873 = vmatprep.mubr.msk.bf16.mxu1 %vm457_vm0, %v2948_v55 }
  0x7c   : > { %2838 = vmatmul.mubr.msk.bf16.gmra.mxu0 %vm457_vm0, %v2949_v56  ;;  %2874 = vmatmul.mubr.msk.bf16.gmra.mxu1 %vm457_vm0, %v2950_v57 }
  0x7d   : > { %2841 = vmatprep.mubr.msk.bf16.mxu0 %vm457_vm0, %v2951_v58  ;;  %2877 = vmatprep.mubr.msk.bf16.mxu1 %vm457_vm0, %v2952_v59 }
  0x84   : > { %2842 = vmatmul.mubr.msk.bf16.gmra.mxu0 %vm457_vm0, %v2953_v60  ;;  %2878 = vmatmul.mubr.msk.bf16.gmra.mxu1 %vm457_vm0, %v2954_v61 }
  0x85   : > { %2845 = vmatprep.mubr.msk.bf16.mxu0 %vm457_vm0, %v2955_v62  ;;  %2881 = vmatprep.mubr.msk.bf16.mxu1 %vm457_vm0, %v2956_v63 }
  0x8c   : > { %2846 = vmatmul.mubr.msk.bf16.gmra.mxu0 %vm457_vm0, %v2957_v0  ;;  %2882 = vmatmul.mubr.msk.bf16.gmra.mxu1 %vm457_vm0, %v2958_v1 }
  0xd4   : > { %v2747_v3 = vpop.f32.mrf.mxu0  ;;  %v2783_v5 = vpop.f32.mrf.mxu1 }
  0xd5   : > { %v549_v4 = vadd.f32 %v2747_v3, %v3174_v2  ;;  %v966_v6 = vadd.f32 %v2783_v5, %v3174_v2 }
  0xd6   : > { %v540_v7 = vpop.f32.mrf.mxu0  ;;  %v957_v10 = vpop.f32.mrf.mxu1 }
  0xd7   : > { %vm669_vm1 = vcmp.ge.f32.partialorder %v549_v4, 0.0  ;;  %v701_v8 = vmul.f32 0.01, %v549_v4  ;;  %v541_v9 = vadd.f32 %v3174_v2, %v540_v7  ;;  %vm1086_vm2 = vcmp.ge.f32.partialorder %v966_v6, 0.0 }
  0xd8   : > { %v1118_v11 = vmul.f32 0.01, %v966_v6  ;;  %v958_v12 = vadd.f32 %v3174_v2, %v957_v10  ;;  %v2748_v13 = vpop.f32.mrf.mxu0  ;;  %v2784_v17 = vpop.f32.mrf.mxu1 }
  0xd9   : > { %v3180_v14 = vsel %vm669_vm1, %v549_v4, %v701_v8  ;;  %vm667_vm3 = vcmp.ge.f32.partialorder %v541_v9, 0.0  ;;  %v699_v15 = vmul.f32 0.01, %v541_v9  ;;  %v552_v16 = vadd.f32 %v2748_v13, %v3174_v2 }
  0xda   : > { %v3183_v18 = vsel %vm1086_vm2, %v966_v6, %v1118_v11  ;;  %vm1084_vm4 = vcmp.ge.f32.partialorder %v958_v12, 0.0  ;;  %v1116_v19 = vmul.f32 0.01, %v958_v12  ;;  %v969_v20 = vadd.f32 %v2784_v17, %v3174_v2  ;;  %v543_v21 = vpop.f32.mrf.mxu0  ;;  %v960_v25 = vpop.f32.mrf.mxu1 }
  0xdb   : > { %v3188_v23 = vsel %vm667_vm3, %v541_v9, %v699_v15  ;;  %vm670_vm5 = vcmp.ge.f32.partialorder %v552_v16, 0.0  ;;  %v702_v24 = vmul.f32 0.01, %v552_v16  ;;  %v544_v28 = vadd.f32 %v3174_v2, %v543_v21 }
  0xdc   : > { %v3190_v26 = vsel %vm1084_vm4, %v958_v12, %v1116_v19  ;;  %vm1087_vm6 = vcmp.ge.f32.partialorder %v969_v20, 0.0  ;;  %v1119_v27 = vmul.f32 0.01, %v969_v20  ;;  %v2751_v29 = vpop.f32.mrf.mxu0  ;;  %v961_v32 = vadd.f32 %v3174_v2, %v960_v25  ;;  %v2787_v34 = vpop.f32.mrf.mxu1 }
  0xdd   : > { %v3195_v31 = vsel %vm670_vm5, %v552_v16, %v702_v24  ;;  %v565_v33 = vadd.f32 %v2751_v29, %v3174_v2  ;;  %vm668_vm7 = vcmp.ge.f32.partialorder %v544_v28, 0.0  ;;  %v700_v36 = vmul.f32 0.01, %v544_v28 }
  0xde   : > { %v3199_v35 = vsel %vm1087_vm6, %v969_v20, %v1119_v27  ;;  %v982_v37 = vadd.f32 %v2787_v34, %v3174_v2  ;;  %v556_v38 = vpop.f32.mrf.mxu0  ;;  %vm1085_vm8 = vcmp.ge.f32.partialorder %v961_v32, 0.0  ;;  %v1117_v40 = vmul.f32 0.01, %v961_v32  ;;  %v973_v41 = vpop.f32.mrf.mxu1 }
  0xdf   : > { %vm673_vm9 = vcmp.ge.f32.partialorder %v565_v33, 0.0  ;;  %v3204_v42 = vsel %vm668_vm7, %v544_v28, %v700_v36  ;;  %v705_v43 = vmul.f32 0.01, %v565_v33  ;;  %v557_v47 = vadd.f32 %v3174_v2, %v556_v38 }
  0xe0   : > { %vm1090_vm10 = vcmp.ge.f32.partialorder %v982_v37, 0.0  ;;  %v1122_v44 = vmul.f32 0.01, %v982_v37  ;;  %v2752_v45 = vpop.f32.mrf.mxu0  ;;  %v3206_v46 = vsel %vm1085_vm8, %v961_v32, %v1117_v40  ;;  %v974_v48 = vadd.f32 %v3174_v2, %v973_v41  ;;  %v2788_v50 = vpop.f32.mrf.mxu1 }
  0xe1   : > { %v568_v49 = vadd.f32 %v2752_v45, %v3174_v2  ;;  %v3213_v52 = vsel %vm673_vm9, %v565_v33, %v705_v43  ;;  %v985_v54 = vadd.f32 %v2788_v50, %v3174_v2  ;;  %vm671_vm11 = vcmp.ge.f32.partialorder %v557_v47, 0.0 }
  0xe2   : > { %v3215_v53 = vsel %vm1090_vm10, %v982_v37, %v1122_v44  ;;  %v559_v55 = vpop.f32.mrf.mxu0  ;;  %v703_v57 = vmul.f32 0.01, %v557_v47  ;;  %vm1088_vm12 = vcmp.ge.f32.partialorder %v974_v48, 0.0  ;;  %v976_v58 = vpop.f32.mrf.mxu1  ;;  %v1120_v59 = vmul.f32 0.01, %v974_v48 }
  0xe3   : > { %vm674_vm13 = vcmp.ge.f32.partialorder %v568_v49, 0.0  ;;  %v706_v60 = vmul.f32 0.01, %v568_v49  ;;  %vm1091_vm14 = vcmp.ge.f32.partialorder %v985_v54, 0.0  ;;  %v1123_v63 = vmul.f32 0.01, %v985_v54 }
  0xe4   : > { %v2755_v61 = vpop.f32.mrf.mxu0  ;;  %v3220_v62 = vsel %vm671_vm11, %v557_v47, %v703_v57  ;;  %v560_v0 = vadd.f32 %v3174_v2, %v559_v55  ;;  %v977_v1 = vadd.f32 %v3174_v2, %v976_v58  ;;  %v2791_v3 = vpop.f32.mrf.mxu1  ;;  %v3224_v4 = vsel %vm1088_vm12, %v974_v48, %v1120_v59 }
  0xe5   : > { %v3226_v5 = vsel %vm674_vm13, %v568_v49, %v706_v60  ;;  %v581_v6 = vadd.f32 %v2755_v61, %v3174_v2  ;;  %v998_v7 = vadd.f32 %v2791_v3, %v3174_v2  ;;  %v3232_v10 = vsel %vm1091_vm14, %v985_v54, %v1123_v63 }
  0xe6   : > { %v572_v8 = vpop.f32.mrf.mxu0  ;;  %vm672_vm15 = vcmp.ge.f32.partialorder %v560_v0, 0.0  ;;  %v704_v11 = vmul.f32 0.01, %v560_v0  ;;  %v989_v12 = vpop.f32.mrf.mxu1  ;;  %vm1089_vm0 = vcmp.ge.f32.partialorder %v977_v1, 0.0  ;;  %v1121_v15 = vmul.f32 0.01, %v977_v1 }
  0xe7   : > { %vm677_vm1 = vcmp.ge.f32.partialorder %v581_v6, 0.0  ;;  %v709_v19 = vmul.f32 0.01, %v581_v6  ;;  %vm1094_vm2 = vcmp.ge.f32.partialorder %v998_v7, 0.0  ;;  %v1126_v20 = vmul.f32 0.01, %v998_v7 }
  0xe8   : > { %v2756_v16 = vpop.f32.mrf.mxu0  ;;  %v3236_v17 = vsel %vm672_vm15, %v560_v0, %v704_v11  ;;  %v2792_v21 = vpop.f32.mrf.mxu1  ;;  %v3238_v24 = vsel %vm1089_vm0, %v977_v1, %v1121_v15  ;;  %v573_v25 = vadd.f32 %v3174_v2, %v572_v8  ;;  %v990_v27 = vadd.f32 %v3174_v2, %v989_v12 }
  0xe9   : > { %v584_v28 = vadd.f32 %v2756_v16, %v3174_v2  ;;  %v3245_v33 = vsel %vm677_vm1, %v581_v6, %v709_v19  ;;  %v3247_v34 = vsel %vm1094_vm2, %v998_v7, %v1126_v20  ;;  %v1001_v36 = vadd.f32 %v2792_v21, %v3174_v2 }
  0xea   : > { %v575_v29 = vpop.f32.mrf.mxu0  ;;  %v992_v37 = vpop.f32.mrf.mxu1  ;;  %vm675_vm3 = vcmp.ge.f32.partialorder %v573_v25, 0.0  ;;  %v707_v40 = vmul.f32 0.01, %v573_v25  ;;  %vm1092_vm4 = vcmp.ge.f32.partialorder %v990_v27, 0.0  ;;  %v1124_v43 = vmul.f32 0.01, %v990_v27 }
  0xeb   : > { %vm678_vm5 = vcmp.ge.f32.partialorder %v584_v28, 0.0  ;;  %v710_v44 = vmul.f32 0.01, %v584_v28  ;;  %vm1095_vm6 = vcmp.ge.f32.partialorder %v1001_v36, 0.0  ;;  %v1127_v48 = vmul.f32 0.01, %v1001_v36 }
  0xec   : > { %v2759_v41 = vpop.f32.mrf.mxu0  ;;  %v2795_v45 = vpop.f32.mrf.mxu1  ;;  %v3252_v47 = vsel %vm675_vm3, %v573_v25, %v707_v40  ;;  %v576_v49 = vadd.f32 %v3174_v2, %v575_v29  ;;  %v993_v50 = vadd.f32 %v3174_v2, %v992_v37  ;;  %v3256_v55 = vsel %vm1092_vm4, %v990_v27, %v1124_v43 }
  0xed   : > { %v3258_v57 = vsel %vm678_vm5, %v584_v28, %v710_v44  ;;  %v597_v58 = vadd.f32 %v2759_v41, %v3174_v2  ;;  %v1014_v59 = vadd.f32 %v2795_v45, %v3174_v2  ;;  %v3264_v63 = vsel %vm1095_vm6, %v1001_v36, %v1127_v48 }
  0xee   : > { %v588_v54 = vpop.f32.mrf.mxu0  ;;  %v1005_v60 = vpop.f32.mrf.mxu1  ;;  %vm676_vm7 = vcmp.ge.f32.partialorder %v576_v49, 0.0  ;;  %v708_v0 = vmul.f32 0.01, %v576_v49  ;;  %vm1093_vm8 = vcmp.ge.f32.partialorder %v993_v50, 0.0  ;;  %v1125_v6 = vmul.f32 0.01, %v993_v50 }
  0xef   : > { %vm681_vm9 = vcmp.ge.f32.partialorder %v597_v58, 0.0  ;;  %v713_v11 = vmul.f32 0.01, %v597_v58  ;;  %vm1098_vm10 = vcmp.ge.f32.partialorder %v1014_v59, 0.0  ;;  %v1130_v12 = vmul.f32 0.01, %v1014_v59 }
  0xf0   : > { %v2760_v1 = vpop.f32.mrf.mxu0  ;;  %v2796_v7 = vpop.f32.mrf.mxu1  ;;  %v3268_v8 = vsel %vm676_vm7, %v576_v49, %v708_v0  ;;  %v3270_v16 = vsel %vm1093_vm8, %v993_v50, %v1125_v6  ;;  %v589_v19 = vadd.f32 %v3174_v2, %v588_v54  ;;  %v1006_v20 = vadd.f32 %v3174_v2, %v1005_v60 }
  0xf1   : > { %v600_v21 = vadd.f32 %v2760_v1, %v3174_v2  ;;  %v3277_v28 = vsel %vm681_vm9, %v597_v58, %v713_v11  ;;  %v3279_v29 = vsel %vm1098_vm10, %v1014_v59, %v1130_v12  ;;  %v1017_v36 = vadd.f32 %v2796_v7, %v3174_v2 }
  0xf2   : > { %v591_v15 = vpop.f32.mrf.mxu0  ;;  %v1008_v25 = vpop.f32.mrf.mxu1  ;;  %vm679_vm11 = vcmp.ge.f32.partialorder %v589_v19, 0.0  ;;  %v711_v41 = vmul.f32 0.01, %v589_v19  ;;  %vm1096_vm12 = vcmp.ge.f32.partialorder %v1006_v20, 0.0  ;;  %v1128_v44 = vmul.f32 0.01, %v1006_v20 }
  0xf3   : > { %vm682_vm13 = vcmp.ge.f32.partialorder %v600_v21, 0.0  ;;  %v714_v45 = vmul.f32 0.01, %v600_v21  ;;  %vm1099_vm14 = vcmp.ge.f32.partialorder %v1017_v36, 0.0  ;;  %v1131_v50 = vmul.f32 0.01, %v1017_v36 }
  0xf4   : > { %v2763_v37 = vpop.f32.mrf.mxu0  ;;  %v2799_v43 = vpop.f32.mrf.mxu1  ;;  %v3284_v49 = vsel %vm679_vm11, %v589_v19, %v711_v41  ;;  %v592_v54 = vadd.f32 %v3174_v2, %v591_v15  ;;  %v1009_v58 = vadd.f32 %v3174_v2, %v1008_v25  ;;  %v3288_v60 = vsel %vm1096_vm12, %v1006_v20, %v1128_v44 }
  0xf5   : > { %v3290_v0 = vsel %vm682_vm13, %v600_v21, %v714_v45  ;;  %v613_v1 = vadd.f32 %v2763_v37, %v3174_v2  ;;  %v1030_v6 = vadd.f32 %v2799_v43, %v3174_v2  ;;  %v3296_v12 = vsel %vm1099_vm14, %v1017_v36, %v1131_v50 }
  0xf6   : > { %v604_v48 = vpop.f32.mrf.mxu0  ;;  %v1021_v59 = vpop.f32.mrf.mxu1  ;;  %vm680_vm15 = vcmp.ge.f32.partialorder %v592_v54, 0.0  ;;  %v712_v19 = vmul.f32 0.01, %v592_v54  ;;  %vm1097_vm0 = vcmp.ge.f32.partialorder %v1009_v58, 0.0  ;;  %v1129_v20 = vmul.f32 0.01, %v1009_v58 }
  0xf7   : > { %vm685_vm1 = vcmp.ge.f32.partialorder %v613_v1, 0.0  ;;  %v717_v37 = vmul.f32 0.01, %v613_v1  ;;  %vm1102_vm2 = vcmp.ge.f32.partialorder %v1030_v6, 0.0  ;;  %v1134_v43 = vmul.f32 0.01, %v1030_v6 }
  0xf8   : > { %v2764_v7 = vpop.f32.mrf.mxu0  ;;  %v2800_v15 = vpop.f32.mrf.mxu1  ;;  %v3300_v41 = vsel %vm680_vm15, %v592_v54, %v712_v19  ;;  %v3302_v45 = vsel %vm1097_vm0, %v1009_v58, %v1129_v20  ;;  %v605_v36 = vadd.f32 %v3174_v2, %v604_v48  ;;  %v1022_v50 = vadd.f32 %v3174_v2, %v1021_v59 }
  0xf9   : > { %3756 = vst [vmem:[#allocation2_spill] sm:$0xff] %v3300_v41  ;;  %3757 = vst [vmem:[#allocation3_spill] sm:$0xff] %v3302_v45  ;;  %v616_v11 = vadd.f32 %v2764_v7, %v3174_v2  ;;  %v3309_v27 = vsel %vm685_vm1, %v613_v1, %v717_v37  ;;  %v3311_v54 = vsel %vm1102_vm2, %v1030_v6, %v1134_v43 }
  0xfa   : > { %v607_v21 = vpop.f32.mrf.mxu0  ;;  %v1024_v44 = vpop.f32.mrf.mxu1  ;;  %3758 = vst [vmem:[#allocation4_spill] sm:$0xff] %v3309_v27  ;;  %3759 = vst [vmem:[#allocation5_spill] sm:$0xff] %v3311_v54  ;;  %v1033_v19 = vadd.f32 %v2800_v15, %v3174_v2  ;;  %vm683_vm3 = vcmp.ge.f32.partialorder %v605_v36, 0.0  ;;  %v715_v48 = vmul.f32 0.01, %v605_v36  ;;  %vm1100_vm4 = vcmp.ge.f32.partialorder %v1022_v50, 0.0 }
  0xfb   : > { %v1132_v20 = vmul.f32 0.01, %v1022_v50  ;;  %vm686_vm5 = vcmp.ge.f32.partialorder %v616_v11, 0.0  ;;  %v718_v7 = vmul.f32 0.01, %v616_v11  ;;  %v608_v6 = vadd.f32 %v3174_v2, %v607_v21 }
  0xfc   : > { %v2767_v40 = vpop.f32.mrf.mxu0  ;;  %v2803_v3 = vpop.f32.mrf.mxu1  ;;  %vm1103_vm6 = vcmp.ge.f32.partialorder %v1033_v19, 0.0  ;;  %v3316_v25 = vsel %vm683_vm3, %v605_v36, %v715_v48  ;;  %v1135_v1 = vmul.f32 0.01, %v1033_v19  ;;  %v1025_v15 = vadd.f32 %v3174_v2, %v1024_v44 }
  0xfd   : > { %3760 = vst [vmem:[#allocation6_spill] sm:$0xff] %v3316_v25  ;;  %v3320_v43 = vsel %vm1100_vm4, %v1022_v50, %v1132_v20  ;;  %v3322_v58 = vsel %vm686_vm5, %v616_v11, %v718_v7  ;;  %v629_v38 = vadd.f32 %v2767_v40, %v3174_v2  ;;  %v1046_v32 = vadd.f32 %v2803_v3, %v3174_v2 }
  0xfe   : > { %v620_v59 = vpop.f32.mrf.mxu0  ;;  %v1037_v61 = vpop.f32.mrf.mxu1  ;;  %3761 = vst [vmem:[#allocation7_spill] sm:$0xff] %v3320_v43  ;;  %3762 = vst [vmem:[#allocation8_spill] sm:$0xff] %v3322_v58  ;;  %v3328_v36 = vsel %vm1103_vm6, %v1033_v19, %v1135_v1  ;;  %vm684_vm7 = vcmp.ge.f32.partialorder %v608_v6, 0.0  ;;  %v716_v48 = vmul.f32 0.01, %v608_v6  ;;  %vm1101_vm8 = vcmp.ge.f32.partialorder %v1025_v15, 0.0 }
  0xff   : > { %3763 = vst [vmem:[#allocation9_spill] sm:$0xff] %v3328_v36  ;;  %v1133_v50 = vmul.f32 0.01, %v1025_v15  ;;  %vm689_vm9 = vcmp.ge.f32.partialorder %v629_v38, 0.0  ;;  %v721_v40 = vmul.f32 0.01, %v629_v38  ;;  %v621_v19 = vadd.f32 %v3174_v2, %v620_v59 }
 0x100   : > { %v2768_v37 = vpop.f32.mrf.mxu0  ;;  %v2804_v13 = vpop.f32.mrf.mxu1  ;;  %v3332_v20 = vsel %vm684_vm7, %v608_v6, %v716_v48  ;;  %vm1106_vm10 = vcmp.ge.f32.partialorder %v1046_v32, 0.0  ;;  %v1138_v3 = vmul.f32 0.01, %v1046_v32  ;;  %v1038_v1 = vadd.f32 %v3174_v2, %v1037_v61 }
 0x101   : > { %3764 = vst [vmem:[#allocation10_spill] sm:$0xff] %v3332_v20  ;;  %v3334_v56 = vsel %vm1101_vm8, %v1025_v15, %v1133_v50  ;;  %v632_v9 = vadd.f32 %v2768_v37, %v3174_v2  ;;  %v3341_v39 = vsel %vm689_vm9, %v629_v38, %v721_v40  ;;  %v1049_v48 = vadd.f32 %v2804_v13, %v3174_v2 }
 0x102   : > { %v623_v21 = vpop.f32.mrf.mxu0  ;;  %v1040_v11 = vpop.f32.mrf.mxu1  ;;  %3765 = vst [vmem:[#allocation11_spill] sm:$0xff] %v3334_v56  ;;  %3766 = vst [vmem:[#allocation12_spill] sm:$0xff] %v3341_v39  ;;  %v3343_v6 = vsel %vm1106_vm10, %v1046_v32, %v1138_v3  ;;  %vm687_vm11 = vcmp.ge.f32.partialorder %v621_v19, 0.0  ;;  %v719_v59 = vmul.f32 0.01, %v621_v19  ;;  %vm1104_vm12 = vcmp.ge.f32.partialorder %v1038_v1, 0.0 }
 0x103   : > { %3767 = vst [vmem:[#allocation13_spill] sm:$0xff] %v3343_v6  ;;  %v1136_v50 = vmul.f32 0.01, %v1038_v1  ;;  %vm690_vm13 = vcmp.ge.f32.partialorder %v632_v9, 0.0  ;;  %v722_v37 = vmul.f32 0.01, %v632_v9  ;;  %v624_v32 = vadd.f32 %v3174_v2, %v623_v21 }
 0x104   : > { %v2771_v7 = vpop.f32.mrf.mxu0  ;;  %v2807_v51 = vpop.f32.mrf.mxu1  ;;  %vm1107_vm14 = vcmp.ge.f32.partialorder %v1049_v48, 0.0  ;;  %v3348_v44 = vsel %vm687_vm11, %v621_v19, %v719_v59  ;;  %v1139_v38 = vmul.f32 0.01, %v1049_v48  ;;  %v1041_v13 = vadd.f32 %v3174_v2, %v1040_v11 }
 0x105   : > { %3768 = vst [vmem:[#allocation14_spill] sm:$0xff] %v3348_v44  ;;  %v3352_v3 = vsel %vm1104_vm12, %v1038_v1, %v1136_v50  ;;  %v3354_v15 = vsel %vm690_vm13, %v632_v9, %v722_v37  ;;  %v645_v6 = vadd.f32 %v2771_v7, %v3174_v2  ;;  %v1062_v39 = vadd.f32 %v2807_v51, %v3174_v2 }
 0x106   : > { %v636_v30 = vpop.f32.mrf.mxu0  ;;  %v1053_v61 = vpop.f32.mrf.mxu1  ;;  %3769 = vst [vmem:[#allocation15_spill] sm:$0xff] %v3352_v3  ;;  %3770 = vst [vmem:[#allocation16_spill] sm:$0xff] %v3354_v15  ;;  %v3360_v19 = vsel %vm1107_vm14, %v1049_v48, %v1139_v38  ;;  %vm688_vm15 = vcmp.ge.f32.partialorder %v624_v32, 0.0  ;;  %v720_v59 = vmul.f32 0.01, %v624_v32  ;;  %vm1105_vm0 = vcmp.ge.f32.partialorder %v1041_v13, 0.0 }
 0x107   : > { %3771 = vst [vmem:[#allocation17_spill] sm:$0xff] %v3360_v19  ;;  %v1137_v1 = vmul.f32 0.01, %v1041_v13  ;;  %vm693_vm1 = vcmp.ge.f32.partialorder %v645_v6, 0.0  ;;  %v725_v7 = vmul.f32 0.01, %v645_v6  ;;  %v637_v48 = vadd.f32 %v3174_v2, %v636_v30 }
 0x108   : > { %v2772_v22 = vpop.f32.mrf.mxu0  ;;  %v2808_v40 = vpop.f32.mrf.mxu1  ;;  %v3364_v50 = vsel %vm688_vm15, %v624_v32, %v720_v59  ;;  %vm1110_vm2 = vcmp.ge.f32.partialorder %v1062_v39, 0.0  ;;  %v1142_v51 = vmul.f32 0.01, %v1062_v39  ;;  %v1054_v38 = vadd.f32 %v3174_v2, %v1053_v61 }
 0x109   : > { %3772 = vst [vmem:[#allocation18_spill] sm:$0xff] %v3364_v50  ;;  %v3366_v36 = vsel %vm1105_vm0, %v1041_v13, %v1137_v1  ;;  %v648_v20 = vadd.f32 %v2772_v22, %v3174_v2  ;;  %v3373_v19 = vsel %vm693_vm1, %v645_v6, %v725_v7  ;;  %v1065_v59 = vadd.f32 %v2808_v40, %v3174_v2 }
 0x10a   : > { %v639_v56 = vpop.f32.mrf.mxu0  ;;  %v1056_v21 = vpop.f32.mrf.mxu1  ;;  %3773 = vst [vmem:[#allocation19_spill] sm:$0xff] %v3366_v36  ;;  %3774 = vst [vmem:[#allocation20_spill] sm:$0xff] %v3373_v19  ;;  %v3375_v32 = vsel %vm1110_vm2, %v1062_v39, %v1142_v51  ;;  %vm691_vm3 = vcmp.ge.f32.partialorder %v637_v48, 0.0  ;;  %v723_v30 = vmul.f32 0.01, %v637_v48  ;;  %vm1108_vm4 = vcmp.ge.f32.partialorder %v1054_v38, 0.0 }
 0x10b   : > { %3775 = vst [vmem:[#allocation21_spill] sm:$0xff] %v3375_v32  ;;  %v1140_v1 = vmul.f32 0.01, %v1054_v38  ;;  %vm694_vm5 = vcmp.ge.f32.partialorder %v648_v20, 0.0  ;;  %v726_v22 = vmul.f32 0.01, %v648_v20  ;;  %v640_v39 = vadd.f32 %v3174_v2, %v639_v56 }
 0x10c   : > { %v2775_v9 = vpop.f32.mrf.mxu0  ;;  %v2811_v37 = vpop.f32.mrf.mxu1  ;;  %vm1111_vm6 = vcmp.ge.f32.partialorder %v1065_v59, 0.0  ;;  %v3380_v11 = vsel %vm691_vm3, %v637_v48, %v723_v30  ;;  %v1143_v6 = vmul.f32 0.01, %v1065_v59  ;;  %v1057_v40 = vadd.f32 %v3174_v2, %v1056_v21 }
 0x10d   : > { %3776 = vst [vmem:[#allocation22_spill] sm:$0xff] %v3380_v11  ;;  %v3384_v51 = vsel %vm1108_vm4, %v1054_v38, %v1140_v1  ;;  %v3386_v13 = vsel %vm694_vm5, %v648_v20, %v726_v22  ;;  %v661_v32 = vadd.f32 %v2775_v9, %v3174_v2  ;;  %v1078_v19 = vadd.f32 %v2811_v37, %v3174_v2 }
 0x10e   : > { %v652_v3 = vpop.f32.mrf.mxu0  ;;  %v1069_v15 = vpop.f32.mrf.mxu1  ;;  %3777 = vst [vmem:[#allocation23_spill] sm:$0xff] %v3384_v51  ;;  %3778 = vst [vmem:[#allocation24_spill] sm:$0xff] %v3386_v13  ;;  %v3392_v48 = vsel %vm1111_vm6, %v1065_v59, %v1143_v6  ;;  %vm692_vm7 = vcmp.ge.f32.partialorder %v640_v39, 0.0  ;;  %v724_v30 = vmul.f32 0.01, %v640_v39  ;;  %vm1109_vm8 = vcmp.ge.f32.partialorder %v1057_v40, 0.0 }
 0x10f   : > { %3779 = vst [vmem:[#allocation25_spill] sm:$0xff] %v3392_v48  ;;  %v1141_v38 = vmul.f32 0.01, %v1057_v40  ;;  %vm697_vm9 = vcmp.ge.f32.partialorder %v661_v32, 0.0  ;;  %v729_v9 = vmul.f32 0.01, %v661_v32  ;;  %v653_v59 = vadd.f32 %v3174_v2, %v652_v3 }
 0x110   : > { %v2776_v61 = vpop.f32.mrf.mxu0  ;;  %v2812_v44 = vpop.f32.mrf.mxu1  ;;  %v3396_v1 = vsel %vm692_vm7, %v640_v39, %v724_v30  ;;  %vm1114_vm10 = vcmp.ge.f32.partialorder %v1078_v19, 0.0  ;;  %v1146_v37 = vmul.f32 0.01, %v1078_v19  ;;  %v1070_v6 = vadd.f32 %v3174_v2, %v1069_v15 }
 0x111   : > { %3780 = vst [vmem:[#allocation26_spill] sm:$0xff] %v3396_v1  ;;  %v3398_v58 = vsel %vm1109_vm8, %v1057_v40, %v1141_v38  ;;  %v664_v50 = vadd.f32 %v2776_v61, %v3174_v2  ;;  %v3405_v48 = vsel %vm697_vm9, %v661_v32, %v729_v9  ;;  %v1081_v30 = vadd.f32 %v2812_v44, %v3174_v2 }
 0x112   : > { %v655_v7 = vpop.f32.mrf.mxu0  ;;  %v1072_v36 = vpop.f32.mrf.mxu1  ;;  %3781 = vst [vmem:[#allocation27_spill] sm:$0xff] %v3398_v58  ;;  %3782 = vst [vmem:[#allocation28_spill] sm:$0xff] %v3405_v48  ;;  %v3407_v39 = vsel %vm1114_vm10, %v1078_v19, %v1146_v37  ;;  %vm695_vm11 = vcmp.ge.f32.partialorder %v653_v59, 0.0  ;;  %v727_v3 = vmul.f32 0.01, %v653_v59  ;;  %vm1112_vm12 = vcmp.ge.f32.partialorder %v1070_v6, 0.0 }
 0x113   : > { %3783 = vst [vmem:[#allocation29_spill] sm:$0xff] %v3407_v39  ;;  %v1144_v38 = vmul.f32 0.01, %v1070_v6  ;;  %vm698_vm13 = vcmp.ge.f32.partialorder %v664_v50, 0.0  ;;  %v730_v61 = vmul.f32 0.01, %v664_v50  ;;  %v656_v19 = vadd.f32 %v3174_v2, %v655_v7 }
 0x114   : > { %v2819_v56 = vpop.f32.mrf.mxu0  ;;  %v2855_v20 = vpop.f32.mrf.mxu1  ;;  %vm1115_vm14 = vcmp.ge.f32.partialorder %v1081_v30, 0.0  ;;  %v3412_v21 = vsel %vm695_vm11, %v653_v59, %v727_v3  ;;  %v1147_v32 = vmul.f32 0.01, %v1081_v30  ;;  %v1073_v44 = vadd.f32 %v3174_v2, %v1072_v36 }
 0x115   : > { %3784 = vst [vmem:[#allocation30_spill] sm:$0xff] %v3412_v21  ;;  %v3416_v37 = vsel %vm1112_vm12, %v1070_v6, %v1144_v38  ;;  %v3418_v40 = vsel %vm698_vm13, %v664_v50, %v730_v61  ;;  %v1415_v39 = vadd.f32 %v2819_v56, %v3174_v2  ;;  %v1832_v48 = vadd.f32 %v2855_v20, %v3174_v2 }
 0x116   : > { %v1406_v22 = vpop.f32.mrf.mxu0  ;;  %v1823_v51 = vpop.f32.mrf.mxu1  ;;  %3785 = vst [vmem:[#allocation31_spill] sm:$0xff] %v3416_v37  ;;  %3786 = vst [vmem:[#allocation32_spill] sm:$0xff] %v3418_v40  ;;  %v3424_v59 = vsel %vm1115_vm14, %v1081_v30, %v1147_v32  ;;  %vm696_vm15 = vcmp.ge.f32.partialorder %v656_v19, 0.0  ;;  %v728_v3 = vmul.f32 0.01, %v656_v19  ;;  %vm1113_vm0 = vcmp.ge.f32.partialorder %v1073_v44, 0.0 }
 0x117   : > { %3787 = vst [vmem:[#allocation33_spill] sm:$0xff] %v3424_v59  ;;  %v1145_v6 = vmul.f32 0.01, %v1073_v44  ;;  %vm1535_vm1 = vcmp.ge.f32.partialorder %v1415_v39, 0.0  ;;  %v1567_v56 = vmul.f32 0.01, %v1415_v39  ;;  %v1407_v30 = vadd.f32 %v3174_v2, %v1406_v22 }
 0x118   : > { %v2820_v13 = vpop.f32.mrf.mxu0  ;;  %v2856_v15 = vpop.f32.mrf.mxu1  ;;  %v3428_v38 = vsel %vm696_vm15, %v656_v19, %v728_v3  ;;  %vm1952_vm2 = vcmp.ge.f32.partialorder %v1832_v48, 0.0  ;;  %v1984_v20 = vmul.f32 0.01, %v1832_v48  ;;  %v1824_v32 = vadd.f32 %v3174_v2, %v1823_v51 }
 0x119   : > { %3788 = vst [vmem:[#allocation34_spill] sm:$0xff] %v3428_v38  ;;  %v3430_v43 = vsel %vm1113_vm0, %v1073_v44, %v1145_v6  ;;  %v1418_v1 = vadd.f32 %v2820_v13, %v3174_v2  ;;  %v1599_v21 = vsel %vm1535_vm1, %v1415_v39, %v1567_v56  ;;  %v1835_v19 = vadd.f32 %v2856_v15, %v3174_v2 }
 0x11a   : > { %v1409_v11 = vpop.f32.mrf.mxu0  ;;  %v1826_v9 = vpop.f32.mrf.mxu1  ;;  %3789 = vst [vmem:[#allocation35_spill] sm:$0xff] %v3430_v43  ;;  %v2016_v59 = vsel %vm1952_vm2, %v1832_v48, %v1984_v20  ;;  %vm1533_vm3 = vcmp.ge.f32.partialorder %v1407_v30, 0.0  ;;  %v1565_v25 = vmul.f32 0.01, %v1407_v30  ;;  %vm1950_vm4 = vcmp.ge.f32.partialorder %v1824_v32, 0.0 }
 0x11b   : > { %v2048_v40 = vmax.f32 %v1599_v21, %v2016_v59  ;;  %v1982_v6 = vmul.f32 0.01, %v1824_v32  ;;  %vm1536_vm5 = vcmp.ge.f32.partialorder %v1418_v1, 0.0  ;;  %v1568_v22 = vmul.f32 0.01, %v1418_v1 }
 0x11c   : > { %v2823_v58 = vpop.f32.mrf.mxu0  ;;  %v2859_v7 = vpop.f32.mrf.mxu1  ;;  %vm1953_vm6 = vcmp.ge.f32.partialorder %v1835_v19, 0.0  ;;  %v3790_v13 = vmax.f32 %v3180_v14, %v3183_v18  ;;  %v1597_v39 = vsel %vm1533_vm3, %v1407_v30, %v1565_v25  ;;  %v1985_v48 = vmul.f32 0.01, %v1835_v19 }
 0x11d   : > { %v1410_v15 = vadd.f32 %v3174_v2, %v1409_v11  ;;  %v2014_v21 = vsel %vm1950_vm4, %v1824_v32, %v1982_v6  ;;  %v1600_v59 = vsel %vm1536_vm5, %v1418_v1, %v1568_v22  ;;  %v1827_v20 = vadd.f32 %v3174_v2, %v1826_v9 }
 0x11e   : > { %v1422_v50 = vpop.f32.mrf.mxu0  ;;  %v1839_v61 = vpop.f32.mrf.mxu1  ;;  %v2080_v36 = vmax.f32 %v3790_v13, %v2048_v40  ;;  %v1431_v43 = vadd.f32 %v2823_v58, %v3174_v2  ;;  %v2046_v54 = vmax.f32 %v1597_v39, %v2014_v21  ;;  %v2017_v27 = vsel %vm1953_vm6, %v1835_v19, %v1985_v48 }
 0x11f   : > { %vm1534_vm7 = vcmp.ge.f32.partialorder %v1410_v15, 0.0  ;;  %v1566_v45 = vmul.f32 0.01, %v1410_v15  ;;  %v2049_v14 = vmax.f32 %v1600_v59, %v2017_v27  ;;  %vm1951_vm8 = vcmp.ge.f32.partialorder %v1827_v20, 0.0 }
 0x120   : > { %v2824_v37 = vpop.f32.mrf.mxu0  ;;  %v2860_v3 = vpop.f32.mrf.mxu1  ;;  %v1983_v18 = vmul.f32 0.01, %v1827_v20  ;;  %vm1539_vm9 = vcmp.ge.f32.partialorder %v1431_v43, 0.0  ;;  %v3791_v11 = vmax.f32 %v3188_v23, %v3190_v26  ;;  %v1571_v58 = vmul.f32 0.01, %v1431_v43 }
 0x121   : > { %v1598_v40 = vsel %vm1534_vm7, %v1410_v15, %v1566_v45  ;;  %v1848_v9 = vadd.f32 %v2859_v7, %v3174_v2  ;;  %v3792_v32 = vmax.f32 %v3195_v31, %v3199_v35  ;;  %v1423_v6 = vadd.f32 %v3174_v2, %v1422_v50 }
 0x122   : > { %v1425_v44 = vpop.f32.mrf.mxu0  ;;  %v3438_v51 = vpop.f32.mrf.mxu1  ;;  %v2078_v1 = vmax.f32 %v3791_v11, %v2046_v54  ;;  %v2015_v27 = vsel %vm1951_vm8, %v1827_v20, %v1983_v18  ;;  %v1840_v22 = vadd.f32 %v3174_v2, %v1839_v61  ;;  %v1603_v26 = vsel %vm1539_vm9, %v1431_v43, %v1571_v58 }
 0x123   : > { %v2081_v19 = vmax.f32 %v3792_v32, %v2049_v14  ;;  %v2047_v23 = vmax.f32 %v1598_v40, %v2015_v27  ;;  %vm1956_vm10 = vcmp.ge.f32.partialorder %v1848_v9, 0.0  ;;  %v1988_v45 = vmul.f32 0.01, %v1848_v9 }
 0x124   : > { %v3444_v56 = vpop.f32.mrf.mxu0  ;;  %v2863_v38 = vpop.f32.mrf.mxu1  ;;  %vm1537_vm11 = vcmp.ge.f32.partialorder %v1423_v6, 0.0  ;;  %v1569_v35 = vmul.f32 0.01, %v1423_v6  ;;  %vm1954_vm12 = vcmp.ge.f32.partialorder %v1840_v22, 0.0  ;;  %v3793_v50 = vmax.f32 %v3204_v42, %v3206_v46 }
 0x125   : > { %v2582_v31 = vpack.c.bf16 %v2081_v19, %v2080_v36  ;;  %v2020_v39 = vsel %vm1956_vm10, %v1848_v9, %v1988_v45  ;;  %v1986_v48 = vmul.f32 0.01, %v1840_v22  ;;  %v1434_v15 = vadd.f32 %v2824_v37, %v3174_v2 }
 0x126   : > { %v3448_v41 = vpop.f32.mrf.mxu0  ;;  %v3450_v25 = vpop.f32.mrf.mxu1  ;;  %v2079_v61 = vmax.f32 %v3793_v50, %v2047_v23  ;;  %v2052_v43 = vmax.f32 %v1603_v26, %v2020_v39  ;;  %v1601_v59 = vsel %vm1537_vm11, %v1423_v6, %v1569_v35  ;;  %v1851_v36 = vadd.f32 %v2860_v3, %v3174_v2 }
 0x127   : > { %2654 = vst [vmem:[%s3469_s22 + $0x8] sm:$0xff] %v2582_v31   ;;  %v1426_v20 = vadd.f32 %v3174_v2, %v1425_v44  ;;  %v2018_v11 = vsel %vm1954_vm12, %v1840_v22, %v1986_v48  ;;  %vm1540_vm13 = vcmp.ge.f32.partialorder %v1434_v15, 0.0  ;;  %v1572_v42 = vmul.f32 0.01, %v1434_v15 }
 0x128   : > { %v3456_v30 = vpop.f32.mrf.mxu0  ;;  %v3463_v13 = vpop.f32.mrf.mxu1  ;;  %v2577_v18 = vpack.c.bf16 %v2079_v61, %v2078_v1  ;;  %v3794_v37 = vmax.f32 %v3213_v52, %v3215_v53  ;;  %v2050_v58 = vmax.f32 %v1601_v59, %v2018_v11  ;;  %vm1957_vm14 = vcmp.ge.f32.partialorder %v1851_v36, 0.0 }
 0x129   : > { %v1989_v9 = vmul.f32 0.01, %v1851_v36  ;;  %v1604_v3 = vsel %vm1540_vm13, %v1434_v15, %v1572_v42  ;;  %vm1538_vm15 = vcmp.ge.f32.partialorder %v1426_v20, 0.0  ;;  %v1570_v44 = vmul.f32 0.01, %v1426_v20 }
 0x12a   : > { %v3471_v54 = vpop.f32.mrf.mxu0  ;;  %v3473_v7 = vpop.f32.mrf.mxu1  ;;  %v2084_v40 = vmax.f32 %v3794_v37, %v2052_v43  ;;  %2578 = vst [vmem:[%s3469_s22] sm:$0xff] %v2577_v18   ;;  %v1843_v1 = vadd.f32 %v3174_v2, %v3438_v51  ;;  %v3795_v27 = vmax.f32 %v3220_v62, %v3224_v4  ;;  %v1447_v53 = vadd.f32 %v3444_v56, %v3174_v2 }
 0x12b   : > { %v2021_v52 = vsel %vm1957_vm14, %v1851_v36, %v1989_v9  ;;  %v1864_v22 = vadd.f32 %v2863_v38, %v3174_v2  ;;  %v1602_v45 = vsel %vm1538_vm15, %v1426_v20, %v1570_v44  ;;  %v3796_v4 = vmax.f32 %v3226_v5, %v3232_v10 }
 0x12c   : > { %v3479_v21 = vpop.f32.mrf.mxu0  ;;  %v3484_v14 = vpop.f32.mrf.mxu1  ;;  %v2082_v6 = vmax.f32 %v3795_v27, %v2050_v58  ;;  %v2053_v26 = vmax.f32 %v1604_v3, %v2021_v52  ;;  %vm1955_vm0 = vcmp.ge.f32.partialorder %v1843_v1, 0.0  ;;  %v1987_v31 = vmul.f32 0.01, %v1843_v1 }
 0x12d   : > { %vm1543_vm1 = vcmp.ge.f32.partialorder %v1447_v53, 0.0  ;;  %v1575_v51 = vmul.f32 0.01, %v1447_v53  ;;  %vm1960_vm2 = vcmp.ge.f32.partialorder %v1864_v22, 0.0  ;;  %v1992_v50 = vmul.f32 0.01, %v1864_v22 }
 0x12e   : > { %v3486_v46 = vpop.f32.mrf.mxu0  ;;  %v3491_v32 = vpop.f32.mrf.mxu1  ;;  %v2085_v56 = vmax.f32 %v3796_v4, %v2053_v26  ;;  %v2019_v61 = vsel %vm1955_vm0, %v1843_v1, %v1987_v31  ;;  %v1439_v38 = vadd.f32 %v3174_v2, %v3448_v41  ;;  %v1856_v39 = vadd.f32 %v3174_v2, %v3450_v25 }
 0x12f   : > { %v2051_v15 = vmax.f32 %v1602_v45, %v2019_v61  ;;  %v1607_v43 = vsel %vm1543_vm1, %v1447_v53, %v1575_v51  ;;  %v2024_v59 = vsel %vm1960_vm2, %v1864_v22, %v1992_v50  ;;  %v1450_v36 = vadd.f32 %v3456_v30, %v3174_v2 }
 0x130   : > { %v3496_v19 = vpop.f32.mrf.mxu0  ;;  %v3504_v23 = vpop.f32.mrf.mxu1  ;;  %v2592_v5 = vpack.c.bf16 %v2085_v56, %v2084_v40  ;;  %v2056_v10 = vmax.f32 %v1607_v43, %v2024_v59  ;;  %vm1541_vm3 = vcmp.ge.f32.partialorder %v1439_v38, 0.0  ;;  %v1573_v18 = vmul.f32 0.01, %v1439_v38 }
 0x131   : > { %v3797_v41 = vmax.f32 %v3236_v17, %v3238_v24  ;;  %vm1958_vm4 = vcmp.ge.f32.partialorder %v1856_v39, 0.0  ;;  %v1990_v42 = vmul.f32 0.01, %v1856_v39  ;;  %vm1544_vm5 = vcmp.ge.f32.partialorder %v1450_v36, 0.0 }
 0x132   : > { %v3506_v35 = vpop.f32.mrf.mxu0  ;;  %v3508_v62 = vpop.f32.mrf.mxu1  ;;  %2656 = vst [vmem:[%s3469_s22 + $0x18] sm:$0xff] %v2592_v5   ;;  %v3798_v30 = vmax.f32 %v3245_v33, %v3247_v34  ;;  %v1605_v58 = vsel %vm1541_vm3, %v1439_v38, %v1573_v18  ;;  %v1576_v9 = vmul.f32 0.01, %v1450_v36  ;;  %v1867_v3 = vadd.f32 %v3463_v13, %v3174_v2 }
 0x133   : > { %v2083_v25 = vmax.f32 %v3797_v41, %v2051_v15  ;;  %v2022_v24 = vsel %vm1958_vm4, %v1856_v39, %v1990_v42  ;;  %v1442_v1 = vadd.f32 %v3174_v2, %v3471_v54  ;;  %v1859_v27 = vadd.f32 %v3174_v2, %v3473_v7  ;;  %v3553_v2 = vld [vmem:[%s3720_s5] ss:$0 sm:$0xff] }
 0x134   : > { %v3517_v48 = vpop.f32.mrf.mxu0  ;;  %v3521_v20 = vpop.f32.mrf.mxu1  ;;  %v2088_v40 = vmax.f32 %v3798_v30, %v2056_v10  ;;  %v2054_v33 = vmax.f32 %v1605_v58, %v2022_v24  ;;  %v1608_v34 = vsel %vm1544_vm5, %v1450_v36, %v1576_v9  ;;  %vm1961_vm6 = vcmp.ge.f32.partialorder %v1867_v3, 0.0 }
 0x135   : > { %v2587_v17 = vpack.c.bf16 %v2083_v25, %v2082_v6  ;;  %v1993_v53 = vmul.f32 0.01, %v1867_v3  ;;  %vm1542_vm7 = vcmp.ge.f32.partialorder %v1442_v1, 0.0  ;;  %v1574_v13 = vmul.f32 0.01, %v1442_v1 }
 0x136   : > { %v3523_v11 = vpop.f32.mrf.mxu0  ;;  %v3528_v37 = vpop.f32.mrf.mxu1  ;;  %vm1959_vm8 = vcmp.ge.f32.partialorder %v1859_v27, 0.0  ;;  %v1991_v6 = vmul.f32 0.01, %v1859_v27  ;;  %v3799_v26 = vmax.f32 %v3252_v47, %v3256_v55  ;;  %v1463_v7 = vadd.f32 %v3553_v2, %v3479_v21 }
 0x137   : > { %2655 = vst [vmem:[%s3469_s22 + $0x10] sm:$0xff] %v2587_v17   ;;  %v2025_v45 = vsel %vm1961_vm6, %v1867_v3, %v1993_v53  ;;  %v1880_v31 = vadd.f32 %v3553_v2, %v3484_v14  ;;  %v1606_v4 = vsel %vm1542_vm7, %v1442_v1, %v1574_v13  ;;  %v1455_v47 = vadd.f32 %v3553_v2, %v3486_v46 }
 0x138   : > { %v3536_v44 = vpop.f32.mrf.mxu0  ;;  %v3542_v52 = vpop.f32.mrf.mxu1  ;;  %v2086_v54 = vmax.f32 %v3799_v26, %v2054_v33  ;;  %v2057_v50 = vmax.f32 %v1608_v34, %v2025_v45  ;;  %v2023_v56 = vsel %vm1959_vm8, %v1859_v27, %v1991_v6  ;;  %vm1547_vm9 = vcmp.ge.f32.partialorder %v1463_v7, 0.0 }
 0x139   : > { %v2055_v61 = vmax.f32 %v1606_v4, %v2023_v56  ;;  %v1579_v38 = vmul.f32 0.01, %v1463_v7  ;;  %vm1964_vm10 = vcmp.ge.f32.partialorder %v1880_v31, 0.0  ;;  %v3800_v21 = vmax.f32 %v3258_v57, %v3264_v63  ;;  %v3805_v56 = vld [vmem:[#allocation2_spill] sm:$0xff] }
 0x13a   : > { %v3544_v22 = vpop.f32.mrf.mxu0  ;;  %v3559_v51 = vpop.f32.mrf.mxu1  ;;  %v1996_v15 = vmul.f32 0.01, %v1880_v31  ;;  %vm1545_vm11 = vcmp.ge.f32.partialorder %v1455_v47, 0.0  ;;  %v1577_v14 = vmul.f32 0.01, %v1455_v47  ;;  %v3801_v43 = vmax.f32 %v3268_v8, %v3270_v16 }
 0x13b   : > { %v2089_v39 = vmax.f32 %v3800_v21, %v2057_v50  ;;  %v1611_v36 = vsel %vm1547_vm9, %v1463_v7, %v1579_v38  ;;  %v1872_v46 = vadd.f32 %v3553_v2, %v3491_v32  ;;  %v1466_v5 = vadd.f32 %v3553_v2, %v3496_v19 }
 0x13c   : > { %v3563_v55 = vpop.f32.mrf.mxu0  ;;  %v2087_v59 = vmax.f32 %v3801_v43, %v2055_v61  ;;  %v3575_v10 = vpop.f32.mrf.mxu1  ;;  %v2028_v63 = vsel %vm1964_vm10, %v1880_v31, %v1996_v15  ;;  %v1609_v18 = vsel %vm1545_vm11, %v1455_v47, %v1577_v14  ;;  %v1883_v41 = vadd.f32 %v3553_v2, %v3504_v23  ;;  %v3806_v47 = vld [vmem:[#allocation3_spill] sm:$0xff] }
 0x13d   : > { %v2602_v57 = vpack.c.bf16 %v2089_v39, %v2088_v40  ;;  %v2060_v16 = vmax.f32 %v1611_v36, %v2028_v63  ;;  %vm1962_vm12 = vcmp.ge.f32.partialorder %v1872_v46, 0.0  ;;  %v1994_v42 = vmul.f32 0.01, %v1872_v46  ;;  %v3808_v63 = vld [vmem:[#allocation4_spill] sm:$0xff] }
 0x13e   : > { %v3579_v25 = vpop.f32.mrf.mxu0  ;;  %v2597_v8 = vpack.c.bf16 %v2087_v59, %v2086_v54  ;;  %vm1548_vm13 = vcmp.ge.f32.partialorder %v1466_v5, 0.0  ;;  %v1580_v32 = vmul.f32 0.01, %v1466_v5  ;;  %vm1965_vm14 = vcmp.ge.f32.partialorder %v1883_v41, 0.0  ;;  %v3590_v3 = vpop.f32.mrf.mxu1 }
 0x13f   : > { %2658 = vst [vmem:[%s3469_s22 + $0x28] sm:$0xff] %v2602_v57   ;;  %v1997_v19 = vmul.f32 0.01, %v1883_v41  ;;  %v3802_v30 = vmax.f32 %v3277_v28, %v3279_v29  ;;  %v2026_v58 = vsel %vm1962_vm12, %v1872_v46, %v1994_v42  ;;  %v1458_v23 = vadd.f32 %v3553_v2, %v3506_v35 }
 0x140   : > { %2657 = vst [vmem:[%s3469_s22 + $0x20] sm:$0xff] %v2597_v8   ;;  %v1875_v9 = vadd.f32 %v3553_v2, %v3508_v62  ;;  %v2058_v17 = vmax.f32 %v1609_v18, %v2026_v58  ;;  %v1612_v24 = vsel %vm1548_vm13, %v1466_v5, %v1580_v32  ;;  %v1479_v27 = vadd.f32 %v3553_v2, %v3517_v48  ;;  %v3594_v33 = vpop.f32.mrf.mxu0  ;;  %v3606_v45 = vpop.f32.mrf.mxu1  ;;  %v3809_v18 = vld [vmem:[#allocation5_spill] sm:$0xff]  ;;  %v3811_v32 = vld [vmem:[#allocation6_spill] sm:$0xff] }
 0x141   : > { %v2092_v40 = vmax.f32 %v3802_v30, %v2060_v16  ;;  %v2029_v1 = vsel %vm1965_vm14, %v1883_v41, %v1997_v19  ;;  %vm1546_vm15 = vcmp.ge.f32.partialorder %v1458_v23, 0.0  ;;  %v1578_v28 = vmul.f32 0.01, %v1458_v23  ;;  %v3812_v19 = vld [vmem:[#allocation7_spill] sm:$0xff] }
 0x142   : > { %v2061_v34 = vmax.f32 %v1612_v24, %v2029_v1  ;;  %vm1963_vm0 = vcmp.ge.f32.partialorder %v1875_v9, 0.0  ;;  %v3803_v29 = vmax.f32 %v3284_v49, %v3288_v60  ;;  %v1995_v53 = vmul.f32 0.01, %v1875_v9 }
 0x143   : > { %vm1551_vm1 = vcmp.ge.f32.partialorder %v1479_v27, 0.0  ;;  %v1583_v62 = vmul.f32 0.01, %v1479_v27  ;;  %v3804_v13 = vmax.f32 %v3290_v0, %v3296_v12  ;;  %v1610_v26 = vsel %vm1546_vm15, %v1458_v23, %v1578_v28  ;;  %v3612_v0 = vpop.f32.mrf.mxu0 }
 0x144   : > { %v2090_v35 = vmax.f32 %v3803_v29, %v2058_v17  ;;  %v1896_v48 = vadd.f32 %v3553_v2, %v3521_v20  ;;  %v1471_v54 = vadd.f32 %v3553_v2, %v3523_v11  ;;  %v2027_v7 = vsel %vm1963_vm0, %v1875_v9, %v1995_v53 }
 0x145   : > { %v2093_v6 = vmax.f32 %v3804_v13, %v2061_v34  ;;  %v1615_v49 = vsel %vm1551_vm1, %v1479_v27, %v1583_v62  ;;  %v1888_v60 = vadd.f32 %v3553_v2, %v3528_v37  ;;  %v1482_v31 = vadd.f32 %v3553_v2, %v3536_v44  ;;  %v1906_v44 = vpop.f32.mrf.mxu1  ;;  %v2843_v59 = vpop.f32.mrf.mxu0 }
 0x146   : > { %v2059_v50 = vmax.f32 %v1610_v26, %v2027_v7  ;;  %vm1968_vm2 = vcmp.ge.f32.partialorder %v1896_v48, 0.0  ;;  %v2000_v20 = vmul.f32 0.01, %v1896_v48  ;;  %vm1549_vm3 = vcmp.ge.f32.partialorder %v1471_v54, 0.0 }
 0x147   : > { %v2612_v12 = vpack.c.bf16 %v2093_v6, %v2092_v40  ;;  %v1581_v4 = vmul.f32 0.01, %v1471_v54  ;;  %vm1966_vm4 = vcmp.ge.f32.partialorder %v1888_v60, 0.0  ;;  %v1998_v11 = vmul.f32 0.01, %v1888_v60  ;;  %v1502_v24 = vpop.f32.mrf.mxu0 }
 0x148   : > { %v3807_v61 = vmax.f32 %v3805_v56, %v3806_v47  ;;  %v2032_v21 = vsel %vm1968_vm2, %v1896_v48, %v2000_v20  ;;  %vm1552_vm5 = vcmp.ge.f32.partialorder %v1482_v31, 0.0  ;;  %v1584_v37 = vmul.f32 0.01, %v1482_v31  ;;  %v3820_v47 = vld [vmem:[#allocation12_spill] sm:$0xff] }
 0x149   : > { %2660 = vst [vmem:[%s3469_s22 + $0x38] sm:$0xff] %v2612_v12   ;;  %v2064_v39 = vmax.f32 %v1615_v49, %v2032_v21  ;;  %v1613_v15 = vsel %vm1549_vm3, %v1471_v54, %v1581_v4  ;;  %v2030_v14 = vsel %vm1966_vm4, %v1888_v60, %v1998_v11  ;;  %v1899_v43 = vadd.f32 %v3553_v2, %v3542_v52  ;;  %v2844_v49 = vpop.f32.mrf.mxu0 }
 0x14a   : > { %v2091_v38 = vmax.f32 %v3807_v61, %v2059_v50  ;;  %v2062_v46 = vmax.f32 %v1613_v15, %v2030_v14  ;;  %v1616_v5 = vsel %vm1552_vm5, %v1482_v31, %v1584_v37  ;;  %v1474_v57 = vadd.f32 %v3553_v2, %v3544_v22  ;;  %v2879_v22 = vpop.f32.mrf.mxu1  ;;  %v3818_v31 = vld [vmem:[#allocation11_spill] sm:$0xff]  ;;  %v3821_v61 = vld [vmem:[#allocation13_spill] sm:$0xff] }
 0x14b   : > { %v3810_v41 = vmax.f32 %v3808_v63, %v3809_v18  ;;  %vm1969_vm6 = vcmp.ge.f32.partialorder %v1899_v43, 0.0  ;;  %v2001_v16 = vmul.f32 0.01, %v1899_v43  ;;  %v1891_v42 = vadd.f32 %v3553_v2, %v3559_v51 }
 0x14c   : > { %v2607_v36 = vpack.c.bf16 %v2091_v38, %v2090_v35  ;;  %v3813_v52 = vmax.f32 %v3811_v32, %v3812_v19  ;;  %vm1550_vm7 = vcmp.ge.f32.partialorder %v1474_v57, 0.0  ;;  %v1582_v40 = vmul.f32 0.01, %v1474_v57  ;;  %v3814_v35 = vld [vmem:[#allocation8_spill] sm:$0xff]  ;;  %v1919_v26 = vpop.f32.mrf.mxu1 }
 0x14d   : > { %v2096_v8 = vmax.f32 %v3810_v41, %v2064_v39  ;;  %v1495_v58 = vadd.f32 %v3553_v2, %v3563_v55  ;;  %v2033_v23 = vsel %vm1969_vm6, %v1899_v43, %v2001_v16  ;;  %vm1967_vm8 = vcmp.ge.f32.partialorder %v1891_v42, 0.0  ;;  %v3815_v55 = vld [vmem:[#allocation9_spill] sm:$0xff]  ;;  %v3824_v41 = vld [vmem:[#allocation15_spill] sm:$0xff] }
 0x14e   : > { %2659 = vst [vmem:[%s3469_s22 + $0x30] sm:$0xff] %v2607_v36   ;;  %v2094_v30 = vmax.f32 %v3813_v52, %v2062_v46  ;;  %v1999_v9 = vmul.f32 0.01, %v1891_v42  ;;  %v1912_v17 = vadd.f32 %v3553_v2, %v3575_v10  ;;  %v2065_v1 = vmax.f32 %v1616_v5, %v2033_v23  ;;  %v2880_v39 = vpop.f32.mrf.mxu1  ;;  %v1505_v46 = vpop.f32.mrf.mxu0 }
 0x14f   : > { %v1614_v51 = vsel %vm1550_vm7, %v1474_v57, %v1582_v40  ;;  %vm1555_vm9 = vcmp.ge.f32.partialorder %v1495_v58, 0.0  ;;  %v1587_v27 = vmul.f32 0.01, %v1495_v58  ;;  %v1487_v29 = vadd.f32 %v3553_v2, %v3579_v25  ;;  %v3817_v25 = vld [vmem:[#allocation10_spill] sm:$0xff] }
 0x150   : > { %v2031_v34 = vsel %vm1967_vm8, %v1891_v42, %v1999_v9  ;;  %vm1972_vm10 = vcmp.ge.f32.partialorder %v1912_v17, 0.0  ;;  %v2004_v28 = vmul.f32 0.01, %v1912_v17  ;;  %v3816_v53 = vmax.f32 %v3814_v35, %v3815_v55  ;;  %v1922_v32 = vpop.f32.mrf.mxu1  ;;  %v2847_v40 = vpop.f32.mrf.mxu0 }
 0x151   : > { %v2063_v13 = vmax.f32 %v1614_v51, %v2031_v34  ;;  %v1619_v6 = vsel %vm1555_vm9, %v1495_v58, %v1587_v27  ;;  %v1904_v10 = vadd.f32 %v3553_v2, %v3590_v3  ;;  %vm1553_vm11 = vcmp.ge.f32.partialorder %v1487_v29, 0.0 }
 0x152   : > { %v2097_v62 = vmax.f32 %v3816_v53, %v2065_v1  ;;  %v2036_v48 = vsel %vm1972_vm10, %v1912_v17, %v2004_v28  ;;  %v1585_v54 = vmul.f32 0.01, %v1487_v29  ;;  %v1498_v7 = vadd.f32 %v3553_v2, %v3594_v33  ;;  %v3826_v17 = vld [vmem:[#allocation16_spill] sm:$0xff]  ;;  %v3827_v1 = vld [vmem:[#allocation17_spill] sm:$0xff]  ;;  %v3829_v28 = vld [vmem:[#allocation18_spill] sm:$0xff] }
 0x153   : > { %v3819_v12 = vmax.f32 %v3817_v25, %v3818_v31  ;;  %v2068_v20 = vmax.f32 %v1619_v6, %v2036_v48  ;;  %vm1970_vm12 = vcmp.ge.f32.partialorder %v1904_v10, 0.0  ;;  %v2002_v11 = vmul.f32 0.01, %v1904_v10  ;;  %v3832_v25 = vld [vmem:[#allocation20_spill] sm:$0xff]  ;;  %v3833_v31 = vld [vmem:[#allocation21_spill] sm:$0xff] }
 0x154   : > { %v2622_v60 = vpack.c.bf16 %v2097_v62, %v2096_v8  ;;  %v1617_v4 = vsel %vm1553_vm11, %v1487_v29, %v1585_v54  ;;  %vm1556_vm13 = vcmp.ge.f32.partialorder %v1498_v7, 0.0  ;;  %v1588_v3 = vmul.f32 0.01, %v1498_v7  ;;  %v3830_v29 = vld [vmem:[#allocation19_spill] sm:$0xff]  ;;  %v1518_v54 = vpop.f32.mrf.mxu0 }
 0x155   : > { %v2095_v50 = vmax.f32 %v3819_v12, %v2063_v13  ;;  %v3822_v38 = vmax.f32 %v3820_v47, %v3821_v61  ;;  %v1915_v33 = vadd.f32 %v3553_v2, %v3606_v45  ;;  %v1490_v37 = vadd.f32 %v3553_v2, %v3612_v0  ;;  %v3823_v45 = vld [vmem:[#allocation14_spill] sm:$0xff]  ;;  %v2883_v13 = vpop.f32.mrf.mxu1 }
 0x156   : > { %2662 = vst [vmem:[%s3469_s22 + $0x48] sm:$0xff] %v2622_v60   ;;  %v2034_v15 = vsel %vm1970_vm12, %v1904_v10, %v2002_v11  ;;  %v1620_v14 = vsel %vm1556_vm13, %v1498_v7, %v1588_v3  ;;  %v1907_v43 = vadd.f32 %v3553_v2, %v1906_v44  ;;  %v1511_v36 = vadd.f32 %v3553_v2, %v2843_v59 }
 0x157   : > { %v2617_v56 = vpack.c.bf16 %v2095_v50, %v2094_v30  ;;  %v2100_v21 = vmax.f32 %v3822_v38, %v2068_v20  ;;  %v2066_v5 = vmax.f32 %v1617_v4, %v2034_v15  ;;  %vm1973_vm14 = vcmp.ge.f32.partialorder %v1915_v33, 0.0  ;;  %v1935_v47 = vpop.f32.mrf.mxu1  ;;  %v3835_v15 = vld [vmem:[#allocation22_spill] sm:$0xff] }
 0x158   : > { %v2005_v57 = vmul.f32 0.01, %v1915_v33  ;;  %vm1554_vm15 = vcmp.ge.f32.partialorder %v1490_v37, 0.0  ;;  %v1586_v63 = vmul.f32 0.01, %v1490_v37  ;;  %vm1971_vm0 = vcmp.ge.f32.partialorder %v1907_v43, 0.0 }
 0x159   : > { %2661 = vst [vmem:[%s3469_s22 + $0x40] sm:$0xff] %v2617_v56   ;;  %v2003_v18 = vmul.f32 0.01, %v1907_v43  ;;  %vm1559_vm1 = vcmp.ge.f32.partialorder %v1511_v36, 0.0  ;;  %v3825_v0 = vmax.f32 %v3823_v45, %v3824_v41  ;;  %v1591_v42 = vmul.f32 0.01, %v1511_v36 }
 0x15a   : > { %v2037_v16 = vsel %vm1973_vm14, %v1915_v33, %v2005_v57  ;;  %v1928_v44 = vadd.f32 %v3553_v2, %v2879_v22  ;;  %v1618_v19 = vsel %vm1554_vm15, %v1490_v37, %v1586_v63  ;;  %v1503_v30 = vadd.f32 %v3553_v2, %v1502_v24  ;;  %v2848_v33 = vpop.f32.mrf.mxu0  ;;  %v3838_v63 = vld [vmem:[#allocation24_spill] sm:$0xff] }
 0x15b   : > { %v2098_v8 = vmax.f32 %v3825_v0, %v2066_v5  ;;  %v2069_v59 = vmax.f32 %v1620_v14, %v2037_v16  ;;  %v2035_v52 = vsel %vm1971_vm0, %v1907_v43, %v2003_v18  ;;  %v1623_v23 = vsel %vm1559_vm1, %v1511_v36, %v1591_v42  ;;  %v3836_v14 = vld [vmem:[#allocation23_spill] sm:$0xff]  ;;  %v3839_v18 = vld [vmem:[#allocation25_spill] sm:$0xff]  ;;  %v2884_v42 = vpop.f32.mrf.mxu1 }
 0x15c   : > { %v2067_v58 = vmax.f32 %v1618_v19, %v2035_v52  ;;  %vm1976_vm2 = vcmp.ge.f32.partialorder %v1928_v44, 0.0  ;;  %v2008_v9 = vmul.f32 0.01, %v1928_v44  ;;  %v3828_v51 = vmax.f32 %v3826_v17, %v3827_v1  ;;  %v1521_v19 = vpop.f32.mrf.mxu0 }
 0x15d   : > { %vm1557_vm3 = vcmp.ge.f32.partialorder %v1503_v30, 0.0  ;;  %v1589_v34 = vmul.f32 0.01, %v1503_v30  ;;  %v1920_v22 = vadd.f32 %v3553_v2, %v1919_v26  ;;  %v3831_v35 = vmax.f32 %v3829_v28, %v3830_v29 }
 0x15e   : > { %v2101_v27 = vmax.f32 %v3828_v51, %v2069_v59  ;;  %v2040_v53 = vsel %vm1976_vm2, %v1928_v44, %v2008_v9  ;;  %v1514_v24 = vadd.f32 %v3553_v2, %v2844_v49  ;;  %v1931_v62 = vadd.f32 %v3553_v2, %v2880_v39 }
 0x15f   : > { %v2099_v55 = vmax.f32 %v3831_v35, %v2067_v58  ;;  %v2072_v10 = vmax.f32 %v1623_v23, %v2040_v53  ;;  %v1621_v48 = vsel %vm1557_vm3, %v1503_v30, %v1589_v34  ;;  %vm1974_vm4 = vcmp.ge.f32.partialorder %v1920_v22, 0.0  ;;  %v3842_v58 = vld [vmem:[#allocation27_spill] sm:$0xff] }
 0x160   : > { %v2632_v6 = vpack.c.bf16 %v2101_v27, %v2100_v21  ;;  %v2006_v60 = vmul.f32 0.01, %v1920_v22  ;;  %vm1560_vm5 = vcmp.ge.f32.partialorder %v1514_v24, 0.0  ;;  %v1592_v26 = vmul.f32 0.01, %v1514_v24 }
 0x161   : > { %v2627_v7 = vpack.c.bf16 %v2099_v55, %v2098_v8  ;;  %v3834_v12 = vmax.f32 %v3832_v25, %v3833_v31  ;;  %vm1977_vm6 = vcmp.ge.f32.partialorder %v1931_v62, 0.0  ;;  %v2009_v49 = vmul.f32 0.01, %v1931_v62  ;;  %v3845_v25 = vld [vmem:[#allocation29_spill] sm:$0xff] }
 0x162   : > { %2664 = vst [vmem:[%s3469_s22 + $0x58] sm:$0xff] %v2632_v6   ;;  %v1506_v20 = vadd.f32 %v3553_v2, %v1505_v46  ;;  %v2038_v4 = vsel %vm1974_vm4, %v1920_v22, %v2006_v60  ;;  %v1624_v11 = vsel %vm1560_vm5, %v1514_v24, %v1592_v26  ;;  %v1923_v3 = vadd.f32 %v3553_v2, %v1922_v32  ;;  %v1938_v22 = vpop.f32.mrf.mxu1  ;;  %v3844_v26 = vld [vmem:[#allocation28_spill] sm:$0xff] }
 0x163   : > { %v2104_v50 = vmax.f32 %v3834_v12, %v2072_v10  ;;  %2663 = vst [vmem:[%s3469_s22 + $0x50] sm:$0xff] %v2627_v7   ;;  %v1527_v56 = vadd.f32 %v3553_v2, %v2847_v40  ;;  %v2070_v61 = vmax.f32 %v1621_v48, %v2038_v4  ;;  %v2041_v38 = vsel %vm1977_vm6, %v1931_v62, %v2009_v49  ;;  %v3841_v40 = vld [vmem:[#allocation26_spill] sm:$0xff]  ;;  %v3848_v49 = vld [vmem:[#allocation33_spill] sm:$0xff] }
 0x164   : > { %vm1558_vm7 = vcmp.ge.f32.partialorder %v1506_v20, 0.0  ;;  %v1590_v21 = vmul.f32 0.01, %v1506_v20  ;;  %v2073_v37 = vmax.f32 %v1624_v11, %v2041_v38  ;;  %vm1975_vm8 = vcmp.ge.f32.partialorder %v1923_v3, 0.0 }
 0x165   : > { %v2007_v39 = vmul.f32 0.01, %v1923_v3  ;;  %vm1563_vm9 = vcmp.ge.f32.partialorder %v1527_v56, 0.0  ;;  %v3837_v43 = vmax.f32 %v3835_v15, %v3836_v14  ;;  %v1595_v5 = vmul.f32 0.01, %v1527_v56 }
 0x166   : > { %v1622_v46 = vsel %vm1558_vm7, %v1506_v20, %v1590_v21  ;;  %v1944_v57 = vadd.f32 %v3553_v2, %v2883_v13  ;;  %v3840_v45 = vmax.f32 %v3838_v63, %v3839_v18  ;;  %v1519_v8 = vadd.f32 %v3553_v2, %v1518_v54  ;;  %v3853_v21 = vld [vmem:[#allocation34_spill] sm:$0xff] }
 0x167   : > { %v2102_v36 = vmax.f32 %v3837_v43, %v2070_v61  ;;  %v2039_v0 = vsel %vm1975_vm8, %v1923_v3, %v2007_v39  ;;  %v1936_v16 = vadd.f32 %v3553_v2, %v1935_v47  ;;  %v1627_v32 = vsel %vm1563_vm9, %v1527_v56, %v1595_v5  ;;  %v3850_v47 = vld [vmem:[#allocation30_spill] sm:$0xff] }
 0x168   : > { %v2105_v41 = vmax.f32 %v3840_v45, %v2073_v37  ;;  %v2071_v44 = vmax.f32 %v1622_v46, %v2039_v0  ;;  %vm1980_vm10 = vcmp.ge.f32.partialorder %v1944_v57, 0.0  ;;  %v2012_v59 = vmul.f32 0.01, %v1944_v57 }
 0x169   : > { %vm1561_vm11 = vcmp.ge.f32.partialorder %v1519_v8, 0.0  ;;  %v1593_v30 = vmul.f32 0.01, %v1519_v8  ;;  %vm1978_vm12 = vcmp.ge.f32.partialorder %v1936_v16, 0.0  ;;  %v3843_v23 = vmax.f32 %v3841_v40, %v3842_v58 }
 0x16a   : > { %v2642_v52 = vpack.c.bf16 %v2105_v41, %v2104_v50  ;;  %v2044_v17 = vsel %vm1980_vm10, %v1944_v57, %v2012_v59  ;;  %v2010_v1 = vmul.f32 0.01, %v1936_v16  ;;  %v1530_v51 = vadd.f32 %v3553_v2, %v2848_v33  ;;  %v3847_v50 = vld [vmem:[#allocation32_spill] sm:$0xff]  ;;  %v3854_v33 = vld [vmem:[#allocation35_spill] sm:$0xff] }
 0x16b   : > { %v2103_v9 = vmax.f32 %v3843_v23, %v2071_v44  ;;  %v1947_v27 = vadd.f32 %v3553_v2, %v2884_v42  ;;  %v1522_v34 = vadd.f32 %v3553_v2, %v1521_v19  ;;  %v2076_v29 = vmax.f32 %v1627_v32, %v2044_v17 }
 0x16c   : > { %2666 = vst [vmem:[%s3469_s22 + $0x68] sm:$0xff] %v2642_v52   ;;  %vm1564_vm13 = vcmp.ge.f32.partialorder %v1530_v51, 0.0  ;;  %v1596_v35 = vmul.f32 0.01, %v1530_v51  ;;  %v1625_v55 = vsel %vm1561_vm11, %v1519_v8, %v1593_v30  ;;  %v2042_v53 = vsel %vm1978_vm12, %v1936_v16, %v2010_v1 }
 0x16d   : > { %v2637_v28 = vpack.c.bf16 %v2103_v9, %v2102_v36  ;;  %vm1981_vm14 = vcmp.ge.f32.partialorder %v1947_v27, 0.0  ;;  %v2013_v24 = vmul.f32 0.01, %v1947_v27  ;;  %vm1562_vm15 = vcmp.ge.f32.partialorder %v1522_v34, 0.0 }
 0x16e   : > { %v1628_v62 = vsel %vm1564_vm13, %v1530_v51, %v1596_v35  ;;  %v1594_v13 = vmul.f32 0.01, %v1522_v34  ;;  %v1939_v6 = vadd.f32 %v3553_v2, %v1938_v22  ;;  %v2074_v60 = vmax.f32 %v1625_v55, %v2042_v53  ;;  %v3851_v2 = vld [vmem:[#allocation31_spill] sm:$0xff] }
 0x16f   : > { %2665 = vst [vmem:[%s3469_s22 + $0x60] sm:$0xff] %v2637_v28   ;;  %v2045_v10 = vsel %vm1981_vm14, %v1947_v27, %v2013_v24  ;;  %v3846_v31 = vmax.f32 %v3844_v26, %v3845_v25  ;;  %v3849_v20 = vmax.f32 %v3847_v50, %v3848_v49  ;;  %v3852_v61 = vmax.f32 %v3850_v47, %v3851_v2 }
 0x170   : > { %v2077_v48 = vmax.f32 %v1628_v62, %v2045_v10  ;;  %v1626_v54 = vsel %vm1562_vm15, %v1522_v34, %v1594_v13  ;;  %vm1979_vm0 = vcmp.ge.f32.partialorder %v1939_v6, 0.0  ;;  %v2011_v7 = vmul.f32 0.01, %v1939_v6 }
 0x171   : > { %v2108_v12 = vmax.f32 %v3846_v31, %v2076_v29  ;;  %v2106_v38 = vmax.f32 %v3852_v61, %v2074_v60  ;;  %v3855_v37 = vmax.f32 %v3853_v21, %v3854_v33 }
 0x172   : > { %v2109_v4 = vmax.f32 %v3849_v20, %v2077_v48  ;;  %v2043_v11 = vsel %vm1979_vm0, %v1939_v6, %v2011_v7 }
 0x173   : > { %v2075_v3 = vmax.f32 %v1626_v54, %v2043_v11 }
 0x174   : > { %v2652_v56 = vpack.c.bf16 %v2109_v4, %v2108_v12 }
 0x175   : > { %v2107_v39 = vmax.f32 %v3855_v37, %v2075_v3 }
 0x176   : > { %2668 = vst [vmem:[%s3469_s22 + $0x78] sm:$0xff] %v2652_v56  }
 0x177   : > { %v2647_v15 = vpack.c.bf16 %v2107_v39, %v2106_v38 }
 0x179   : > { %2667 = vst [vmem:[%s3469_s22 + $0x70] sm:$0xff] %v2647_v15  }
 0x17a PF: > { %s16_s21 = sadd.s32 1, %s2966_s21  }
 0x17b   : > { %p13_p4 = scmp.ge.s32.totalorder %s16_s21, 4  }
 0x17d   :  { %15 = sbr.rel (!%p13_p4) target bundleno = 1 (0x1), region = 83 }

// kernel: simple_cnn_forward.5
= control target key start
LH: loop header
LB: loop body
LE: loop exit
PB: predicated region body
PF: predicated region fallthrough
CT: control target
= control target key end

     0   :  { %s2115_s21 = smov 0   ;;  %s2579_s0 = inlined_call_operand.vmem [shape: bf16[128,288], index: 0, kind: input, shape index: {}]   ;;  %s2580_s1 = inlined_call_operand.vmem [shape: bf16[128,288], index: 1, kind: input, shape index: {}]   ;;  %s2581_s2 = inlined_call_operand.vmem [shape: bf16[128,288], index: 2, kind: input, shape index: {}]   ;;  %s2582_s3 = inlined_call_operand.vmem [shape: bf16[128,288], index: 3, kind: input, shape index: {}]   ;;  %s2583_s4 = inlined_call_operand.vmem [shape: bf16[288,128], index: 4, kind: input, shape index: {}]   ;;  %s2584_s5 = inlined_call_operand.vmem [shape: f32[1,128], index: 5, kind: input, shape index: {}]   ;;  %s2585_s6 = inlined_call_operand.vmem [shape: bf16[128,128], index: 6, kind: output, shape index: {}]  }
   0x1 LB: > { %s1610_s22 = sadd.s32 4294967295, %s2078_s21   ;;  %p1614_p0 = scmp.ge.s32.totalorder %s2078_s21, 1  ;;  %s2078_s21 = sphi %s2115_s21, %s16_s21  }
   0x2   : > { %p250_p1 = scmp.lt.s32.totalorder %s2078_s21, 3 }
   0x4   : > { %p251_p2 = pnand %p1614_p0, %p250_p1 }
   0x5   : > { %s1615_s25 = sshll.u32 (!%p251_p2), %s1610_s22, 3 }
   0x6   : > { %254 = sbr.rel (%p251_p2) target bundleno = 347 (0x15b), region = 44  ;;  %p300_p3 = scmp.lt.s32.totalorder (!%p251_p2), %s1615_s25, 15 }
   0xb   : > { %v2126_v0 = vld [vmem:[%s2583_s4 + $0x78] sm:$0xff]   ;;  %v2138_v2 = vld [vmem:[%s2583_s4 + $0x70] sm:$0xff]   ;;  %v2152_v4 = vld [vmem:[%s2583_s4 + $0x68] sm:$0xff]   ;;  %s2587_s25 = smov (!%p300_p3, %s1615_s25), 15  ;;  %vm561_vm0 = vcmask 261120  }
   0xc   : > { %v2131_v1 = vld [vmem:[%s2583_s4 + $0x38] sm:$0xff]   ;;  %1749 = vmatprep.subr.bf16.mxu0 %v2126_v0  ;;  %1795 = vmatprep.subr.bf16.mxu1 %v2126_v0  ;;  %v2145_v3 = vld [vmem:[%s2583_s4 + $0x30] sm:$0xff]   ;;  %v2161_v5 = vld [vmem:[%s2583_s4 + $0x28] sm:$0xff]   ;;  %s2171_s14 = smul.u32 12, %s2587_s25 }
   0xd   : > { %1750 = vmatpush3.bf16.msra.mxu0 %v2131_v1  ;;  %1796 = vmatpush3.bf16.msra.mxu1 %v2131_v1  ;;  %v2168_v6 = vld [vmem:[%s2583_s4 + $0x60] sm:$0xff]   ;;  %v2185_v8 = vld [vmem:[%s2583_s4 + $0x58] sm:$0xff]   ;;  %v2211_v10 = vld [vmem:[%s2583_s4 + $0x50] sm:$0xff]  }
   0xe   : > { %1751 = vmatprep.subr.bf16.mxu0 %v2138_v2  ;;  %1797 = vmatprep.subr.bf16.mxu1 %v2138_v2  ;;  %v2178_v7 = vld [vmem:[%s2583_s4 + $0x20] sm:$0xff]   ;;  %s2191_s22 = scalar_lea.vmem %s2579_s0, %s2171_s14  ;;  %v2198_v9 = vld [vmem:[%s2583_s4 + $0x18] sm:$0xff]   ;;  %s2204_s28 = scalar_lea.vmem %s2580_s1, %s2171_s14  ;;  %v2220_v13 = vld [vmem:[%s2583_s4 + $0x10] sm:$0xff]  }
   0xf   : > { %v2008_v11 = vld [vmem:[%s2191_s22 + $0x4] ss:$12 sps:$4 sm:$0xff]   ;;  %v2227_v14 = vld [vmem:[%s2583_s4 + $0x48] sm:$0xff]   ;;  %s2261_s24 = scalar_lea.vmem %s2581_s2, %s2171_s14  ;;  %v2019_v26 = vld [vmem:[%s2191_s22 + $0x34] ss:$12 sps:$4 sm:$0xff]   ;;  %s2292_s7 = scalar_lea.vmem %s2582_s3, %s2171_s14 }
  0x10   : > { %v2011_v12 = vld [vmem:[%s2204_s28 + $0x4] ss:$12 sps:$4 sm:$0xff]   ;;  %606 = vmatprep.mubr.bf16.mxu0 %v2008_v11  ;;  %v2234_v15 = vld [vmem:[%s2583_s4 + $0x8] sm:$0xff]   ;;  %v2021_v27 = vld [vmem:[%s2204_s28 + $0x34] ss:$12 sps:$4 sm:$0xff]  }
  0x11   : > { %1752 = vmatpush3.bf16.msra.mxu0 %v2145_v3  ;;  %1798 = vmatpush3.bf16.msra.mxu1 %v2145_v3  ;;  %v2241_v16 = vld [vmem:[%s2583_s4 + $0x40] sm:$0xff]   ;;  %v2255_v18 = vld [vmem:[%s2583_s4 + $0x88] sm:$0xff]   ;;  %v2023_v28 = vld [vmem:[%s2191_s22 + $0x30] ss:$12 sps:$4 sm:$0xff]  }
  0x12   : > { %1753 = vmatprep.subr.bf16.mxu0 %v2152_v4  ;;  %1799 = vmatprep.subr.bf16.mxu1 %v2152_v4  ;;  %v2248_v17 = vld [vmem:[%s2583_s4] sm:$0xff]   ;;  %v2013_v21 = vld [vmem:[%s2191_s22 + $0x1c] ss:$12 sps:$4 sm:$0xff]   ;;  %v2026_v30 = vld [vmem:[%s2191_s22 + $0x4c] ss:$12 sps:$4 sm:$0xff]  }
  0x13   : > { %848 = vmatprep.mubr.bf16.mxu1 %v2011_v12  ;;  %v2006_v19 = vld [vmem:[%s2191_s22] ss:$12 sps:$4 sm:$0xff]   ;;  %v2015_v22 = vld [vmem:[%s2204_s28 + $0x1c] ss:$12 sps:$4 sm:$0xff]   ;;  %v2017_v24 = vld [vmem:[%s2191_s22 + $0x18] ss:$12 sps:$4 sm:$0xff]  }
  0x14   : > { %v2009_v20 = vld [vmem:[%s2204_s28] ss:$12 sps:$4 sm:$0xff]   ;;  %v2018_v25 = vld [vmem:[%s2204_s28 + $0x18] ss:$12 sps:$4 sm:$0xff]   ;;  %v2024_v29 = vld [vmem:[%s2204_s28 + $0x30] ss:$12 sps:$4 sm:$0xff]  }
  0x15   : > { %1754 = vmatpush3.bf16.msra.mxu0 %v2161_v5  ;;  %1800 = vmatpush3.bf16.msra.mxu1 %v2161_v5  ;;  %v2274_v23 = vld [vmem:[%s2583_s4 + $0x80] sm:$0xff]   ;;  %v2028_v31 = vld [vmem:[%s2204_s28 + $0x4c] ss:$12 sps:$4 sm:$0xff]   ;;  %v2030_v32 = vld [vmem:[%s2191_s22 + $0x48] ss:$12 sps:$4 sm:$0xff]  }
  0x16   : > { %1755 = vmatprep.subr.bf16.mxu0 %v2168_v6  ;;  %1801 = vmatprep.subr.bf16.mxu1 %v2168_v6  ;;  %v2031_v33 = vld [vmem:[%s2204_s28 + $0x48] ss:$12 sps:$4 sm:$0xff]   ;;  %v2035_v35 = vld [vmem:[%s2261_s24 + $0x4] ss:$12 sps:$4 sm:$0xff]   ;;  %v2033_v36 = vld [vmem:[%s2261_s24] ss:$12 sps:$4 sm:$0xff]  }
  0x17   : > { %v2032_v34 = vld [vmem:[%s2191_s22 + $0x8] ss:$12 sps:$4 sm:$0xff]   ;;  %v2036_v37 = vld [vmem:[%s2191_s22 + $0x20] ss:$12 sps:$4 sm:$0xff]   ;;  %v2037_v38 = vld [vmem:[%s2191_s22 + $0x38] ss:$12 sps:$4 sm:$0xff]  }
  0x18   : > { %v2038_v39 = vld [vmem:[%s2261_s24 + $0x1c] ss:$12 sps:$4 sm:$0xff]   ;;  %v2041_v41 = vld [vmem:[%s2261_s24 + $0x18] ss:$12 sps:$4 sm:$0xff]   ;;  %v2043_v43 = vld [vmem:[%s2261_s24 + $0x34] ss:$12 sps:$4 sm:$0xff]  }
  0x19   : > { %1756 = vmatpush3.bf16.msra.mxu0 %v2178_v7  ;;  %1802 = vmatpush3.bf16.msra.mxu1 %v2178_v7  ;;  %v2040_v40 = vld [vmem:[%s2191_s22 + $0x50] ss:$12 sps:$4 sm:$0xff]   ;;  %v2042_v42 = vld [vmem:[%s2204_s28 + $0x8] ss:$12 sps:$4 sm:$0xff]   ;;  %v2045_v44 = vld [vmem:[%s2204_s28 + $0x20] ss:$12 sps:$4 sm:$0xff]  }
  0x1a   : > { %1757 = vmatprep.subr.bf16.mxu0 %v2185_v8  ;;  %1803 = vmatprep.subr.bf16.mxu1 %v2185_v8  ;;  %v2046_v45 = vld [vmem:[%s2261_s24 + $0x30] ss:$12 sps:$4 sm:$0xff]   ;;  %v2047_v46 = vld [vmem:[%s2204_s28 + $0x38] ss:$12 sps:$4 sm:$0xff]   ;;  %v2051_v49 = vld [vmem:[%s2261_s24 + $0x48] ss:$12 sps:$4 sm:$0xff]  }
  0x1b   : > { %v2048_v47 = vld [vmem:[%s2261_s24 + $0x4c] ss:$12 sps:$4 sm:$0xff]   ;;  %v2050_v48 = vld [vmem:[%s2204_s28 + $0x50] ss:$12 sps:$4 sm:$0xff]   ;;  %v2052_v50 = vld [vmem:[%s2261_s24 + $0x8] ss:$12 sps:$4 sm:$0xff]  }
  0x1c   : > { %v2055_v51 = vld [vmem:[%s2292_s7 + $0x4] ss:$12 sps:$4 sm:$0xff]   ;;  %v2053_v52 = vld [vmem:[%s2292_s7] ss:$12 sps:$4 sm:$0xff]   ;;  %v2058_v55 = vld [vmem:[%s2292_s7 + $0x1c] ss:$12 sps:$4 sm:$0xff]  }
  0x1d   : > { %1758 = vmatpush3.bf16.msra.mxu0 %v2198_v9  ;;  %1804 = vmatpush3.bf16.msra.mxu1 %v2198_v9  ;;  %v2056_v53 = vld [vmem:[%s2261_s24 + $0x20] ss:$12 sps:$4 sm:$0xff]   ;;  %v2057_v54 = vld [vmem:[%s2261_s24 + $0x38] ss:$12 sps:$4 sm:$0xff]   ;;  %v2060_v56 = vld [vmem:[%s2261_s24 + $0x50] ss:$12 sps:$4 sm:$0xff]  }
  0x1e   : > { %1759 = vmatprep.subr.bf16.mxu0 %v2211_v10  ;;  %1805 = vmatprep.subr.bf16.mxu1 %v2211_v10  ;;  %v2061_v57 = vld [vmem:[%s2292_s7 + $0x18] ss:$12 sps:$4 sm:$0xff]   ;;  %v2062_v58 = vld [vmem:[%s2292_s7 + $0x34] ss:$12 sps:$4 sm:$0xff]   ;;  %v2065_v60 = vld [vmem:[%s2292_s7 + $0x30] ss:$12 sps:$4 sm:$0xff]  }
  0x1f   : > { %v2064_v59 = vld [vmem:[%s2292_s7 + $0x8] ss:$12 sps:$4 sm:$0xff]   ;;  %v2066_v61 = vld [vmem:[%s2292_s7 + $0x20] ss:$12 sps:$4 sm:$0xff]   ;;  %v2069_v63 = vld [vmem:[%s2292_s7 + $0x38] ss:$12 sps:$4 sm:$0xff]  }
  0x20   : > { %v2067_v62 = vld [vmem:[%s2292_s7 + $0x4c] ss:$12 sps:$4 sm:$0xff]   ;;  %s1624_s28 = sshll.u32 %s2587_s25, 2 }
  0x21   : > { %1760 = vmatpush3.bf16.msra.mxu0 %v2220_v13  ;;  %1806 = vmatpush3.bf16.msra.mxu1 %v2220_v13  ;;  %s2542_s9 = scalar_lea.vmem %s2585_s6, %s1624_s28 }
  0x22   : > { %1761 = vmatprep.subr.bf16.mxu0 %v2227_v14  ;;  %1807 = vmatprep.subr.bf16.mxu1 %v2227_v14 }
  0x25   : > { %1762 = vmatpush3.bf16.msra.mxu0 %v2234_v15  ;;  %1808 = vmatpush3.bf16.msra.mxu1 %v2234_v15 }
  0x26   : > { %1763 = vmatprep.subr.bf16.mxu0 %v2241_v16  ;;  %1809 = vmatprep.subr.bf16.mxu1 %v2241_v16 }
  0x29   : > { %1764 = vmatpush3.bf16.msra.mxu0 %v2248_v17  ;;  %1810 = vmatpush3.bf16.msra.mxu1 %v2248_v17 }
  0x2a   : > { %1841 = vmatprep.subr.bf16.mxu1 %v2126_v0  ;;  %1933 = vmatprep.subr.bf16.mxu0 %v2255_v18 }
  0x2c   : > { %607 = vmatmul.mubr.bf16.vlgmr.msra.gmra.mxu0 %v2006_v19  ;;  %849 = vmatmul.mubr.bf16.vlgmr.msra.gmra.mxu1 %v2009_v20 }
  0x2d   : > { %1842 = vmatpush3.bf16.msra.mxu1 %v2131_v1  ;;  %1934 = vmatpush3.bf16.msra.mxu0 %v2255_v18 }
  0x2e   : > { %1843 = vmatprep.subr.bf16.mxu1 %v2138_v2  ;;  %614 = vmatprep.mubr.bf16.mxu0 %v2013_v21 }
  0x2f   : > { %856 = vmatprep.mubr.bf16.mxu1 %v2015_v22  ;;  %1935 = vmatprep.subr.bf16.mxu0 %v2274_v23 }
  0x31   : > { %1844 = vmatpush3.bf16.msra.mxu1 %v2145_v3  ;;  %1936 = vmatpush3.bf16.msra.mxu0 %v2274_v23 }
  0x32   : > { %1845 = vmatprep.subr.bf16.mxu1 %v2152_v4  ;;  %1945 = vmatprep.subr.bf16.mxu0 %v2255_v18 }
  0x34   : > { %615 = vmatmul.mubr.bf16.gmra.mxu0 %v2017_v24  ;;  %857 = vmatmul.mubr.bf16.gmra.mxu1 %v2018_v25 }
  0x35   : > { %1846 = vmatpush3.bf16.msra.mxu1 %v2161_v5  ;;  %622 = vmatprep.mubr.bf16.mxu0 %v2019_v26 }
  0x36   : > { %1847 = vmatprep.subr.bf16.mxu1 %v2168_v6  ;;  %864 = vmatprep.mubr.bf16.mxu1 %v2021_v27 }
  0x39   : > { %1848 = vmatpush3.bf16.msra.mxu1 %v2178_v7 }
  0x3a   : > { %1849 = vmatprep.subr.bf16.mxu1 %v2185_v8 }
  0x3c   : > { %623 = vmatmul.mubr.bf16.gmra.mxu0 %v2023_v28  ;;  %865 = vmatmul.mubr.bf16.gmra.mxu1 %v2024_v29 }
  0x3d   : > { %1850 = vmatpush3.bf16.msra.mxu1 %v2198_v9  ;;  %630 = vmatprep.mubr.bf16.mxu0 %v2026_v30 }
  0x3e   : > { %1851 = vmatprep.subr.bf16.mxu1 %v2211_v10  ;;  %872 = vmatprep.mubr.bf16.mxu1 %v2028_v31 }
  0x41   : > { %1852 = vmatpush3.bf16.msra.mxu1 %v2220_v13 }
  0x42   : > { %1853 = vmatprep.subr.bf16.mxu1 %v2227_v14 }
  0x44   : > { %631 = vmatmul.mubr.bf16.gmra.mxu0 %v2030_v32  ;;  %873 = vmatmul.mubr.bf16.gmra.mxu1 %v2031_v33 }
  0x45   : > { %1854 = vmatpush3.bf16.msra.mxu1 %v2234_v15  ;;  %1937 = vmatprep.mubr.msk.bf16.mxu0 %vm561_vm0, %v2032_v34 }
  0x46   : > { %1855 = vmatprep.subr.bf16.mxu1 %v2241_v16  ;;  %1098 = vmatprep.mubr.bf16.mxu1 %v2035_v35 }
  0x49   : > { %1856 = vmatpush3.bf16.msra.mxu1 %v2248_v17 }
  0x4a   : > { %1887 = vmatprep.subr.bf16.mxu1 %v2126_v0  ;;  %v2070_v0 = vld [vmem:[%s2292_s7 + $0x48] ss:$12 sps:$4 sm:$0xff]  }
  0x4c   : > { %1938 = vmatmul.mubr.msk.bf16.vlgmr.msra.gmra.mxu0 %vm561_vm0, %v2036_v37  ;;  %1099 = vmatmul.mubr.bf16.vlgmr.msra.gmra.mxu1 %v2033_v36 }
  0x4d   : > { %1888 = vmatpush3.bf16.msra.mxu1 %v2131_v1  ;;  %1946 = vmatpush3.bf16.msra.mxu0 %v2255_v18  ;;  %v2071_v1 = vld [vmem:[%s2292_s7 + $0x50] ss:$12 sps:$4 sm:$0xff]  }
  0x4e   : > { %1889 = vmatprep.subr.bf16.mxu1 %v2138_v2  ;;  %1941 = vmatprep.mubr.msk.bf16.mxu0 %vm561_vm0, %v2037_v38 }
  0x4f   : > { %1106 = vmatprep.mubr.bf16.mxu1 %v2038_v39  ;;  %1947 = vmatprep.subr.bf16.mxu0 %v2274_v23 }
  0x51   : > { %1890 = vmatpush3.bf16.msra.mxu1 %v2145_v3  ;;  %1948 = vmatpush3.bf16.msra.mxu0 %v2274_v23 }
  0x52   : > { %1891 = vmatprep.subr.bf16.mxu1 %v2152_v4  ;;  %1957 = vmatprep.subr.bf16.mxu0 %v2255_v18 }
  0x54   : > { %1942 = vmatmul.mubr.msk.bf16.gmra.mxu0 %vm561_vm0, %v2040_v40  ;;  %1107 = vmatmul.mubr.bf16.gmra.mxu1 %v2041_v41 }
  0x55   : > { %1892 = vmatpush3.bf16.msra.mxu1 %v2161_v5  ;;  %1949 = vmatprep.mubr.msk.bf16.mxu0 %vm561_vm0, %v2042_v42 }
  0x56   : > { %1893 = vmatprep.subr.bf16.mxu1 %v2168_v6  ;;  %1114 = vmatprep.mubr.bf16.mxu1 %v2043_v43 }
  0x59   : > { %1894 = vmatpush3.bf16.msra.mxu1 %v2178_v7 }
  0x5a   : > { %1895 = vmatprep.subr.bf16.mxu1 %v2185_v8 }
  0x5c   : > { %1950 = vmatmul.mubr.msk.bf16.vlgmr.msra.gmra.mxu0 %vm561_vm0, %v2045_v44  ;;  %1115 = vmatmul.mubr.bf16.gmra.mxu1 %v2046_v45 }
  0x5d   : > { %1896 = vmatpush3.bf16.msra.mxu1 %v2198_v9  ;;  %1958 = vmatpush3.bf16.msra.mxu0 %v2255_v18 }
  0x5e   : > { %1897 = vmatprep.subr.bf16.mxu1 %v2211_v10  ;;  %1953 = vmatprep.mubr.msk.bf16.mxu0 %vm561_vm0, %v2047_v46 }
  0x5f   : > { %1122 = vmatprep.mubr.bf16.mxu1 %v2048_v47  ;;  %1959 = vmatprep.subr.bf16.mxu0 %v2274_v23 }
  0x61   : > { %1898 = vmatpush3.bf16.msra.mxu1 %v2220_v13  ;;  %1960 = vmatpush3.bf16.msra.mxu0 %v2274_v23 }
  0x62   : > { %1899 = vmatprep.subr.bf16.mxu1 %v2227_v14  ;;  %1969 = vmatprep.subr.bf16.mxu0 %v2255_v18 }
  0x64   : > { %1954 = vmatmul.mubr.msk.bf16.gmra.mxu0 %vm561_vm0, %v2050_v48  ;;  %1123 = vmatmul.mubr.bf16.gmra.mxu1 %v2051_v49 }
  0x65   : > { %1900 = vmatpush3.bf16.msra.mxu1 %v2234_v15  ;;  %1961 = vmatprep.mubr.msk.bf16.mxu0 %vm561_vm0, %v2052_v50 }
  0x66   : > { %1901 = vmatprep.subr.bf16.mxu1 %v2241_v16  ;;  %1340 = vmatprep.mubr.bf16.mxu1 %v2055_v51 }
  0x69   : > { %1902 = vmatpush3.bf16.msra.mxu1 %v2248_v17 }
  0x6c   : > { %1962 = vmatmul.mubr.msk.bf16.vlgmr.msra.gmra.mxu0 %vm561_vm0, %v2056_v53  ;;  %1341 = vmatmul.mubr.bf16.vlgmr.msra.gmra.mxu1 %v2053_v52 }
  0x6d   : > { %1970 = vmatpush3.bf16.msra.mxu0 %v2255_v18  ;;  %1965 = vmatprep.mubr.msk.bf16.mxu0 %vm561_vm0, %v2057_v54 }
  0x6e   : > { %1348 = vmatprep.mubr.bf16.mxu1 %v2058_v55  ;;  %1971 = vmatprep.subr.bf16.mxu0 %v2274_v23 }
  0x71   : > { %1972 = vmatpush3.bf16.msra.mxu0 %v2274_v23 }
  0x74   : > { %1966 = vmatmul.mubr.msk.bf16.gmra.mxu0 %vm561_vm0, %v2060_v56  ;;  %1349 = vmatmul.mubr.bf16.gmra.mxu1 %v2061_v57 }
  0x75   : > { %1356 = vmatprep.mubr.bf16.mxu1 %v2062_v58  ;;  %1973 = vmatprep.mubr.msk.bf16.mxu0 %vm561_vm0, %v2064_v59 }
  0x7c   : > { %1357 = vmatmul.mubr.bf16.gmra.mxu1 %v2065_v60  ;;  %1974 = vmatmul.mubr.msk.bf16.vlgmr.msra.gmra.mxu0 %vm561_vm0, %v2066_v61  ;;  %v2405_v60 = vld [vmem:[%s2584_s5] ss:$0 sm:$0xff] }
  0x7d   : > { %1364 = vmatprep.mubr.bf16.mxu1 %v2067_v62  ;;  %1977 = vmatprep.mubr.msk.bf16.mxu0 %vm561_vm0, %v2069_v63 }
  0x84   : > { %1365 = vmatmul.mubr.bf16.gmra.mxu1 %v2070_v0  ;;  %1978 = vmatmul.mubr.msk.bf16.gmra.mxu0 %vm561_vm0, %v2071_v1 }
  0xec   : > { %v1765_v2 = vpop.f32.mrf.mxu0  ;;  %v1811_v3 = vpop.f32.mrf.mxu1 }
  0xee   : > { %v1766_v4 = vpop.f32.mrf.mxu0  ;;  %v1812_v5 = vpop.f32.mrf.mxu1 }
  0xef   : > { %v1767_v6 = vadd.f32 %v1766_v4, %v1765_v2  ;;  %v2386_v7 = vadd.f32 %v1812_v5, %v1811_v3 }
  0xf0   : > { %v1768_v8 = vpop.f32.mrf.mxu0  ;;  %v1814_v9 = vpop.f32.mrf.mxu1 }
  0xf1   : > { %v609_v62 = vadd.f32 %v1767_v6, %v2405_v60  ;;  %v851_v6 = vadd.f32 %v2386_v7, %v2405_v60 }
  0xf2   : > { %v1769_v10 = vpop.f32.mrf.mxu0  ;;  %v1815_v11 = vpop.f32.mrf.mxu1 }
  0xf3   : > { %v1770_v12 = vadd.f32 %v1769_v10, %v1768_v8  ;;  %v2388_v13 = vadd.f32 %v1815_v11, %v1814_v9 }
  0xf4   : > { %v1771_v14 = vpop.f32.mrf.mxu0  ;;  %v1817_v15 = vpop.f32.mrf.mxu1 }
  0xf5   : > { %v612_v4 = vadd.f32 %v1770_v12, %v2405_v60 }
  0xf6   : > { %v1772_v16 = vpop.f32.mrf.mxu0  ;;  %v1818_v17 = vpop.f32.mrf.mxu1 }
  0xf7   : > { %v1773_v18 = vadd.f32 %v1772_v16, %v1771_v14  ;;  %v1819_v19 = vadd.f32 %v1818_v17, %v1817_v15  ;;  %v854_v15 = vadd.f32 %v2388_v13, %v2405_v60 }
  0xf8   : > { %v1774_v20 = vpop.f32.mrf.mxu0  ;;  %v1820_v21 = vpop.f32.mrf.mxu1 }
  0xf9   : > { %v617_v61 = vadd.f32 %v1773_v18, %v2405_v60  ;;  %v859_v17 = vadd.f32 %v1819_v19, %v2405_v60 }
  0xfa   : > { %v1775_v22 = vpop.f32.mrf.mxu0  ;;  %v1821_v23 = vpop.f32.mrf.mxu1 }
  0xfb   : > { %v1776_v24 = vadd.f32 %v1775_v22, %v1774_v20  ;;  %v1822_v25 = vadd.f32 %v1821_v23, %v1820_v21 }
  0xfc   : > { %v1777_v26 = vpop.f32.mrf.mxu0  ;;  %v1823_v27 = vpop.f32.mrf.mxu1 }
  0xfd   : > { %v620_v3 = vadd.f32 %v1776_v24, %v2405_v60  ;;  %v862_v12 = vadd.f32 %v1822_v25, %v2405_v60 }
  0xfe   : > { %v1778_v28 = vpop.f32.mrf.mxu0  ;;  %v1824_v29 = vpop.f32.mrf.mxu1 }
  0xff   : > { %v1779_v30 = vadd.f32 %v1778_v28, %v1777_v26  ;;  %v1825_v31 = vadd.f32 %v1824_v29, %v1823_v27 }
 0x100   : > { %v1780_v32 = vpop.f32.mrf.mxu0  ;;  %v1826_v33 = vpop.f32.mrf.mxu1 }
 0x101   : > { %v625_v16 = vadd.f32 %v1779_v30, %v2405_v60  ;;  %v867_v18 = vadd.f32 %v1825_v31, %v2405_v60 }
 0x102   : > { %v1781_v34 = vpop.f32.mrf.mxu0  ;;  %v1827_v35 = vpop.f32.mrf.mxu1 }
 0x103   : > { %v1782_v36 = vadd.f32 %v1781_v34, %v1780_v32  ;;  %v2390_v37 = vadd.f32 %v1827_v35, %v1826_v33 }
 0x104   : > { %v1783_v38 = vpop.f32.mrf.mxu0  ;;  %v1829_v39 = vpop.f32.mrf.mxu1 }
 0x105   : > { %v628_v23 = vadd.f32 %v1782_v36, %v2405_v60 }
 0x106   : > { %v1784_v40 = vpop.f32.mrf.mxu0  ;;  %v1830_v41 = vpop.f32.mrf.mxu1 }
 0x107   : > { %v1785_v42 = vadd.f32 %v1784_v40, %v1783_v38  ;;  %v1831_v43 = vadd.f32 %v1830_v41, %v1829_v39 }
 0x108   : > { %v1786_v44 = vpop.f32.mrf.mxu0  ;;  %v1832_v45 = vpop.f32.mrf.mxu1 }
 0x109   : > { %v633_v22 = vadd.f32 %v1785_v42, %v2405_v60  ;;  %v875_v13 = vadd.f32 %v1831_v43, %v2405_v60 }
 0x10a   : > { %v1787_v46 = vpop.f32.mrf.mxu0  ;;  %v1833_v47 = vpop.f32.mrf.mxu1 }
 0x10b   : > { %v1788_v48 = vadd.f32 %v1787_v46, %v1786_v44  ;;  %v1834_v49 = vadd.f32 %v1833_v47, %v1832_v45 }
 0x10c   : > { %v1939_v50 = vpop.f32.mrf.mxu0  ;;  %v2392_v51 = vpop.f32.mrf.mxu1 }
 0x10d   : > { %v682_v1 = vadd.f32 %v1939_v50, %v617_v61  ;;  %v636_v25 = vadd.f32 %v1788_v48, %v2405_v60  ;;  %v878_v38 = vadd.f32 %v1834_v49, %v2405_v60 }
 0x10e   : > { %v673_v52 = vpop.f32.mrf.mxu0  ;;  %v2394_v53 = vpop.f32.mrf.mxu1 }
 0x10f   : > { %v674_v2 = vadd.f32 %v673_v52, %v609_v62  ;;  %v714_v20 = vmul.f32 0.01, %v682_v1  ;;  %vm706_vm1 = vcmp.ge.f32.partialorder %v682_v1, 0.0 }
 0x110   : > { %v1940_v54 = vpop.f32.mrf.mxu0  ;;  %v2396_v55 = vpop.f32.mrf.mxu1 }
 0x111   : > { %v685_v9 = vadd.f32 %v1940_v54, %v620_v3  ;;  %v712_v21 = vmul.f32 0.01, %v674_v2  ;;  %vm704_vm2 = vcmp.ge.f32.partialorder %v674_v2, 0.0  ;;  %v2433_v32 = vsel %vm706_vm1, %v682_v1, %v714_v20 }
 0x112   : > { %v676_v56 = vpop.f32.mrf.mxu0  ;;  %v2398_v57 = vpop.f32.mrf.mxu1 }
 0x113   : > { %v677_v10 = vadd.f32 %v676_v56, %v612_v4  ;;  %vm707_vm3 = vcmp.ge.f32.partialorder %v685_v9, 0.0  ;;  %v715_v19 = vmul.f32 0.01, %v685_v9  ;;  %v2435_v33 = vsel %vm704_vm2, %v674_v2, %v712_v21 }
 0x114   : > { %v1943_v58 = vpop.f32.mrf.mxu0  ;;  %v2400_v59 = vpop.f32.mrf.mxu1 }
 0x115   : > { %v713_v27 = vmul.f32 0.01, %v677_v10  ;;  %vm705_vm4 = vcmp.ge.f32.partialorder %v677_v10, 0.0  ;;  %v698_v34 = vadd.f32 %v1943_v58, %v633_v22  ;;  %v2443_v42 = vsel %vm707_vm3, %v685_v9, %v715_v19 }
 0x116   : > { %v689_v63 = vpop.f32.mrf.mxu0  ;;  %v2409_v0 = vpop.f32.mrf.mxu1 }
 0x117   : > { %v2445_v43 = vsel %vm705_vm4, %v677_v10, %v713_v27  ;;  %v690_v44 = vadd.f32 %v689_v63, %v625_v16  ;;  %vm710_vm8 = vcmp.ge.f32.partialorder %v698_v34, 0.0  ;;  %v718_v52 = vmul.f32 0.01, %v698_v34 }
 0x118   : > { %v1944_v5 = vpop.f32.mrf.mxu0  ;;  %v2413_v8 = vpop.f32.mrf.mxu1 }
 0x119   : > { %v701_v54 = vadd.f32 %v1944_v5, %v636_v25  ;;  %vm708_vm10 = vcmp.ge.f32.partialorder %v690_v44, 0.0  ;;  %v716_v2 = vmul.f32 0.01, %v690_v44  ;;  %v2464_v16 = vsel %vm710_vm8, %v698_v34, %v718_v52 }
 0x11a   : > { %v692_v11 = vpop.f32.mrf.mxu0  ;;  %v2415_v14 = vpop.f32.mrf.mxu1  ;;  %v1865_v52 = vadd.f32 %v2409_v0, %v2400_v59 }
 0x11b   : > { %v693_v3 = vadd.f32 %v692_v11, %v628_v23  ;;  %v870_v11 = vadd.f32 %v2390_v37, %v2405_v60  ;;  %vm711_vm13 = vcmp.ge.f32.partialorder %v701_v54, 0.0 }
 0x11c   : > { %v1951_v24 = vpop.f32.mrf.mxu0  ;;  %v2427_v26 = vpop.f32.mrf.mxu1 }
 0x11d   : > { %v924_v7 = vadd.f32 %v1951_v24, %v859_v17  ;;  %v719_v17 = vmul.f32 0.01, %v701_v54  ;;  %vm709_vm15 = vcmp.ge.f32.partialorder %v693_v3, 0.0 }
 0x11e   : > { %v915_v28 = vpop.f32.mrf.mxu0  ;;  %v2431_v29 = vpop.f32.mrf.mxu1 }
 0x11f   : > { %vm948_vm5 = vcmp.ge.f32.partialorder %v924_v7, 0.0  ;;  %v956_v30 = vmul.f32 0.01, %v924_v7  ;;  %v916_v31 = vadd.f32 %v915_v28, %v851_v6 }
 0x120   : > { %v1952_v35 = vpop.f32.mrf.mxu0  ;;  %v2437_v36 = vpop.f32.mrf.mxu1 }
 0x121   : > { %v2440_v39 = vsel %vm948_vm5, %v924_v7, %v956_v30  ;;  %vm946_vm6 = vcmp.ge.f32.partialorder %v916_v31, 0.0  ;;  %v954_v40 = vmul.f32 0.01, %v916_v31  ;;  %v927_v41 = vadd.f32 %v1952_v35, %v862_v12 }
 0x122   : > { %v972_v45 = vmax.f32 %v2433_v32, %v2440_v39  ;;  %v918_v46 = vpop.f32.mrf.mxu0  ;;  %v2449_v47 = vpop.f32.mrf.mxu1  ;;  %v2473_v7 = vsel %vm708_vm10, %v690_v44, %v716_v2  ;;  %v2481_v35 = vsel %vm711_vm13, %v701_v54, %v719_v17  ;;  %v1868_v17 = vadd.f32 %v2415_v14, %v2413_v8 }
 0x123   : > { %v2451_v48 = vsel %vm946_vm6, %v916_v31, %v954_v40  ;;  %vm949_vm7 = vcmp.ge.f32.partialorder %v927_v41, 0.0  ;;  %v957_v49 = vmul.f32 0.01, %v927_v41  ;;  %v919_v50 = vadd.f32 %v918_v46, %v854_v15 }
 0x124   : > { %v970_v56 = vmax.f32 %v2435_v33, %v2451_v48  ;;  %v1955_v58 = vpop.f32.mrf.mxu0  ;;  %v2455_v61 = vpop.f32.mrf.mxu1  ;;  %v1112_v8 = vadd.f32 %v1868_v17, %v2405_v60 }
 0x125   : > { %v2457_v62 = vsel %vm949_vm7, %v927_v41, %v957_v49  ;;  %vm947_vm9 = vcmp.ge.f32.partialorder %v919_v50, 0.0  ;;  %v955_v63 = vmul.f32 0.01, %v919_v50  ;;  %v940_v1 = vadd.f32 %v1955_v58, %v875_v13 }
 0x126   : > { %v973_v4 = vmax.f32 %v2443_v42, %v2457_v62  ;;  %v931_v9 = vpop.f32.mrf.mxu0  ;;  %v1876_v10 = vpop.f32.mrf.mxu1 }
 0x127   : > { %v2461_v5 = vsel %vm947_vm9, %v919_v50, %v955_v63  ;;  %vm952_vm11 = vcmp.ge.f32.partialorder %v940_v1, 0.0  ;;  %v960_v6 = vmul.f32 0.01, %v940_v1  ;;  %v932_v15 = vadd.f32 %v931_v9, %v867_v18 }
 0x128   : > { %v971_v12 = vmax.f32 %v2445_v43, %v2461_v5  ;;  %v1956_v20 = vpop.f32.mrf.mxu0  ;;  %v1878_v21 = vpop.f32.mrf.mxu1  ;;  %v717_v18 = vmul.f32 0.01, %v693_v3  ;;  %v1877_v14 = vadd.f32 %v1876_v10, %v2455_v61 }
 0x129   : > { %v2470_v22 = vsel %vm952_vm11, %v940_v1, %v960_v6  ;;  %vm950_vm12 = vcmp.ge.f32.partialorder %v932_v15, 0.0  ;;  %v958_v23 = vmul.f32 0.01, %v932_v15  ;;  %v943_v24 = vadd.f32 %v1956_v20, %v878_v38 }
 0x12a   : > { %v976_v13 = vmax.f32 %v2464_v16, %v2470_v22  ;;  %v934_v19 = vpop.f32.mrf.mxu0  ;;  %v1879_v27 = vpop.f32.mrf.mxu1  ;;  %v2487_v49 = vsel %vm709_vm15, %v693_v3, %v717_v18  ;;  %v1859_v1 = vadd.f32 %v2394_v53, %v2392_v51  ;;  %v1109_v6 = vadd.f32 %v1865_v52, %v2405_v60 }
 0x12b   : > { %v2477_v25 = vsel %vm950_vm12, %v932_v15, %v958_v23  ;;  %vm953_vm14 = vcmp.ge.f32.partialorder %v943_v24, 0.0  ;;  %v961_v28 = vmul.f32 0.01, %v943_v24  ;;  %v935_v37 = vadd.f32 %v934_v19, %v870_v11 }
 0x12c   : > { %v974_v30 = vmax.f32 %v2473_v7, %v2477_v25  ;;  %v1963_v31 = vpop.f32.mrf.mxu0  ;;  %v1903_v34 = vpop.f32.mrf.mxu1  ;;  %v1101_v20 = vadd.f32 %v1859_v1, %v2405_v60  ;;  %v1862_v23 = vadd.f32 %v2398_v57, %v2396_v55  ;;  %v1871_v51 = vadd.f32 %v2431_v29, %v2427_v26 }
 0x12d   : > { %v2483_v38 = vsel %vm953_vm14, %v943_v24, %v961_v28  ;;  %vm951_vm0 = vcmp.ge.f32.partialorder %v935_v37, 0.0  ;;  %v959_v40 = vmul.f32 0.01, %v935_v37  ;;  %v1174_v59 = vadd.f32 %v1963_v31, %v1109_v6 }
 0x12e   : > { %v977_v41 = vmax.f32 %v2481_v35, %v2483_v38  ;;  %v1165_v44 = vpop.f32.mrf.mxu0  ;;  %v1904_v46 = vpop.f32.mrf.mxu1  ;;  %v1874_v28 = vadd.f32 %v2449_v47, %v2437_v36  ;;  %v1104_v26 = vadd.f32 %v1862_v23, %v2405_v60  ;;  %v1117_v36 = vadd.f32 %v1871_v51, %v2405_v60 }
 0x12f   : > { %v2489_v50 = vsel %vm951_vm0, %v935_v37, %v959_v40  ;;  %v1166_v24 = vadd.f32 %v1165_v44, %v1101_v20  ;;  %v1880_v37 = vadd.f32 %v1879_v27, %v1878_v21  ;;  %v1206_v31 = vmul.f32 0.01, %v1174_v59 }
 0x130   : > { %v975_v54 = vmax.f32 %v2487_v49, %v2489_v50  ;;  %v1964_v58 = vpop.f32.mrf.mxu0  ;;  %v1906_v63 = vpop.f32.mrf.mxu1  ;;  %v1905_v40 = vadd.f32 %v1904_v46, %v1903_v34  ;;  %vm1198_vm1 = vcmp.ge.f32.partialorder %v1174_v59, 0.0  ;;  %v1120_v21 = vadd.f32 %v1874_v28, %v2405_v60 }
 0x131   : > { %v1204_v57 = vmul.f32 0.01, %v1166_v24  ;;  %vm1196_vm2 = vcmp.ge.f32.partialorder %v1166_v24, 0.0  ;;  %v1177_v44 = vadd.f32 %v1964_v58, %v1112_v8  ;;  %v1214_v34 = vsel %vm1198_vm1, %v1174_v59, %v1206_v31 }
 0x132   : > { %v1168_v2 = vpop.f32.mrf.mxu0  ;;  %v1907_v9 = vpop.f32.mrf.mxu1  ;;  %v1125_v46 = vadd.f32 %v1877_v14, %v2405_v60  ;;  %v1343_v20 = vadd.f32 %v1905_v40, %v2405_v60 }
 0x133   : > { %v1169_v61 = vadd.f32 %v1168_v2, %v1104_v26  ;;  %v1908_v10 = vadd.f32 %v1907_v9, %v1906_v63  ;;  %vm1199_vm4 = vcmp.ge.f32.partialorder %v1177_v44, 0.0  ;;  %v1207_v63 = vmul.f32 0.01, %v1177_v44 }
 0x134   : > { %v1967_v15 = vpop.f32.mrf.mxu0  ;;  %v1909_v3 = vpop.f32.mrf.mxu1 }
 0x135   : > { %vm1197_vm5 = vcmp.ge.f32.partialorder %v1169_v61, 0.0  ;;  %v1346_v8 = vadd.f32 %v1908_v10, %v2405_v60  ;;  %v1205_v14 = vmul.f32 0.01, %v1169_v61 }
 0x136   : > { %v1181_v0 = vpop.f32.mrf.mxu0  ;;  %v1910_v11 = vpop.f32.mrf.mxu1 }
 0x137   : > { %v1911_v53 = vadd.f32 %v1910_v11, %v1909_v3  ;;  %v2519_v3 = vadd.f32 %v1880_v37, %v2405_v60  ;;  %v1212_v11 = vsel %vm1196_vm2, %v1166_v24, %v1204_v57  ;;  %v2525_v37 = vadd.f32 %v1967_v15, %v1125_v46 }
 0x138   : > { %v2505_v18 = vpop.f32.mrf.mxu0  ;;  %v1912_v19 = vpop.f32.mrf.mxu1 }
 0x139   : > { %v1351_v29 = vadd.f32 %v1911_v53, %v2405_v60  ;;  %vm1202_vm14 = vcmp.ge.f32.partialorder %v2525_v37, 0.0 }
 0x13a   : > { %v2511_v52 = vpop.f32.mrf.mxu0  ;;  %v1913_v55 = vpop.f32.mrf.mxu1 }
 0x13b   : > { %v1914_v47 = vadd.f32 %v1913_v55, %v1912_v19  ;;  %v1182_v55 = vadd.f32 %v1181_v0, %v1117_v36  ;;  %v1210_v0 = vmul.f32 0.01, %v2525_v37 }
 0x13c   : > { %v1915_v1 = vpop.f32.mrf.mxu1  ;;  %v1975_v6 = vpop.f32.mrf.mxu0 }
 0x13d   : > { %v1416_v27 = vadd.f32 %v1975_v6, %v1351_v29  ;;  %v1354_v2 = vadd.f32 %v1914_v47, %v2405_v60  ;;  %v1215_v29 = vsel %vm1199_vm4, %v1177_v44, %v1207_v63  ;;  %vm1200_vm9 = vcmp.ge.f32.partialorder %v1182_v55, 0.0 }
 0x13e   : > { %v1916_v17 = vpop.f32.mrf.mxu1  ;;  %v1407_v58 = vpop.f32.mrf.mxu0  ;;  %v1208_v39 = vmul.f32 0.01, %v1182_v55 }
 0x13f   : > { %vm1440_vm3 = vcmp.ge.f32.partialorder %v1416_v27, 0.0  ;;  %v1448_v23 = vmul.f32 0.01, %v1416_v27  ;;  %v1917_v9 = vadd.f32 %v1916_v17, %v1915_v1  ;;  %v1408_v51 = vadd.f32 %v1407_v58, %v1343_v20 }
 0x140   : > { %v1918_v59 = vpop.f32.mrf.mxu1  ;;  %v1976_v53 = vpop.f32.mrf.mxu0  ;;  %v1213_v20 = vsel %vm1197_vm5, %v1169_v61, %v1205_v14 }
 0x141   : > { %v1456_v19 = vsel %vm1440_vm3, %v1416_v27, %v1448_v23  ;;  %v1419_v28 = vadd.f32 %v1976_v53, %v1354_v2  ;;  %vm1438_vm6 = vcmp.ge.f32.partialorder %v1408_v51, 0.0  ;;  %v1446_v24 = vmul.f32 0.01, %v1408_v51 }
 0x142   : > { %v1919_v31 = vpop.f32.mrf.mxu1  ;;  %v1410_v40 = vpop.f32.mrf.mxu0  ;;  %v1464_v47 = vmax.f32 %v1214_v34, %v1456_v19  ;;  %v1359_v10 = vadd.f32 %v1917_v9, %v2405_v60 }
 0x143   : > { %vm1441_vm7 = vcmp.ge.f32.partialorder %v1419_v28, 0.0  ;;  %v1449_v57 = vmul.f32 0.01, %v1419_v28  ;;  %v1411_v26 = vadd.f32 %v1410_v40, %v1346_v8  ;;  %v1454_v1 = vsel %vm1438_vm6, %v1408_v51, %v1446_v24 }
 0x144   : > { %v1921_v6 = vpop.f32.mrf.mxu1  ;;  %v1979_v27 = vpop.f32.mrf.mxu0  ;;  %v1920_v15 = vadd.f32 %v1919_v31, %v1918_v59  ;;  %v1462_v36 = vmax.f32 %v1212_v11, %v1454_v1  ;;  %v1185_v51 = vadd.f32 %v2511_v52, %v1120_v21  ;;  %v1472_v9 = vmax.f32 %v972_v45, %v1464_v47 }
 0x145   : > { %v1457_v17 = vsel %vm1441_vm7, %v1419_v28, %v1449_v57  ;;  %vm1439_vm8 = vcmp.ge.f32.partialorder %v1411_v26, 0.0  ;;  %v1447_v46 = vmul.f32 0.01, %v1411_v26  ;;  %v1193_v28 = vadd.f32 %v2505_v18, %v2519_v3 }
 0x146   : > { %v1465_v58 = vmax.f32 %v1215_v29, %v1457_v17  ;;  %v1922_v23 = vpop.f32.mrf.mxu1  ;;  %v1423_v2 = vpop.f32.mrf.mxu0  ;;  %v1362_v32 = vadd.f32 %v1920_v15, %v2405_v60  ;;  %v1470_v42 = vmax.f32 %v970_v56, %v1462_v36  ;;  %vm1201_vm11 = vcmp.ge.f32.partialorder %v1185_v51, 0.0 }
 0x147   : > { %v1455_v44 = vsel %vm1439_vm8, %v1411_v26, %v1447_v46  ;;  %v1923_v34 = vadd.f32 %v1922_v23, %v1921_v6  ;;  %v1424_v63 = vadd.f32 %v1423_v2, %v1359_v10  ;;  %v1209_v31 = vmul.f32 0.01, %v1185_v51 }
 0x148   : > { %v1473_v61 = vmax.f32 %v973_v4, %v1465_v58  ;;  %v1463_v59 = vmax.f32 %v1213_v20, %v1455_v44  ;;  %v1924_v11 = vpop.f32.mrf.mxu1  ;;  %v1980_v53 = vpop.f32.mrf.mxu0  ;;  %v1216_v56 = vsel %vm1200_vm9, %v1182_v55, %v1208_v39  ;;  %vm1203_vm15 = vcmp.ge.f32.partialorder %v1193_v28, 0.0 }
 0x149   : > { %v1367_v19 = vadd.f32 %v1923_v34, %v2405_v60  ;;  %vm1442_vm10 = vcmp.ge.f32.partialorder %v1424_v63, 0.0  ;;  %v1450_v52 = vmul.f32 0.01, %v1424_v63  ;;  %v1217_v26 = vsel %vm1201_vm11, %v1185_v51, %v1209_v31 }
 0x14a   : > { %v1734_v45 = vpack.c.bf16 %v1473_v61, %v1472_v9  ;;  %v1471_v62 = vmax.f32 %v971_v12, %v1463_v59  ;;  %v1925_v4 = vpop.f32.mrf.mxu1  ;;  %v1426_v21 = vpop.f32.mrf.mxu0  ;;  %v1211_v12 = vmul.f32 0.01, %v1193_v28  ;;  %v1218_v47 = vsel %vm1202_vm14, %v2525_v37, %v1210_v0 }
 0x14b   : > { %v1432_v8 = vadd.f32 %v1979_v27, %v1367_v19  ;;  %v1926_v14 = vadd.f32 %v1925_v4, %v1924_v11  ;;  %v1427_v24 = vadd.f32 %v1426_v21, %v1362_v32  ;;  %v1458_v33 = vsel %vm1442_vm10, %v1424_v63, %v1450_v52 }
 0x14c   : > { %1746 = vst [vmem:[%s2542_s9 + $0x8] sm:$0xff] %v1734_v45   ;;  %v1729_v40 = vpack.c.bf16 %v1471_v62, %v1470_v42  ;;  %v1466_v3 = vmax.f32 %v1216_v56, %v1458_v33  ;;  %v1219_v27 = vsel %vm1203_vm15, %v1193_v28, %v1211_v12 }
 0x14d   : > { %vm1444_vm12 = vcmp.ge.f32.partialorder %v1432_v8, 0.0  ;;  %v1452_v48 = vmul.f32 0.01, %v1432_v8  ;;  %v1370_v43 = vadd.f32 %v1926_v14, %v2405_v60  ;;  %vm1443_vm13 = vcmp.ge.f32.partialorder %v1427_v24, 0.0 }
 0x14e   : > { %1730 = vst [vmem:[%s2542_s9] sm:$0xff] %v1729_v40   ;;  %v1451_v5 = vmul.f32 0.01, %v1427_v24  ;;  %v1474_v55 = vmax.f32 %v974_v30, %v1466_v3 }
 0x14f   : > { %v1460_v18 = vsel %vm1444_vm12, %v1432_v8, %v1452_v48  ;;  %v1435_v57 = vadd.f32 %v1980_v53, %v1370_v43 }
 0x150   : > { %v1459_v29 = vsel %vm1443_vm13, %v1427_v24, %v1451_v5  ;;  %v1468_v6 = vmax.f32 %v1218_v47, %v1460_v18 }
 0x151   : > { %vm1445_vm0 = vcmp.ge.f32.partialorder %v1435_v57, 0.0  ;;  %v1453_v60 = vmul.f32 0.01, %v1435_v57  ;;  %v1467_v1 = vmax.f32 %v1217_v26, %v1459_v29 }
 0x152   : > { %v1476_v37 = vmax.f32 %v976_v13, %v1468_v6 }
 0x153   : > { %v1461_v10 = vsel %vm1445_vm0, %v1435_v57, %v1453_v60  ;;  %v1475_v17 = vmax.f32 %v975_v54, %v1467_v1 }
 0x154   : > { %v1469_v15 = vmax.f32 %v1219_v27, %v1461_v10 }
 0x155   : > { %v1739_v46 = vpack.c.bf16 %v1475_v17, %v1474_v55 }
 0x156   : > { %v1477_v20 = vmax.f32 %v977_v41, %v1469_v15 }
 0x157   : > { %1747 = vst [vmem:[%s2542_s9 + $0x10] sm:$0xff] %v1739_v46  }
 0x158   : > { %v1744_v0 = vpack.c.bf16 %v1477_v20, %v1476_v37 }
 0x15a   : > { %1748 = vst [vmem:[%s2542_s9 + $0x18] sm:$0xff] %v1744_v0  }
 0x15b PF: > { %s16_s21 = sadd.s32 1, %s2078_s21  }
 0x15c   : > { %p13_p4 = scmp.ge.s32.totalorder %s16_s21, 4  }
 0x15e   :  { %15 = sbr.rel (!%p13_p4) target bundleno = 1 (0x1), region = 83 }

// kernel: simple_cnn_forward.6
= control target key start
LH: loop header
LB: loop body
LE: loop exit
PB: predicated region body
PF: predicated region fallthrough
CT: control target
= control target key end

     0   :  { %s1249_s12 = smov 0   ;;  %s1406_s0 = inlined_call_operand.vmem [shape: bf16[128,576], index: 0, kind: input, shape index: {}]   ;;  %s1407_s1 = inlined_call_operand.vmem [shape: bf16[576,128], index: 1, kind: input, shape index: {}]   ;;  %s1408_s2 = inlined_call_operand.vmem [shape: f32[1,128], index: 2, kind: input, shape index: {}]   ;;  %s1409_s3 = inlined_call_operand.vmem [shape: bf16[128,128], index: 3, kind: output, shape index: {}]  }
   0x1 LB: > { %s925_s13 = sadd.s32 4294967295, %s1227_s12   ;;  %p929_p0 = scmp.ge.s32.totalorder %s1227_s12, 1  ;;  %s1227_s12 = sphi %s1249_s12, %s13_s12  }
   0x2   : > { %p139_p1 = scmp.lt.s32.totalorder %s1227_s12, 3 }
   0x4   : > { %p140_p2 = pnand %p929_p0, %p139_p1 }
   0x5   : > { %s930_s19 = sshll.u32 (!%p140_p2), %s925_s13, 3 }
   0x6   : > { %143 = sbr.rel (%p140_p2) target bundleno = 285 (0x11d), region = 32  ;;  %p165_p3 = scmp.lt.s32.totalorder (!%p140_p2), %s930_s19, 15 }
   0xb   : > { %v1157_v0 = vld [vmem:[%s1407_s1 + $0x78] sm:$0xff]   ;;  %v1161_v4 = vld [vmem:[%s1407_s1 + $0x70] sm:$0xff]   ;;  %v1165_v8 = vld [vmem:[%s1407_s1 + $0x68] sm:$0xff]   ;;  %s1411_s19 = smov (!%p165_p3, %s930_s19), 15  ;;  %vm597_vm0 = vcmask 523264  }
   0xc   : > { %v1158_v1 = vld [vmem:[%s1407_s1 + $0xf8] sm:$0xff]   ;;  %1036 = vmatprep.subr.bf16.mxu0 %v1157_v0  ;;  %v1162_v5 = vld [vmem:[%s1407_s1 + $0xf0] sm:$0xff]   ;;  %v1166_v9 = vld [vmem:[%s1407_s1 + $0xe8] sm:$0xff]   ;;  %s1148_s16 = smul.u32 20, %s1411_s19  ;;  %s933_s17 = sshll.u32 %s1411_s19, 2 }
   0xd   : > { %v1159_v2 = vld [vmem:[%s1407_s1 + $0x38] sm:$0xff]   ;;  %1076 = vmatprep.subr.bf16.mxu1 %v1158_v1  ;;  %v1163_v6 = vld [vmem:[%s1407_s1 + $0x30] sm:$0xff]   ;;  %v1167_v10 = vld [vmem:[%s1407_s1 + $0x28] sm:$0xff]   ;;  %s175_s21 = scalar_lea.vmem %s1409_s3, %s933_s17 }
   0xe   : > { %v1160_v3 = vld [vmem:[%s1407_s1 + $0xb8] sm:$0xff]   ;;  %1037 = vmatpush3.bf16.msra.mxu0 %v1159_v2  ;;  %v1164_v7 = vld [vmem:[%s1407_s1 + $0xb0] sm:$0xff]   ;;  %v1168_v11 = vld [vmem:[%s1407_s1 + $0xa8] sm:$0xff]   ;;  %s1355_s13 = scalar_lea.vmem %s1406_s0, %s1148_s16 }
   0xf   : > { %1077 = vmatpush3.bf16.msra.mxu1 %v1160_v3  ;;  %1038 = vmatprep.subr.bf16.mxu0 %v1161_v4  ;;  %v1169_v12 = vld [vmem:[%s1407_s1 + $0x60] sm:$0xff]   ;;  %v1173_v16 = vld [vmem:[%s1407_s1 + $0x58] sm:$0xff]   ;;  %v1177_v20 = vld [vmem:[%s1407_s1 + $0x50] sm:$0xff]  }
  0x10   : > { %1078 = vmatprep.subr.bf16.mxu1 %v1162_v5  ;;  %v1170_v13 = vld [vmem:[%s1407_s1 + $0xe0] sm:$0xff]   ;;  %v1174_v17 = vld [vmem:[%s1407_s1 + $0xd8] sm:$0xff]   ;;  %v1178_v21 = vld [vmem:[%s1407_s1 + $0xd0] sm:$0xff]  }
  0x11   : > { %v1171_v14 = vld [vmem:[%s1407_s1 + $0x20] sm:$0xff]   ;;  %v1175_v18 = vld [vmem:[%s1407_s1 + $0x18] sm:$0xff]   ;;  %v1179_v22 = vld [vmem:[%s1407_s1 + $0x10] sm:$0xff]  }
  0x12   : > { %1039 = vmatpush3.bf16.msra.mxu0 %v1163_v6  ;;  %v1172_v15 = vld [vmem:[%s1407_s1 + $0xa0] sm:$0xff]   ;;  %v1176_v19 = vld [vmem:[%s1407_s1 + $0x98] sm:$0xff]   ;;  %v1180_v23 = vld [vmem:[%s1407_s1 + $0x90] sm:$0xff]  }
  0x13   : > { %1079 = vmatpush3.bf16.msra.mxu1 %v1164_v7  ;;  %1040 = vmatprep.subr.bf16.mxu0 %v1165_v8  ;;  %v1181_v24 = vld [vmem:[%s1407_s1 + $0x48] sm:$0xff]   ;;  %v1185_v28 = vld [vmem:[%s1407_s1 + $0x40] sm:$0xff]   ;;  %v1195_v36 = vld [vmem:[%s1407_s1 + $0x118] sm:$0xff]  }
  0x14   : > { %1080 = vmatprep.subr.bf16.mxu1 %v1166_v9  ;;  %v1182_v25 = vld [vmem:[%s1407_s1 + $0xc8] sm:$0xff]   ;;  %v1186_v29 = vld [vmem:[%s1407_s1 + $0xc0] sm:$0xff]   ;;  %v1202_v39 = vld [vmem:[%s1407_s1 + $0x110] sm:$0xff]  }
  0x15   : > { %v1183_v26 = vld [vmem:[%s1407_s1 + $0x8] sm:$0xff]   ;;  %v1187_v30 = vld [vmem:[%s1407_s1] sm:$0xff]   ;;  %v1205_v43 = vld [vmem:[%s1355_s13 + $0x5c] ss:$20 sps:$4 sm:$0xff]  }
  0x16   : > { %1041 = vmatpush3.bf16.msra.mxu0 %v1167_v10  ;;  %v1184_v27 = vld [vmem:[%s1407_s1 + $0x88] sm:$0xff]   ;;  %v1188_v31 = vld [vmem:[%s1407_s1 + $0x80] sm:$0xff]   ;;  %v1210_v48 = vld [vmem:[%s1355_s13 + $0x7c] ss:$20 sps:$4 sm:$0xff]  }
  0x17   : > { %1081 = vmatpush3.bf16.msra.mxu1 %v1168_v11  ;;  %1042 = vmatprep.subr.bf16.mxu0 %v1169_v12  ;;  %v1189_v32 = vld [vmem:[%s1355_s13] ss:$20 sps:$4 sm:$0xff]   ;;  %v1191_v33 = vld [vmem:[%s1355_s13 + $0x4] ss:$20 sps:$4 sm:$0xff]   ;;  %v1192_v34 = vld [vmem:[%s1355_s13 + $0x8] ss:$20 sps:$4 sm:$0xff]  }
  0x18   : > { %1082 = vmatprep.subr.bf16.mxu1 %v1170_v13  ;;  %v1194_v35 = vld [vmem:[%s1355_s13 + $0xc] ss:$20 sps:$4 sm:$0xff]   ;;  %642 = vmatprep.mubr.bf16.mxu0 %v1191_v33  ;;  %v1198_v38 = vld [vmem:[%s1355_s13 + $0x34] ss:$20 sps:$4 sm:$0xff]   ;;  %v1201_v41 = vld [vmem:[%s1355_s13 + $0x30] ss:$20 sps:$4 sm:$0xff]  }
  0x19   : > { %707 = vmatprep.mubr.bf16.mxu1 %v1194_v35  ;;  %v1196_v37 = vld [vmem:[%s1355_s13 + $0x2c] ss:$20 sps:$4 sm:$0xff]   ;;  %v1200_v40 = vld [vmem:[%s1355_s13 + $0x28] ss:$20 sps:$4 sm:$0xff]   ;;  %v1207_v46 = vld [vmem:[%s1355_s13 + $0x50] ss:$20 sps:$4 sm:$0xff]  }
  0x1a   : > { %1043 = vmatpush3.bf16.msra.mxu0 %v1171_v14  ;;  %v1203_v42 = vld [vmem:[%s1355_s13 + $0x54] ss:$20 sps:$4 sm:$0xff]   ;;  %v1216_v45 = vld [vmem:[%s1407_s1 + $0x100] sm:$0xff]   ;;  %v1208_v47 = vld [vmem:[%s1355_s13 + $0x58] ss:$20 sps:$4 sm:$0xff]  }
  0x1b   : > { %1083 = vmatpush3.bf16.msra.mxu1 %v1172_v15  ;;  %1044 = vmatprep.subr.bf16.mxu0 %v1173_v16  ;;  %v1209_v44 = vld [vmem:[%s1407_s1 + $0x108] sm:$0xff]   ;;  %v1212_v49 = vld [vmem:[%s1355_s13 + $0x84] ss:$20 sps:$4 sm:$0xff]   ;;  %v1215_v51 = vld [vmem:[%s1355_s13 + $0x80] ss:$20 sps:$4 sm:$0xff]  }
  0x1c   : > { %1084 = vmatprep.subr.bf16.mxu1 %v1174_v17  ;;  %v1214_v50 = vld [vmem:[%s1355_s13 + $0x78] ss:$20 sps:$4 sm:$0xff]   ;;  %v1217_v52 = vld [vmem:[%s1355_s13 + $0x10] ss:$20 sps:$4 sm:$0xff]   ;;  %v1218_v53 = vld [vmem:[%s1355_s13 + $0x60] ss:$20 sps:$4 sm:$0xff]  }
  0x1d   : > { %v1219_v54 = vld [vmem:[%s1355_s13 + $0x38] ss:$20 sps:$4 sm:$0xff]   ;;  %v1220_v55 = vld [vmem:[%s1355_s13 + $0x88] ss:$20 sps:$4 sm:$0xff]  }
  0x1e   : > { %1045 = vmatpush3.bf16.msra.mxu0 %v1175_v18  ;;  %v934_v18 = vld [vmem:[%s1408_s2] ss:$0 sm:$0xff] }
  0x1f   : > { %1085 = vmatpush3.bf16.msra.mxu1 %v1176_v19  ;;  %1046 = vmatprep.subr.bf16.mxu0 %v1177_v20 }
  0x20   : > { %1086 = vmatprep.subr.bf16.mxu1 %v1178_v21 }
  0x22   : > { %1047 = vmatpush3.bf16.msra.mxu0 %v1179_v22 }
  0x23   : > { %1087 = vmatpush3.bf16.msra.mxu1 %v1180_v23  ;;  %1048 = vmatprep.subr.bf16.mxu0 %v1181_v24 }
  0x24   : > { %1088 = vmatprep.subr.bf16.mxu1 %v1182_v25 }
  0x26   : > { %1049 = vmatpush3.bf16.msra.mxu0 %v1183_v26 }
  0x27   : > { %1089 = vmatpush3.bf16.msra.mxu1 %v1184_v27  ;;  %1050 = vmatprep.subr.bf16.mxu0 %v1185_v28 }
  0x28   : > { %1090 = vmatprep.subr.bf16.mxu1 %v1186_v29 }
  0x2a   : > { %1051 = vmatpush3.bf16.msra.mxu0 %v1187_v30 }
  0x2b   : > { %1091 = vmatpush3.bf16.msra.mxu1 %v1188_v31  ;;  %1124 = vmatprep.subr.bf16.mxu0 %v1195_v36 }
  0x2c   : > { %1140 = vmatprep.subr.bf16.mxu1 %v1195_v36 }
  0x2d   : > { %643 = vmatmul.mubr.bf16.vlgmr.msra.gmra.mxu0 %v1189_v32 }
  0x2e   : > { %708 = vmatmul.mubr.bf16.vlgmr.msra.gmra.mxu1 %v1192_v34  ;;  %1125 = vmatpush3.bf16.msra.mxu0 %v1195_v36 }
  0x2f   : > { %1144 = vmatpush3.bf16.msra.mxu1 %v1195_v36  ;;  %650 = vmatprep.mubr.bf16.mxu0 %v1196_v37 }
  0x30   : > { %715 = vmatprep.mubr.bf16.mxu1 %v1198_v38  ;;  %1126 = vmatprep.subr.bf16.mxu0 %v1202_v39 }
  0x31   : > { %1141 = vmatprep.subr.bf16.mxu1 %v1202_v39 }
  0x32   : > { %1127 = vmatpush3.bf16.msra.mxu0 %v1202_v39 }
  0x33   : > { %1145 = vmatpush3.bf16.msra.mxu1 %v1202_v39  ;;  %1128 = vmatprep.subr.bf16.mxu0 %v1209_v44 }
  0x34   : > { %1142 = vmatprep.subr.bf16.mxu1 %v1209_v44 }
  0x35   : > { %651 = vmatmul.mubr.bf16.gmra.mxu0 %v1200_v40 }
  0x36   : > { %716 = vmatmul.mubr.bf16.gmra.mxu1 %v1201_v41  ;;  %658 = vmatprep.mubr.bf16.mxu0 %v1203_v42 }
  0x37   : > { %723 = vmatprep.mubr.bf16.mxu1 %v1205_v43  ;;  %1129 = vmatpush3.bf16.msra.mxu0 %v1209_v44 }
  0x38   : > { %1146 = vmatpush3.bf16.msra.mxu1 %v1209_v44  ;;  %1130 = vmatprep.subr.bf16.mxu0 %v1216_v45 }
  0x39   : > { %1143 = vmatprep.subr.bf16.mxu1 %v1216_v45 }
  0x3b   : > { %1131 = vmatpush3.bf16.msra.mxu0 %v1216_v45 }
  0x3c   : > { %1147 = vmatpush3.bf16.msra.mxu1 %v1216_v45 }
  0x3d   : > { %659 = vmatmul.mubr.bf16.gmra.mxu0 %v1207_v46 }
  0x3e   : > { %724 = vmatmul.mubr.bf16.gmra.mxu1 %v1208_v47  ;;  %666 = vmatprep.mubr.bf16.mxu0 %v1210_v48 }
  0x3f   : > { %731 = vmatprep.mubr.bf16.mxu1 %v1212_v49 }
  0x45   : > { %667 = vmatmul.mubr.bf16.gmra.mxu0 %v1214_v50 }
  0x46   : > { %732 = vmatmul.mubr.bf16.gmra.mxu1 %v1215_v51  ;;  %1132 = vmatprep.mubr.msk.bf16.mxu0 %vm597_vm0, %v1217_v52 }
  0x47   : > { %1136 = vmatprep.mubr.msk.bf16.mxu1 %vm597_vm0, %v1218_v53 }
  0x4d   : > { %1133 = vmatmul.mubr.msk.bf16.vlgmr.msra.gmra.mxu0 %vm597_vm0, %v1219_v54 }
  0x4e   : > { %1137 = vmatmul.mubr.msk.bf16.vlgmr.msra.gmra.mxu1 %vm597_vm0, %v1220_v55 }
  0xed   : > { %v1052_v56 = vpop.f32.mrf.mxu0 }
  0xee   : > { %v1092_v57 = vpop.f32.mrf.mxu1 }
  0xef   : > { %v1053_v58 = vpop.f32.mrf.mxu0 }
  0xf0   : > { %v1093_v59 = vpop.f32.mrf.mxu1  ;;  %v1054_v15 = vadd.f32 %v1053_v58, %v1052_v56 }
  0xf1   : > { %v1055_v60 = vpop.f32.mrf.mxu0  ;;  %v1094_v28 = vadd.f32 %v1093_v59, %v1092_v57 }
  0xf2   : > { %v1095_v61 = vpop.f32.mrf.mxu1  ;;  %v645_v24 = vadd.f32 %v1054_v15, %v934_v18 }
  0xf3   : > { %v1056_v62 = vpop.f32.mrf.mxu0 }
  0xf4   : > { %v1096_v63 = vpop.f32.mrf.mxu1  ;;  %v1057_v29 = vadd.f32 %v1056_v62, %v1055_v60  ;;  %v710_v43 = vadd.f32 %v1094_v28, %v645_v24 }
  0xf5   : > { %v1058_v0 = vpop.f32.mrf.mxu0  ;;  %v1097_v45 = vadd.f32 %v1096_v63, %v1095_v61 }
  0xf6   : > { %v1098_v1 = vpop.f32.mrf.mxu1  ;;  %v648_v44 = vadd.f32 %v1057_v29, %v934_v18 }
  0xf7   : > { %v1059_v2 = vpop.f32.mrf.mxu0 }
  0xf8   : > { %v1099_v3 = vpop.f32.mrf.mxu1  ;;  %v1060_v16 = vadd.f32 %v1059_v2, %v1058_v0 }
  0xf9   : > { %v1061_v4 = vpop.f32.mrf.mxu0  ;;  %v1100_v31 = vadd.f32 %v1099_v3, %v1098_v1 }
  0xfa   : > { %v1101_v5 = vpop.f32.mrf.mxu1  ;;  %v653_v25 = vadd.f32 %v1060_v16, %v934_v18 }
  0xfb   : > { %v1062_v6 = vpop.f32.mrf.mxu0 }
  0xfc   : > { %v1102_v7 = vpop.f32.mrf.mxu1  ;;  %v1063_v21 = vadd.f32 %v1062_v6, %v1061_v4  ;;  %v718_v41 = vadd.f32 %v1100_v31, %v653_v25  ;;  %v713_v4 = vadd.f32 %v1097_v45, %v648_v44 }
  0xfd   : > { %v1064_v8 = vpop.f32.mrf.mxu0  ;;  %v1103_v46 = vadd.f32 %v1102_v7, %v1101_v5 }
  0xfe   : > { %v1104_v9 = vpop.f32.mrf.mxu1  ;;  %v656_v36 = vadd.f32 %v1063_v21, %v934_v18 }
  0xff   : > { %v1065_v10 = vpop.f32.mrf.mxu0 }
 0x100   : > { %v1105_v11 = vpop.f32.mrf.mxu1  ;;  %v1066_v22 = vadd.f32 %v1065_v10, %v1064_v8  ;;  %v721_v58 = vadd.f32 %v1103_v46, %v656_v36 }
 0x101   : > { %v1067_v12 = vpop.f32.mrf.mxu0  ;;  %v1106_v47 = vadd.f32 %v1105_v11, %v1104_v9 }
 0x102   : > { %v1107_v13 = vpop.f32.mrf.mxu1  ;;  %v661_v37 = vadd.f32 %v1066_v22, %v934_v18 }
 0x103   : > { %v1068_v14 = vpop.f32.mrf.mxu0 }
 0x104   : > { %v1108_v17 = vpop.f32.mrf.mxu1  ;;  %v1069_v32 = vadd.f32 %v1068_v14, %v1067_v12  ;;  %v726_v57 = vadd.f32 %v1106_v47, %v661_v37 }
 0x105   : > { %v1070_v19 = vpop.f32.mrf.mxu0  ;;  %v1109_v54 = vadd.f32 %v1108_v17, %v1107_v13 }
 0x106   : > { %v1110_v20 = vpop.f32.mrf.mxu1  ;;  %v664_v49 = vadd.f32 %v1069_v32, %v934_v18 }
 0x107   : > { %v1071_v23 = vpop.f32.mrf.mxu0 }
 0x108   : > { %v1072_v26 = vadd.f32 %v1071_v23, %v1070_v19  ;;  %v1111_v27 = vpop.f32.mrf.mxu1  ;;  %v729_v5 = vadd.f32 %v1109_v54, %v664_v49 }
 0x109   : > { %v1073_v30 = vpop.f32.mrf.mxu0  ;;  %v1112_v34 = vadd.f32 %v1111_v27, %v1110_v20 }
 0x10a   : > { %v669_v33 = vadd.f32 %v1072_v26, %v934_v18  ;;  %v1113_v35 = vpop.f32.mrf.mxu1 }
 0x10b   : > { %v1074_v38 = vpop.f32.mrf.mxu0 }
 0x10c   : > { %v1075_v39 = vadd.f32 %v1074_v38, %v1073_v30  ;;  %v1114_v40 = vpop.f32.mrf.mxu1  ;;  %v734_v42 = vadd.f32 %v1112_v34, %v669_v33 }
 0x10d   : > { %v1134_v48 = vpop.f32.mrf.mxu0  ;;  %v1115_v51 = vadd.f32 %v1114_v40, %v1113_v35 }
 0x10e   : > { %v672_v50 = vadd.f32 %v1075_v39, %v934_v18  ;;  %v783_v52 = vadd.f32 %v1134_v48, %v718_v41  ;;  %v1138_v53 = vpop.f32.mrf.mxu1 }
 0x10f   : > { %v799_v55 = vadd.f32 %v1138_v53, %v734_v42  ;;  %v774_v56 = vpop.f32.mrf.mxu0 }
 0x110   : > { %vm807_vm1 = vcmp.ge.f32.partialorder %v783_v52, 0.0  ;;  %v815_v59 = vmul.f32 0.01, %v783_v52  ;;  %v775_v60 = vadd.f32 %v774_v56, %v710_v43  ;;  %v790_v62 = vpop.f32.mrf.mxu1  ;;  %v737_v0 = vadd.f32 %v1115_v51, %v672_v50 }
 0x111   : > { %vm811_vm2 = vcmp.ge.f32.partialorder %v799_v55, 0.0  ;;  %v819_v61 = vmul.f32 0.01, %v799_v55  ;;  %v791_v63 = vadd.f32 %v790_v62, %v726_v57  ;;  %v1135_v1 = vpop.f32.mrf.mxu0 }
 0x112   : > { %v786_v2 = vadd.f32 %v1135_v1, %v721_v58  ;;  %v1139_v3 = vpop.f32.mrf.mxu1  ;;  %v823_v6 = vsel %vm807_vm1, %v783_v52, %v815_v59  ;;  %vm805_vm3 = vcmp.ge.f32.partialorder %v775_v60, 0.0  ;;  %v813_v7 = vmul.f32 0.01, %v775_v60 }
 0x113   : > { %v802_v8 = vadd.f32 %v1139_v3, %v737_v0  ;;  %v777_v9 = vpop.f32.mrf.mxu0  ;;  %v827_v10 = vsel %vm811_vm2, %v799_v55, %v819_v61  ;;  %v817_v14 = vmul.f32 0.01, %v791_v63  ;;  %vm809_vm6 = vcmp.ge.f32.partialorder %v791_v63, 0.0 }
 0x114   : > { %vm808_vm4 = vcmp.ge.f32.partialorder %v786_v2, 0.0  ;;  %v816_v11 = vmul.f32 0.01, %v786_v2  ;;  %v778_v12 = vadd.f32 %v777_v9, %v713_v4  ;;  %v793_v13 = vpop.f32.mrf.mxu1  ;;  %v821_v22 = vsel %vm805_vm3, %v775_v60, %v813_v7 }
 0x115   : > { %vm812_vm5 = vcmp.ge.f32.partialorder %v802_v8, 0.0  ;;  %v820_v15 = vmul.f32 0.01, %v802_v8  ;;  %v794_v16 = vadd.f32 %v793_v13, %v729_v5  ;;  %v825_v25 = vsel %vm809_vm6, %v791_v63, %v817_v14 }
 0x116   : > { %v824_v17 = vsel %vm808_vm4, %v786_v2, %v816_v11  ;;  %vm806_vm7 = vcmp.ge.f32.partialorder %v778_v12, 0.0  ;;  %v814_v18 = vmul.f32 0.01, %v778_v12 }
 0x117   : > { %v1021_v19 = vpack.c.bf16 %v824_v17, %v823_v6  ;;  %v828_v20 = vsel %vm812_vm5, %v802_v8, %v820_v15  ;;  %vm810_vm8 = vcmp.ge.f32.partialorder %v794_v16, 0.0  ;;  %v818_v21 = vmul.f32 0.01, %v794_v16 }
 0x118   : > { %v1031_v23 = vpack.c.bf16 %v828_v20, %v827_v10  ;;  %v822_v24 = vsel %vm806_vm7, %v778_v12, %v814_v18 }
 0x119   : > { %1033 = vst [vmem:[%s175_s21 + $0x8] sm:$0xff] %v1021_v19   ;;  %v1016_v26 = vpack.c.bf16 %v822_v24, %v821_v22  ;;  %v826_v27 = vsel %vm810_vm8, %v794_v16, %v818_v21 }
 0x11a   : > { %1035 = vst [vmem:[%s175_s21 + $0x18] sm:$0xff] %v1031_v23   ;;  %v1026_v28 = vpack.c.bf16 %v826_v27, %v825_v25 }
 0x11b   : > { %1017 = vst [vmem:[%s175_s21] sm:$0xff] %v1016_v26  }
 0x11c   : > { %1034 = vst [vmem:[%s175_s21 + $0x10] sm:$0xff] %v1026_v28  }
 0x11d PF: > { %s13_s12 = sadd.s32 1, %s1227_s12  }
 0x11e   : > { %p10_p4 = scmp.ge.s32.totalorder %s13_s12, 4  }
 0x120   :  { %12 = sbr.rel (!%p10_p4) target bundleno = 1 (0x1), region = 62 }

// kernel: simple_cnn_forward.7
= control target key start
LH: loop header
LB: loop body
LE: loop exit
PB: predicated region body
PF: predicated region fallthrough
CT: control target
= control target key end

     0   :  { %s4617_s1 = inlined_call_operand.vmem [shape: bf16[4096,128], index: 1, kind: input, shape index: {}]   ;;  %s4618_s0 = inlined_call_operand.vmem [shape: bf16[8,4096], index: 0, kind: input, shape index: {}]   ;;  %s4619_s2 = inlined_call_operand.vmem [shape: f32[1,128], index: 2, kind: input, shape index: {}]   ;;  %s4620_s3 = inlined_call_operand.vmem [shape: f32[8,128], index: 3, kind: output, shape index: {}]  }
   0x1   :  { %v3484_v0 = vld [vmem:[%s4617_s1 + $0x78] sm:$0xff]   ;;  %v3488_v4 = vld [vmem:[%s4617_s1 + $0x70] sm:$0xff]   ;;  %v3492_v8 = vld [vmem:[%s4617_s1 + $0x68] sm:$0xff]  }
   0x2   :  { %v3485_v1 = vld [vmem:[%s4617_s1 + $0xf8] sm:$0xff]   ;;  %3132 = vmatprep.subr.bf16.mxu0 %v3484_v0  ;;  %v3489_v5 = vld [vmem:[%s4617_s1 + $0xf0] sm:$0xff]   ;;  %v3493_v9 = vld [vmem:[%s4617_s1 + $0xe8] sm:$0xff]  }
   0x3   :  { %v3486_v2 = vld [vmem:[%s4617_s1 + $0x38] sm:$0xff]   ;;  %3154 = vmatprep.subr.bf16.mxu1 %v3485_v1  ;;  %v3490_v6 = vld [vmem:[%s4617_s1 + $0x30] sm:$0xff]   ;;  %v3494_v10 = vld [vmem:[%s4617_s1 + $0x28] sm:$0xff]  }
   0x4   :  { %v3487_v3 = vld [vmem:[%s4617_s1 + $0xb8] sm:$0xff]   ;;  %3133 = vmatpush3.bf16.msra.mxu0 %v3486_v2  ;;  %v3491_v7 = vld [vmem:[%s4617_s1 + $0xb0] sm:$0xff]   ;;  %v3495_v11 = vld [vmem:[%s4617_s1 + $0xa8] sm:$0xff]  }
   0x5   :  { %3155 = vmatpush3.bf16.msra.mxu1 %v3487_v3  ;;  %3134 = vmatprep.subr.bf16.mxu0 %v3488_v4  ;;  %v3496_v12 = vld [vmem:[%s4617_s1 + $0x60] sm:$0xff]   ;;  %v3500_v16 = vld [vmem:[%s4617_s1 + $0x58] sm:$0xff]   ;;  %v3504_v20 = vld [vmem:[%s4617_s1 + $0x50] sm:$0xff]  }
   0x6   :  { %3156 = vmatprep.subr.bf16.mxu1 %v3489_v5  ;;  %v3497_v13 = vld [vmem:[%s4617_s1 + $0xe0] sm:$0xff]   ;;  %v3501_v17 = vld [vmem:[%s4617_s1 + $0xd8] sm:$0xff]   ;;  %v3505_v21 = vld [vmem:[%s4617_s1 + $0xd0] sm:$0xff]  }
   0x7   :  { %v3498_v14 = vld [vmem:[%s4617_s1 + $0x20] sm:$0xff]   ;;  %v3502_v18 = vld [vmem:[%s4617_s1 + $0x18] sm:$0xff]   ;;  %v3506_v22 = vld [vmem:[%s4617_s1 + $0x10] sm:$0xff]  }
   0x8   :  { %3135 = vmatpush3.bf16.msra.mxu0 %v3490_v6  ;;  %v3499_v15 = vld [vmem:[%s4617_s1 + $0xa0] sm:$0xff]   ;;  %v3503_v19 = vld [vmem:[%s4617_s1 + $0x98] sm:$0xff]   ;;  %v3507_v23 = vld [vmem:[%s4617_s1 + $0x90] sm:$0xff]  }
   0x9   :  { %3157 = vmatpush3.bf16.msra.mxu1 %v3491_v7  ;;  %3136 = vmatprep.subr.bf16.mxu0 %v3492_v8  ;;  %v3508_v24 = vld [vmem:[%s4617_s1 + $0x48] sm:$0xff]   ;;  %v3512_v28 = vld [vmem:[%s4617_s1 + $0x40] sm:$0xff]   ;;  %v3520_v38 = vld [vmem:[%s4617_s1 + $0x178] sm:$0xff]  }
   0xa   :  { %3158 = vmatprep.subr.bf16.mxu1 %v3493_v9  ;;  %v3509_v25 = vld [vmem:[%s4617_s1 + $0xc8] sm:$0xff]   ;;  %v3513_v29 = vld [vmem:[%s4617_s1 + $0xc0] sm:$0xff]   ;;  %v3521_v39 = vld [vmem:[%s4617_s1 + $0x1f8] sm:$0xff]  }
   0xb   :  { %v3510_v26 = vld [vmem:[%s4617_s1 + $0x8] sm:$0xff]   ;;  %v3514_v30 = vld [vmem:[%s4617_s1] sm:$0xff]   ;;  %v3522_v40 = vld [vmem:[%s4617_s1 + $0x138] sm:$0xff]  }
   0xc   :  { %3137 = vmatpush3.bf16.msra.mxu0 %v3494_v10  ;;  %v3511_v27 = vld [vmem:[%s4617_s1 + $0x88] sm:$0xff]   ;;  %v3515_v31 = vld [vmem:[%s4617_s1 + $0x80] sm:$0xff]   ;;  %v3523_v41 = vld [vmem:[%s4617_s1 + $0x1b8] sm:$0xff]  }
   0xd   :  { %3159 = vmatpush3.bf16.msra.mxu1 %v3495_v11  ;;  %3138 = vmatprep.subr.bf16.mxu0 %v3496_v12  ;;  %v15_v32 = vld [vmem:[%s4618_s0] sm:$0xff]  ;;  %v16_v33 = vld [vmem:[%s4618_s0 + $0x8] sm:$0xff]  ;;  %v3524_v42 = vld [vmem:[%s4617_s1 + $0x170] sm:$0xff]  }
   0xe   :  { %3160 = vmatprep.subr.bf16.mxu1 %v3497_v13  ;;  %v2844_v34 = vcombine.low %v15_v32, %v15_v32  ;;  %v2845_v35 = vcombine.high %v15_v32, %v15_v32  ;;  %v2846_v36 = vcombine.low %v16_v33, %v16_v33  ;;  %v2847_v37 = vcombine.high %v16_v33, %v16_v33  ;;  %v3525_v43 = vld [vmem:[%s4617_s1 + $0x1f0] sm:$0xff]   ;;  %v3528_v46 = vld [vmem:[%s4617_s1 + $0x168] sm:$0xff]   ;;  %v3532_v50 = vld [vmem:[%s4617_s1 + $0x160] sm:$0xff]  }
   0xf   :  { %v3526_v44 = vld [vmem:[%s4617_s1 + $0x130] sm:$0xff]   ;;  %v3529_v47 = vld [vmem:[%s4617_s1 + $0x1e8] sm:$0xff]   ;;  %v3533_v51 = vld [vmem:[%s4617_s1 + $0x1e0] sm:$0xff]  }
  0x10   :  { %3139 = vmatpush3.bf16.msra.mxu0 %v3498_v14  ;;  %2230 = vmatprep.mubr.bf16.mxu0 %v2845_v35  ;;  %v3527_v45 = vld [vmem:[%s4617_s1 + $0x1b0] sm:$0xff]   ;;  %v3530_v48 = vld [vmem:[%s4617_s1 + $0x128] sm:$0xff]   ;;  %v3534_v52 = vld [vmem:[%s4617_s1 + $0x120] sm:$0xff]  }
  0x11   :  { %3161 = vmatpush3.bf16.msra.mxu1 %v3499_v15  ;;  %3140 = vmatprep.subr.bf16.mxu0 %v3500_v16  ;;  %v3531_v49 = vld [vmem:[%s4617_s1 + $0x1a8] sm:$0xff]   ;;  %v3535_v53 = vld [vmem:[%s4617_s1 + $0x1a0] sm:$0xff]   ;;  %v3536_v54 = vld [vmem:[%s4617_s1 + $0x158] sm:$0xff]  }
  0x12   :  { %3162 = vmatprep.subr.bf16.mxu1 %v3501_v17  ;;  %2270 = vmatprep.mubr.bf16.mxu1 %v2847_v37  ;;  %v3537_v55 = vld [vmem:[%s4617_s1 + $0x1d8] sm:$0xff]   ;;  %v3540_v58 = vld [vmem:[%s4617_s1 + $0x150] sm:$0xff]   ;;  %v3544_v62 = vld [vmem:[%s4617_s1 + $0x148] sm:$0xff]  }
  0x13   :  { %v3538_v56 = vld [vmem:[%s4617_s1 + $0x118] sm:$0xff]   ;;  %v3541_v59 = vld [vmem:[%s4617_s1 + $0x1d0] sm:$0xff]   ;;  %v3545_v63 = vld [vmem:[%s4617_s1 + $0x1c8] sm:$0xff]  }
  0x14   :  { %3141 = vmatpush3.bf16.msra.mxu0 %v3502_v18  ;;  %v3539_v57 = vld [vmem:[%s4617_s1 + $0x198] sm:$0xff]   ;;  %v3542_v60 = vld [vmem:[%s4617_s1 + $0x110] sm:$0xff]   ;;  %v3546_v0 = vld [vmem:[%s4617_s1 + $0x108] sm:$0xff]  }
  0x15   :  { %3163 = vmatpush3.bf16.msra.mxu1 %v3503_v19  ;;  %3142 = vmatprep.subr.bf16.mxu0 %v3504_v20  ;;  %v3543_v61 = vld [vmem:[%s4617_s1 + $0x190] sm:$0xff]   ;;  %v3547_v1 = vld [vmem:[%s4617_s1 + $0x188] sm:$0xff]   ;;  %v3548_v2 = vld [vmem:[%s4617_s1 + $0x140] sm:$0xff]  }
  0x16   :  { %3164 = vmatprep.subr.bf16.mxu1 %v3505_v21  ;;  %v3549_v3 = vld [vmem:[%s4617_s1 + $0x1c0] sm:$0xff]   ;;  %v17_v6 = vld [vmem:[%s4618_s0 + $0x10] sm:$0xff]  ;;  %v18_v9 = vld [vmem:[%s4618_s0 + $0x18] sm:$0xff] }
  0x17   :  { %v3550_v4 = vld [vmem:[%s4617_s1 + $0x100] sm:$0xff]   ;;  %v2848_v7 = vcombine.low %v17_v6, %v17_v6  ;;  %v2849_v8 = vcombine.high %v17_v6, %v17_v6  ;;  %v2850_v10 = vcombine.low %v18_v9, %v18_v9  ;;  %v2851_v11 = vcombine.high %v18_v9, %v18_v9  ;;  %v3556_v12 = vld [vmem:[%s4617_s1 + $0x278] sm:$0xff]   ;;  %v3560_v16 = vld [vmem:[%s4617_s1 + $0x270] sm:$0xff]  }
  0x18   :  { %3143 = vmatpush3.bf16.msra.mxu0 %v3506_v22  ;;  %v3551_v5 = vld [vmem:[%s4617_s1 + $0x180] sm:$0xff]   ;;  %v3557_v13 = vld [vmem:[%s4617_s1 + $0x2f8] sm:$0xff]   ;;  %v3561_v17 = vld [vmem:[%s4617_s1 + $0x2f0] sm:$0xff]  }
  0x19   :  { %3165 = vmatpush3.bf16.msra.mxu1 %v3507_v23  ;;  %3144 = vmatprep.subr.bf16.mxu0 %v3508_v24  ;;  %v3558_v14 = vld [vmem:[%s4617_s1 + $0x238] sm:$0xff]   ;;  %v3562_v18 = vld [vmem:[%s4617_s1 + $0x230] sm:$0xff]   ;;  %v3564_v20 = vld [vmem:[%s4617_s1 + $0x268] sm:$0xff]  }
  0x1a   :  { %3166 = vmatprep.subr.bf16.mxu1 %v3509_v25  ;;  %v3559_v15 = vld [vmem:[%s4617_s1 + $0x2b8] sm:$0xff]   ;;  %v3563_v19 = vld [vmem:[%s4617_s1 + $0x2b0] sm:$0xff]   ;;  %v3565_v21 = vld [vmem:[%s4617_s1 + $0x2e8] sm:$0xff]  }
  0x1b   :  { %v3566_v22 = vld [vmem:[%s4617_s1 + $0x228] sm:$0xff]   ;;  %v3568_v24 = vld [vmem:[%s4617_s1 + $0x260] sm:$0xff]   ;;  %v3576_v32 = vld [vmem:[%s4617_s1 + $0x250] sm:$0xff]  }
  0x1c   :  { %3145 = vmatpush3.bf16.msra.mxu0 %v3510_v26  ;;  %v3567_v23 = vld [vmem:[%s4617_s1 + $0x2a8] sm:$0xff]   ;;  %v3569_v25 = vld [vmem:[%s4617_s1 + $0x2e0] sm:$0xff]   ;;  %v3577_v33 = vld [vmem:[%s4617_s1 + $0x2d0] sm:$0xff]  }
  0x1d   :  { %3167 = vmatpush3.bf16.msra.mxu1 %v3511_v27  ;;  %3146 = vmatprep.subr.bf16.mxu0 %v3512_v28  ;;  %v3570_v26 = vld [vmem:[%s4617_s1 + $0x220] sm:$0xff]   ;;  %v3572_v28 = vld [vmem:[%s4617_s1 + $0x258] sm:$0xff]   ;;  %v3579_v35 = vld [vmem:[%s4617_s1 + $0x290] sm:$0xff]  }
  0x1e   :  { %3168 = vmatprep.subr.bf16.mxu1 %v3513_v29  ;;  %v3571_v27 = vld [vmem:[%s4617_s1 + $0x2a0] sm:$0xff]   ;;  %v3573_v29 = vld [vmem:[%s4617_s1 + $0x2d8] sm:$0xff]   ;;  %v3581_v37 = vld [vmem:[%s4617_s1 + $0x2c8] sm:$0xff]  }
  0x1f   :  { %v3612_v6 = vld [vmem:[%s4617_s1 + $0x350] sm:$0xff]  }
  0x20   :  { %3147 = vmatpush3.bf16.msra.mxu0 %v3514_v30  ;;  %v3574_v30 = vld [vmem:[%s4617_s1 + $0x218] sm:$0xff]   ;;  %v3615_v9 = vld [vmem:[%s4617_s1 + $0x390] sm:$0xff]  }
  0x21   :  { %3169 = vmatpush3.bf16.msra.mxu1 %v3515_v31  ;;  %3176 = vmatprep.subr.bf16.mxu0 %v3520_v38  ;;  %v3575_v31 = vld [vmem:[%s4617_s1 + $0x298] sm:$0xff]   ;;  %v3582_v38 = vld [vmem:[%s4617_s1 + $0x208] sm:$0xff]  }
  0x22   :  { %3198 = vmatprep.subr.bf16.mxu1 %v3521_v39  ;;  %v3583_v39 = vld [vmem:[%s4617_s1 + $0x288] sm:$0xff]  }
  0x23   :  { %2231 = vmatmul.mubr.bf16.vlgmr.msra.gmra.mxu0 %v2844_v34  ;;  %v3578_v34 = vld [vmem:[%s4617_s1 + $0x210] sm:$0xff]  }
  0x24   :  { %2271 = vmatmul.mubr.bf16.vlgmr.msra.gmra.mxu1 %v2846_v36  ;;  %3177 = vmatpush3.bf16.msra.mxu0 %v3522_v40  ;;  %v3580_v36 = vld [vmem:[%s4617_s1 + $0x248] sm:$0xff]   ;;  %v3584_v40 = vld [vmem:[%s4617_s1 + $0x240] sm:$0xff]  }
  0x25   :  { %3199 = vmatpush3.bf16.msra.mxu1 %v3523_v41  ;;  %3178 = vmatprep.subr.bf16.mxu0 %v3524_v42  ;;  %v3585_v41 = vld [vmem:[%s4617_s1 + $0x2c0] sm:$0xff]  }
  0x26   :  { %3200 = vmatprep.subr.bf16.mxu1 %v3525_v43  ;;  %2310 = vmatprep.mubr.bf16.mxu0 %v2849_v8  ;;  %v3586_v42 = vld [vmem:[%s4617_s1 + $0x200] sm:$0xff]   ;;  %v3614_v8 = vld [vmem:[%s4617_s1 + $0x310] sm:$0xff]  }
  0x27   :  { %2350 = vmatprep.mubr.bf16.mxu1 %v2851_v11  ;;  %v3587_v43 = vld [vmem:[%s4617_s1 + $0x280] sm:$0xff]   ;;  %v3617_v11 = vld [vmem:[%s4617_s1 + $0x3c8] sm:$0xff]  }
  0x28   :  { %3179 = vmatpush3.bf16.msra.mxu0 %v3526_v44  ;;  %v19_v44 = vld [vmem:[%s4618_s0 + $0x20] sm:$0xff] }
  0x29   :  { %3201 = vmatpush3.bf16.msra.mxu1 %v3527_v45  ;;  %3180 = vmatprep.subr.bf16.mxu0 %v3528_v46  ;;  %v20_v45 = vld [vmem:[%s4618_s0 + $0x28] sm:$0xff]  ;;  %v2852_v46 = vcombine.low %v19_v44, %v19_v44 }
  0x2a   :  { %3202 = vmatprep.subr.bf16.mxu1 %v3529_v47  ;;  %v2853_v47 = vcombine.high %v19_v44, %v19_v44  ;;  %v3648_v44 = vld [vmem:[%s4617_s1 + $0x450] sm:$0xff]  }
  0x2c   :  { %3181 = vmatpush3.bf16.msra.mxu0 %v3530_v48  ;;  %v2854_v48 = vcombine.low %v20_v45, %v20_v45 }
  0x2d   :  { %3203 = vmatpush3.bf16.msra.mxu1 %v3531_v49  ;;  %3182 = vmatprep.subr.bf16.mxu0 %v3532_v50  ;;  %v2855_v49 = vcombine.high %v20_v45, %v20_v45  ;;  %v3592_v50 = vld [vmem:[%s4617_s1 + $0x378] sm:$0xff]   ;;  %v3649_v45 = vld [vmem:[%s4617_s1 + $0x4d0] sm:$0xff]  }
  0x2e   :  { %3204 = vmatprep.subr.bf16.mxu1 %v3533_v51  ;;  %v3593_v51 = vld [vmem:[%s4617_s1 + $0x3f8] sm:$0xff]  }
  0x30   :  { %3183 = vmatpush3.bf16.msra.mxu0 %v3534_v52  ;;  %v3594_v52 = vld [vmem:[%s4617_s1 + $0x338] sm:$0xff]  }
  0x31   :  { %3205 = vmatpush3.bf16.msra.mxu1 %v3535_v53  ;;  %3184 = vmatprep.subr.bf16.mxu0 %v3536_v54  ;;  %v3595_v53 = vld [vmem:[%s4617_s1 + $0x3b8] sm:$0xff]   ;;  %v3596_v54 = vld [vmem:[%s4617_s1 + $0x370] sm:$0xff]  }
  0x32   :  { %3206 = vmatprep.subr.bf16.mxu1 %v3537_v55  ;;  %v3597_v55 = vld [vmem:[%s4617_s1 + $0x3f0] sm:$0xff]  }
  0x34   :  { %3185 = vmatpush3.bf16.msra.mxu0 %v3538_v56  ;;  %v3598_v56 = vld [vmem:[%s4617_s1 + $0x330] sm:$0xff]  }
  0x35   :  { %3207 = vmatpush3.bf16.msra.mxu1 %v3539_v57  ;;  %3186 = vmatprep.subr.bf16.mxu0 %v3540_v58  ;;  %v3599_v57 = vld [vmem:[%s4617_s1 + $0x3b0] sm:$0xff]   ;;  %v3600_v58 = vld [vmem:[%s4617_s1 + $0x368] sm:$0xff]  }
  0x36   :  { %3208 = vmatprep.subr.bf16.mxu1 %v3541_v59  ;;  %v3601_v59 = vld [vmem:[%s4617_s1 + $0x3e8] sm:$0xff]  }
  0x38   :  { %3187 = vmatpush3.bf16.msra.mxu0 %v3542_v60  ;;  %v3602_v60 = vld [vmem:[%s4617_s1 + $0x328] sm:$0xff]  }
  0x39   :  { %3209 = vmatpush3.bf16.msra.mxu1 %v3543_v61  ;;  %3188 = vmatprep.subr.bf16.mxu0 %v3544_v62  ;;  %v3603_v61 = vld [vmem:[%s4617_s1 + $0x3a8] sm:$0xff]   ;;  %v3604_v62 = vld [vmem:[%s4617_s1 + $0x360] sm:$0xff]  }
  0x3a   :  { %3210 = vmatprep.subr.bf16.mxu1 %v3545_v63  ;;  %v3605_v63 = vld [vmem:[%s4617_s1 + $0x3e0] sm:$0xff]  }
  0x3c   :  { %3189 = vmatpush3.bf16.msra.mxu0 %v3546_v0  ;;  %v3606_v0 = vld [vmem:[%s4617_s1 + $0x320] sm:$0xff]  }
  0x3d   :  { %3211 = vmatpush3.bf16.msra.mxu1 %v3547_v1  ;;  %3190 = vmatprep.subr.bf16.mxu0 %v3548_v2  ;;  %v3607_v1 = vld [vmem:[%s4617_s1 + $0x3a0] sm:$0xff]   ;;  %v3608_v2 = vld [vmem:[%s4617_s1 + $0x358] sm:$0xff]  }
  0x3e   :  { %3212 = vmatprep.subr.bf16.mxu1 %v3549_v3  ;;  %v3609_v3 = vld [vmem:[%s4617_s1 + $0x3d8] sm:$0xff]  }
  0x40   :  { %3191 = vmatpush3.bf16.msra.mxu0 %v3550_v4  ;;  %v3610_v4 = vld [vmem:[%s4617_s1 + $0x318] sm:$0xff]  }
  0x41   :  { %3213 = vmatpush3.bf16.msra.mxu1 %v3551_v5  ;;  %3220 = vmatprep.subr.bf16.mxu0 %v3556_v12  ;;  %v3611_v5 = vld [vmem:[%s4617_s1 + $0x398] sm:$0xff]   ;;  %v3618_v12 = vld [vmem:[%s4617_s1 + $0x308] sm:$0xff]  }
  0x42   :  { %3242 = vmatprep.subr.bf16.mxu1 %v3557_v13  ;;  %v3619_v13 = vld [vmem:[%s4617_s1 + $0x388] sm:$0xff]  }
  0x43   :  { %2311 = vmatmul.mubr.bf16.vlgmr.msra.gmra.mxu0 %v2848_v7  ;;  %v3613_v7 = vld [vmem:[%s4617_s1 + $0x3d0] sm:$0xff]  }
  0x44   :  { %2351 = vmatmul.mubr.bf16.vlgmr.msra.gmra.mxu1 %v2850_v10  ;;  %3221 = vmatpush3.bf16.msra.mxu0 %v3558_v14  ;;  %v3616_v10 = vld [vmem:[%s4617_s1 + $0x348] sm:$0xff]   ;;  %v3620_v14 = vld [vmem:[%s4617_s1 + $0x340] sm:$0xff]  }
  0x45   :  { %3243 = vmatpush3.bf16.msra.mxu1 %v3559_v15  ;;  %3222 = vmatprep.subr.bf16.mxu0 %v3560_v16  ;;  %v3621_v15 = vld [vmem:[%s4617_s1 + $0x3c0] sm:$0xff]  }
  0x46   :  { %3244 = vmatprep.subr.bf16.mxu1 %v3561_v17  ;;  %2390 = vmatprep.mubr.bf16.mxu0 %v2853_v47  ;;  %v3622_v16 = vld [vmem:[%s4617_s1 + $0x300] sm:$0xff]   ;;  %v3651_v47 = vld [vmem:[%s4617_s1 + $0x490] sm:$0xff]  }
  0x47   :  { %2430 = vmatprep.mubr.bf16.mxu1 %v2855_v49  ;;  %v3623_v17 = vld [vmem:[%s4617_s1 + $0x380] sm:$0xff]   ;;  %v3653_v49 = vld [vmem:[%s4617_s1 + $0x4c8] sm:$0xff]  }
  0x48   :  { %3223 = vmatpush3.bf16.msra.mxu0 %v3562_v18  ;;  %v21_v18 = vld [vmem:[%s4618_s0 + $0x30] sm:$0xff] }
  0x49   :  { %3245 = vmatpush3.bf16.msra.mxu1 %v3563_v19  ;;  %3224 = vmatprep.subr.bf16.mxu0 %v3564_v20  ;;  %v22_v19 = vld [vmem:[%s4618_s0 + $0x38] sm:$0xff]  ;;  %v2856_v20 = vcombine.low %v21_v18, %v21_v18 }
  0x4a   :  { %3246 = vmatprep.subr.bf16.mxu1 %v3565_v21  ;;  %v2857_v21 = vcombine.high %v21_v18, %v21_v18  ;;  %v3684_v18 = vld [vmem:[%s4617_s1 + $0x550] sm:$0xff]  }
  0x4c   :  { %3225 = vmatpush3.bf16.msra.mxu0 %v3566_v22  ;;  %v2858_v22 = vcombine.low %v22_v19, %v22_v19 }
  0x4d   :  { %3247 = vmatpush3.bf16.msra.mxu1 %v3567_v23  ;;  %3226 = vmatprep.subr.bf16.mxu0 %v3568_v24  ;;  %v3628_v23 = vld [vmem:[%s4617_s1 + $0x478] sm:$0xff]   ;;  %v2859_v24 = vcombine.high %v22_v19, %v22_v19  ;;  %v3685_v19 = vld [vmem:[%s4617_s1 + $0x5d0] sm:$0xff]  }
  0x4e   :  { %3248 = vmatprep.subr.bf16.mxu1 %v3569_v25  ;;  %v3629_v25 = vld [vmem:[%s4617_s1 + $0x4f8] sm:$0xff]  }
  0x50   :  { %3227 = vmatpush3.bf16.msra.mxu0 %v3570_v26  ;;  %v3630_v26 = vld [vmem:[%s4617_s1 + $0x438] sm:$0xff]  }
  0x51   :  { %3249 = vmatpush3.bf16.msra.mxu1 %v3571_v27  ;;  %3228 = vmatprep.subr.bf16.mxu0 %v3572_v28  ;;  %v3631_v27 = vld [vmem:[%s4617_s1 + $0x4b8] sm:$0xff]   ;;  %v3632_v28 = vld [vmem:[%s4617_s1 + $0x470] sm:$0xff]  }
  0x52   :  { %3250 = vmatprep.subr.bf16.mxu1 %v3573_v29  ;;  %v3633_v29 = vld [vmem:[%s4617_s1 + $0x4f0] sm:$0xff]  }
  0x54   :  { %3229 = vmatpush3.bf16.msra.mxu0 %v3574_v30  ;;  %v3634_v30 = vld [vmem:[%s4617_s1 + $0x430] sm:$0xff]  }
  0x55   :  { %3251 = vmatpush3.bf16.msra.mxu1 %v3575_v31  ;;  %3230 = vmatprep.subr.bf16.mxu0 %v3576_v32  ;;  %v3635_v31 = vld [vmem:[%s4617_s1 + $0x4b0] sm:$0xff]   ;;  %v3636_v32 = vld [vmem:[%s4617_s1 + $0x468] sm:$0xff]  }
  0x56   :  { %3252 = vmatprep.subr.bf16.mxu1 %v3577_v33  ;;  %v3637_v33 = vld [vmem:[%s4617_s1 + $0x4e8] sm:$0xff]  }
  0x58   :  { %3231 = vmatpush3.bf16.msra.mxu0 %v3578_v34  ;;  %v3638_v34 = vld [vmem:[%s4617_s1 + $0x428] sm:$0xff]  }
  0x59   :  { %3253 = vmatpush3.bf16.msra.mxu1 %v3579_v35  ;;  %3232 = vmatprep.subr.bf16.mxu0 %v3580_v36  ;;  %v3639_v35 = vld [vmem:[%s4617_s1 + $0x4a8] sm:$0xff]   ;;  %v3640_v36 = vld [vmem:[%s4617_s1 + $0x460] sm:$0xff]  }
  0x5a   :  { %3254 = vmatprep.subr.bf16.mxu1 %v3581_v37  ;;  %v3641_v37 = vld [vmem:[%s4617_s1 + $0x4e0] sm:$0xff]  }
  0x5c   :  { %3233 = vmatpush3.bf16.msra.mxu0 %v3582_v38  ;;  %v3642_v38 = vld [vmem:[%s4617_s1 + $0x420] sm:$0xff]  }
  0x5d   :  { %3255 = vmatpush3.bf16.msra.mxu1 %v3583_v39  ;;  %3234 = vmatprep.subr.bf16.mxu0 %v3584_v40  ;;  %v3643_v39 = vld [vmem:[%s4617_s1 + $0x4a0] sm:$0xff]   ;;  %v3644_v40 = vld [vmem:[%s4617_s1 + $0x458] sm:$0xff]  }
  0x5e   :  { %3256 = vmatprep.subr.bf16.mxu1 %v3585_v41  ;;  %v3645_v41 = vld [vmem:[%s4617_s1 + $0x4d8] sm:$0xff]  }
  0x60   :  { %3235 = vmatpush3.bf16.msra.mxu0 %v3586_v42  ;;  %v3646_v42 = vld [vmem:[%s4617_s1 + $0x418] sm:$0xff]  }
  0x61   :  { %3257 = vmatpush3.bf16.msra.mxu1 %v3587_v43  ;;  %3264 = vmatprep.subr.bf16.mxu0 %v3592_v50  ;;  %v3647_v43 = vld [vmem:[%s4617_s1 + $0x498] sm:$0xff]   ;;  %v3654_v50 = vld [vmem:[%s4617_s1 + $0x408] sm:$0xff]  }
  0x62   :  { %3286 = vmatprep.subr.bf16.mxu1 %v3593_v51  ;;  %v3655_v51 = vld [vmem:[%s4617_s1 + $0x488] sm:$0xff]  }
  0x63   :  { %2391 = vmatmul.mubr.bf16.vlgmr.msra.gmra.mxu0 %v2852_v46  ;;  %v3650_v46 = vld [vmem:[%s4617_s1 + $0x410] sm:$0xff]  }
  0x64   :  { %2431 = vmatmul.mubr.bf16.vlgmr.msra.gmra.mxu1 %v2854_v48  ;;  %3265 = vmatpush3.bf16.msra.mxu0 %v3594_v52  ;;  %v3652_v48 = vld [vmem:[%s4617_s1 + $0x448] sm:$0xff]   ;;  %v3656_v52 = vld [vmem:[%s4617_s1 + $0x440] sm:$0xff]  }
  0x65   :  { %3287 = vmatpush3.bf16.msra.mxu1 %v3595_v53  ;;  %3266 = vmatprep.subr.bf16.mxu0 %v3596_v54  ;;  %v3657_v53 = vld [vmem:[%s4617_s1 + $0x4c0] sm:$0xff]  }
  0x66   :  { %3288 = vmatprep.subr.bf16.mxu1 %v3597_v55  ;;  %2470 = vmatprep.mubr.bf16.mxu0 %v2857_v21  ;;  %v3658_v54 = vld [vmem:[%s4617_s1 + $0x400] sm:$0xff]   ;;  %v3687_v21 = vld [vmem:[%s4617_s1 + $0x590] sm:$0xff]  }
  0x67   :  { %2510 = vmatprep.mubr.bf16.mxu1 %v2859_v24  ;;  %v3659_v55 = vld [vmem:[%s4617_s1 + $0x480] sm:$0xff]   ;;  %v3690_v24 = vld [vmem:[%s4617_s1 + $0x508] sm:$0xff]  }
  0x68   :  { %3267 = vmatpush3.bf16.msra.mxu0 %v3598_v56  ;;  %v23_v56 = vld [vmem:[%s4618_s0 + $0x40] sm:$0xff] }
  0x69   :  { %3289 = vmatpush3.bf16.msra.mxu1 %v3599_v57  ;;  %3268 = vmatprep.subr.bf16.mxu0 %v3600_v58  ;;  %v2860_v57 = vcombine.low %v23_v56, %v23_v56  ;;  %v2861_v58 = vcombine.high %v23_v56, %v23_v56  ;;  %v3720_v56 = vld [vmem:[%s4617_s1 + $0x650] sm:$0xff]  }
  0x6a   :  { %3290 = vmatprep.subr.bf16.mxu1 %v3601_v59  ;;  %v24_v59 = vld [vmem:[%s4618_s0 + $0x48] sm:$0xff] }
  0x6c   :  { %3269 = vmatpush3.bf16.msra.mxu0 %v3602_v60  ;;  %v2862_v60 = vcombine.low %v24_v59, %v24_v59 }
  0x6d   :  { %3291 = vmatpush3.bf16.msra.mxu1 %v3603_v61  ;;  %3270 = vmatprep.subr.bf16.mxu0 %v3604_v62  ;;  %v2863_v61 = vcombine.high %v24_v59, %v24_v59  ;;  %v3664_v62 = vld [vmem:[%s4617_s1 + $0x578] sm:$0xff]   ;;  %v3723_v59 = vld [vmem:[%s4617_s1 + $0x690] sm:$0xff]  }
  0x6e   :  { %3292 = vmatprep.subr.bf16.mxu1 %v3605_v63  ;;  %v3665_v63 = vld [vmem:[%s4617_s1 + $0x5f8] sm:$0xff]  }
  0x70   :  { %3271 = vmatpush3.bf16.msra.mxu0 %v3606_v0  ;;  %v3666_v0 = vld [vmem:[%s4617_s1 + $0x538] sm:$0xff]  }
  0x71   :  { %3293 = vmatpush3.bf16.msra.mxu1 %v3607_v1  ;;  %3272 = vmatprep.subr.bf16.mxu0 %v3608_v2  ;;  %v3667_v1 = vld [vmem:[%s4617_s1 + $0x5b8] sm:$0xff]   ;;  %v3668_v2 = vld [vmem:[%s4617_s1 + $0x570] sm:$0xff]  }
  0x72   :  { %3294 = vmatprep.subr.bf16.mxu1 %v3609_v3  ;;  %v3669_v3 = vld [vmem:[%s4617_s1 + $0x5f0] sm:$0xff]  }
  0x74   :  { %3273 = vmatpush3.bf16.msra.mxu0 %v3610_v4  ;;  %v3670_v4 = vld [vmem:[%s4617_s1 + $0x530] sm:$0xff]  }
  0x75   :  { %3295 = vmatpush3.bf16.msra.mxu1 %v3611_v5  ;;  %3274 = vmatprep.subr.bf16.mxu0 %v3612_v6  ;;  %v3671_v5 = vld [vmem:[%s4617_s1 + $0x5b0] sm:$0xff]   ;;  %v3672_v6 = vld [vmem:[%s4617_s1 + $0x568] sm:$0xff]  }
  0x76   :  { %3296 = vmatprep.subr.bf16.mxu1 %v3613_v7  ;;  %v3673_v7 = vld [vmem:[%s4617_s1 + $0x5e8] sm:$0xff]  }
  0x78   :  { %3275 = vmatpush3.bf16.msra.mxu0 %v3614_v8  ;;  %v3674_v8 = vld [vmem:[%s4617_s1 + $0x528] sm:$0xff]  }
  0x79   :  { %3297 = vmatpush3.bf16.msra.mxu1 %v3615_v9  ;;  %3276 = vmatprep.subr.bf16.mxu0 %v3616_v10  ;;  %v3675_v9 = vld [vmem:[%s4617_s1 + $0x5a8] sm:$0xff]   ;;  %v3676_v10 = vld [vmem:[%s4617_s1 + $0x560] sm:$0xff]  }
  0x7a   :  { %3298 = vmatprep.subr.bf16.mxu1 %v3617_v11  ;;  %v3677_v11 = vld [vmem:[%s4617_s1 + $0x5e0] sm:$0xff]  }
  0x7c   :  { %3277 = vmatpush3.bf16.msra.mxu0 %v3618_v12  ;;  %v3678_v12 = vld [vmem:[%s4617_s1 + $0x520] sm:$0xff]  }
  0x7d   :  { %3299 = vmatpush3.bf16.msra.mxu1 %v3619_v13  ;;  %3278 = vmatprep.subr.bf16.mxu0 %v3620_v14  ;;  %v3679_v13 = vld [vmem:[%s4617_s1 + $0x5a0] sm:$0xff]   ;;  %v3680_v14 = vld [vmem:[%s4617_s1 + $0x558] sm:$0xff]  }
  0x7e   :  { %3300 = vmatprep.subr.bf16.mxu1 %v3621_v15  ;;  %v3681_v15 = vld [vmem:[%s4617_s1 + $0x5d8] sm:$0xff]  }
  0x80   :  { %3279 = vmatpush3.bf16.msra.mxu0 %v3622_v16  ;;  %v3682_v16 = vld [vmem:[%s4617_s1 + $0x518] sm:$0xff]  }
  0x81   :  { %3301 = vmatpush3.bf16.msra.mxu1 %v3623_v17  ;;  %3308 = vmatprep.subr.bf16.mxu0 %v3628_v23  ;;  %v3683_v17 = vld [vmem:[%s4617_s1 + $0x598] sm:$0xff]   ;;  %v3689_v23 = vld [vmem:[%s4617_s1 + $0x5c8] sm:$0xff]  }
  0x82   :  { %3330 = vmatprep.subr.bf16.mxu1 %v3629_v25  ;;  %v3691_v25 = vld [vmem:[%s4617_s1 + $0x588] sm:$0xff]  }
  0x83   :  { %2471 = vmatmul.mubr.bf16.vlgmr.msra.gmra.mxu0 %v2856_v20  ;;  %v3686_v20 = vld [vmem:[%s4617_s1 + $0x510] sm:$0xff]  }
  0x84   :  { %2511 = vmatmul.mubr.bf16.vlgmr.msra.gmra.mxu1 %v2858_v22  ;;  %3309 = vmatpush3.bf16.msra.mxu0 %v3630_v26  ;;  %v3688_v22 = vld [vmem:[%s4617_s1 + $0x548] sm:$0xff]   ;;  %v3692_v26 = vld [vmem:[%s4617_s1 + $0x540] sm:$0xff]  }
  0x85   :  { %3331 = vmatpush3.bf16.msra.mxu1 %v3631_v27  ;;  %3310 = vmatprep.subr.bf16.mxu0 %v3632_v28  ;;  %v3693_v27 = vld [vmem:[%s4617_s1 + $0x5c0] sm:$0xff]  }
  0x86   :  { %3332 = vmatprep.subr.bf16.mxu1 %v3633_v29  ;;  %2550 = vmatprep.mubr.bf16.mxu0 %v2861_v58  ;;  %v3694_v28 = vld [vmem:[%s4617_s1 + $0x500] sm:$0xff]   ;;  %v3722_v58 = vld [vmem:[%s4617_s1 + $0x610] sm:$0xff]  }
  0x87   :  { %2590 = vmatprep.mubr.bf16.mxu1 %v2863_v61  ;;  %v3695_v29 = vld [vmem:[%s4617_s1 + $0x580] sm:$0xff]   ;;  %v3725_v61 = vld [vmem:[%s4617_s1 + $0x6c8] sm:$0xff]  }
  0x88   :  { %3311 = vmatpush3.bf16.msra.mxu0 %v3634_v30  ;;  %v25_v30 = vld [vmem:[%s4618_s0 + $0x50] sm:$0xff] }
  0x89   :  { %3333 = vmatpush3.bf16.msra.mxu1 %v3635_v31  ;;  %3312 = vmatprep.subr.bf16.mxu0 %v3636_v32  ;;  %v26_v31 = vld [vmem:[%s4618_s0 + $0x58] sm:$0xff]  ;;  %v2864_v32 = vcombine.low %v25_v30, %v25_v30 }
  0x8a   :  { %3334 = vmatprep.subr.bf16.mxu1 %v3637_v33  ;;  %v2865_v33 = vcombine.high %v25_v30, %v25_v30  ;;  %v3743_v30 = vld [vmem:[%s4617_s1 + $0x7b0] sm:$0xff]  }
  0x8c   :  { %3313 = vmatpush3.bf16.msra.mxu0 %v3638_v34  ;;  %v2866_v34 = vcombine.low %v26_v31, %v26_v31 }
  0x8d   :  { %3335 = vmatpush3.bf16.msra.mxu1 %v3639_v35  ;;  %3314 = vmatprep.subr.bf16.mxu0 %v3640_v36  ;;  %v2867_v35 = vcombine.high %v26_v31, %v26_v31  ;;  %v3700_v36 = vld [vmem:[%s4617_s1 + $0x678] sm:$0xff]   ;;  %v3744_v31 = vld [vmem:[%s4617_s1 + $0x768] sm:$0xff]  }
  0x8e   :  { %3336 = vmatprep.subr.bf16.mxu1 %v3641_v37  ;;  %v3701_v37 = vld [vmem:[%s4617_s1 + $0x6f8] sm:$0xff]  }
  0x90   :  { %3315 = vmatpush3.bf16.msra.mxu0 %v3642_v38  ;;  %v3702_v38 = vld [vmem:[%s4617_s1 + $0x638] sm:$0xff]  }
  0x91   :  { %3337 = vmatpush3.bf16.msra.mxu1 %v3643_v39  ;;  %3316 = vmatprep.subr.bf16.mxu0 %v3644_v40  ;;  %v3703_v39 = vld [vmem:[%s4617_s1 + $0x6b8] sm:$0xff]   ;;  %v3704_v40 = vld [vmem:[%s4617_s1 + $0x670] sm:$0xff]  }
  0x92   :  { %3338 = vmatprep.subr.bf16.mxu1 %v3645_v41  ;;  %v3705_v41 = vld [vmem:[%s4617_s1 + $0x6f0] sm:$0xff]  }
  0x94   :  { %3317 = vmatpush3.bf16.msra.mxu0 %v3646_v42  ;;  %v3706_v42 = vld [vmem:[%s4617_s1 + $0x630] sm:$0xff]  }
  0x95   :  { %3339 = vmatpush3.bf16.msra.mxu1 %v3647_v43  ;;  %3318 = vmatprep.subr.bf16.mxu0 %v3648_v44  ;;  %v3707_v43 = vld [vmem:[%s4617_s1 + $0x6b0] sm:$0xff]   ;;  %v3708_v44 = vld [vmem:[%s4617_s1 + $0x668] sm:$0xff]  }
  0x96   :  { %3340 = vmatprep.subr.bf16.mxu1 %v3649_v45  ;;  %v3709_v45 = vld [vmem:[%s4617_s1 + $0x6e8] sm:$0xff]  }
  0x98   :  { %3319 = vmatpush3.bf16.msra.mxu0 %v3650_v46  ;;  %v3710_v46 = vld [vmem:[%s4617_s1 + $0x628] sm:$0xff]  }
  0x99   :  { %3341 = vmatpush3.bf16.msra.mxu1 %v3651_v47  ;;  %3320 = vmatprep.subr.bf16.mxu0 %v3652_v48  ;;  %v3711_v47 = vld [vmem:[%s4617_s1 + $0x6a8] sm:$0xff]   ;;  %v3712_v48 = vld [vmem:[%s4617_s1 + $0x660] sm:$0xff]  }
  0x9a   :  { %3342 = vmatprep.subr.bf16.mxu1 %v3653_v49  ;;  %v3713_v49 = vld [vmem:[%s4617_s1 + $0x6e0] sm:$0xff]  }
  0x9c   :  { %3321 = vmatpush3.bf16.msra.mxu0 %v3654_v50  ;;  %v3714_v50 = vld [vmem:[%s4617_s1 + $0x620] sm:$0xff]  }
  0x9d   :  { %3343 = vmatpush3.bf16.msra.mxu1 %v3655_v51  ;;  %3322 = vmatprep.subr.bf16.mxu0 %v3656_v52  ;;  %v3715_v51 = vld [vmem:[%s4617_s1 + $0x6a0] sm:$0xff]   ;;  %v3716_v52 = vld [vmem:[%s4617_s1 + $0x658] sm:$0xff]  }
  0x9e   :  { %3344 = vmatprep.subr.bf16.mxu1 %v3657_v53  ;;  %v3717_v53 = vld [vmem:[%s4617_s1 + $0x6d8] sm:$0xff]  }
  0xa0   :  { %3323 = vmatpush3.bf16.msra.mxu0 %v3658_v54  ;;  %v3718_v54 = vld [vmem:[%s4617_s1 + $0x618] sm:$0xff]  }
  0xa1   :  { %3345 = vmatpush3.bf16.msra.mxu1 %v3659_v55  ;;  %3352 = vmatprep.subr.bf16.mxu0 %v3664_v62  ;;  %v3719_v55 = vld [vmem:[%s4617_s1 + $0x698] sm:$0xff]   ;;  %v3726_v62 = vld [vmem:[%s4617_s1 + $0x608] sm:$0xff]  }
  0xa2   :  { %3374 = vmatprep.subr.bf16.mxu1 %v3665_v63  ;;  %v3727_v63 = vld [vmem:[%s4617_s1 + $0x688] sm:$0xff]  }
  0xa3   :  { %2551 = vmatmul.mubr.bf16.vlgmr.msra.gmra.mxu0 %v2860_v57  ;;  %v3721_v57 = vld [vmem:[%s4617_s1 + $0x6d0] sm:$0xff]  }
  0xa4   :  { %2591 = vmatmul.mubr.bf16.vlgmr.msra.gmra.mxu1 %v2862_v60  ;;  %3353 = vmatpush3.bf16.msra.mxu0 %v3666_v0  ;;  %v3724_v60 = vld [vmem:[%s4617_s1 + $0x648] sm:$0xff]   ;;  %v3728_v0 = vld [vmem:[%s4617_s1 + $0x640] sm:$0xff]  }
  0xa5   :  { %3375 = vmatpush3.bf16.msra.mxu1 %v3667_v1  ;;  %3354 = vmatprep.subr.bf16.mxu0 %v3668_v2  ;;  %v3729_v1 = vld [vmem:[%s4617_s1 + $0x6c0] sm:$0xff]  }
  0xa6   :  { %3376 = vmatprep.subr.bf16.mxu1 %v3669_v3  ;;  %2630 = vmatprep.mubr.bf16.mxu0 %v2865_v33  ;;  %v3730_v2 = vld [vmem:[%s4617_s1 + $0x600] sm:$0xff]   ;;  %v3746_v33 = vld [vmem:[%s4617_s1 + $0x728] sm:$0xff]  }
  0xa7   :  { %2670 = vmatprep.mubr.bf16.mxu1 %v2867_v35  ;;  %v3731_v3 = vld [vmem:[%s4617_s1 + $0x680] sm:$0xff]  }
  0xa8   :  { %3355 = vmatpush3.bf16.msra.mxu0 %v3670_v4  ;;  %v27_v4 = vld [vmem:[%s4618_s0 + $0x60] sm:$0xff] }
  0xa9   :  { %3377 = vmatpush3.bf16.msra.mxu1 %v3671_v5  ;;  %3356 = vmatprep.subr.bf16.mxu0 %v3672_v6  ;;  %v28_v5 = vld [vmem:[%s4618_s0 + $0x68] sm:$0xff]  ;;  %v3748_v35 = vld [vmem:[%s4617_s1 + $0x760] sm:$0xff]  }
  0xaa   :  { %3378 = vmatprep.subr.bf16.mxu1 %v3673_v7 }
  0xac   :  { %3357 = vmatpush3.bf16.msra.mxu0 %v3674_v8  ;;  %v2868_v8 = vcombine.low %v27_v4, %v27_v4 }
  0xad   :  { %3379 = vmatpush3.bf16.msra.mxu1 %v3675_v9  ;;  %3358 = vmatprep.subr.bf16.mxu0 %v3676_v10  ;;  %v2869_v9 = vcombine.high %v27_v4, %v27_v4  ;;  %v2870_v10 = vcombine.low %v28_v5, %v28_v5 }
  0xae   :  { %3380 = vmatprep.subr.bf16.mxu1 %v3677_v11  ;;  %v3736_v11 = vld [vmem:[%s4617_s1 + $0x778] sm:$0xff]  }
  0xb0   :  { %3359 = vmatpush3.bf16.msra.mxu0 %v3678_v12  ;;  %v2871_v12 = vcombine.high %v28_v5, %v28_v5 }
  0xb1   :  { %3381 = vmatpush3.bf16.msra.mxu1 %v3679_v13  ;;  %3360 = vmatprep.subr.bf16.mxu0 %v3680_v14  ;;  %v3737_v13 = vld [vmem:[%s4617_s1 + $0x7f8] sm:$0xff]  }
  0xb2   :  { %3382 = vmatprep.subr.bf16.mxu1 %v3681_v15 }
  0xb4   :  { %3361 = vmatpush3.bf16.msra.mxu0 %v3682_v16  ;;  %v3738_v16 = vld [vmem:[%s4617_s1 + $0x738] sm:$0xff]  }
  0xb5   :  { %3383 = vmatpush3.bf16.msra.mxu1 %v3683_v17  ;;  %3362 = vmatprep.subr.bf16.mxu0 %v3684_v18 }
  0xb6   :  { %3384 = vmatprep.subr.bf16.mxu1 %v3685_v19  ;;  %v3739_v19 = vld [vmem:[%s4617_s1 + $0x7b8] sm:$0xff]  }
  0xb8   :  { %3363 = vmatpush3.bf16.msra.mxu0 %v3686_v20  ;;  %v2843_v20 = vld [vmem:[%s4619_s2] ss:$0 sm:$0xff] }
  0xb9   :  { %3385 = vmatpush3.bf16.msra.mxu1 %v3687_v21  ;;  %3364 = vmatprep.subr.bf16.mxu0 %v3688_v22 }
  0xba   :  { %3386 = vmatprep.subr.bf16.mxu1 %v3689_v23 }
  0xbc   :  { %3365 = vmatpush3.bf16.msra.mxu0 %v3690_v24  ;;  %v3740_v24 = vld [vmem:[%s4617_s1 + $0x770] sm:$0xff]  }
  0xbd   :  { %3387 = vmatpush3.bf16.msra.mxu1 %v3691_v25  ;;  %3366 = vmatprep.subr.bf16.mxu0 %v3692_v26  ;;  %v3741_v25 = vld [vmem:[%s4617_s1 + $0x7f0] sm:$0xff]  }
  0xbe   :  { %3388 = vmatprep.subr.bf16.mxu1 %v3693_v27 }
  0xc0   :  { %3367 = vmatpush3.bf16.msra.mxu0 %v3694_v28 }
  0xc1   :  { %3389 = vmatpush3.bf16.msra.mxu1 %v3695_v29  ;;  %3396 = vmatprep.subr.bf16.mxu0 %v3700_v36  ;;  %v3742_v29 = vld [vmem:[%s4617_s1 + $0x730] sm:$0xff]   ;;  %v3749_v36 = vld [vmem:[%s4617_s1 + $0x7e0] sm:$0xff]  }
  0xc2   :  { %3418 = vmatprep.subr.bf16.mxu1 %v3701_v37  ;;  %v3750_v37 = vld [vmem:[%s4617_s1 + $0x720] sm:$0xff]  }
  0xc3   :  { %2631 = vmatmul.mubr.bf16.vlgmr.msra.gmra.mxu0 %v2864_v32  ;;  %v3745_v32 = vld [vmem:[%s4617_s1 + $0x7e8] sm:$0xff]  }
  0xc4   :  { %2671 = vmatmul.mubr.bf16.vlgmr.msra.gmra.mxu1 %v2866_v34  ;;  %3397 = vmatpush3.bf16.msra.mxu0 %v3702_v38  ;;  %v3747_v34 = vld [vmem:[%s4617_s1 + $0x7a8] sm:$0xff]   ;;  %v3751_v38 = vld [vmem:[%s4617_s1 + $0x7a0] sm:$0xff]  }
  0xc5   :  { %3419 = vmatpush3.bf16.msra.mxu1 %v3703_v39  ;;  %3398 = vmatprep.subr.bf16.mxu0 %v3704_v40  ;;  %v3752_v39 = vld [vmem:[%s4617_s1 + $0x758] sm:$0xff]  }
  0xc6   :  { %3420 = vmatprep.subr.bf16.mxu1 %v3705_v41  ;;  %2710 = vmatprep.mubr.bf16.mxu0 %v2869_v9  ;;  %v3753_v40 = vld [vmem:[%s4617_s1 + $0x7d8] sm:$0xff]  }
  0xc7   :  { %2750 = vmatprep.mubr.bf16.mxu1 %v2871_v12  ;;  %v3754_v41 = vld [vmem:[%s4617_s1 + $0x718] sm:$0xff]  }
  0xc8   :  { %3399 = vmatpush3.bf16.msra.mxu0 %v3706_v42  ;;  %v3755_v42 = vld [vmem:[%s4617_s1 + $0x798] sm:$0xff]  }
  0xc9   :  { %3421 = vmatpush3.bf16.msra.mxu1 %v3707_v43  ;;  %3400 = vmatprep.subr.bf16.mxu0 %v3708_v44  ;;  %v3756_v43 = vld [vmem:[%s4617_s1 + $0x750] sm:$0xff]  }
  0xca   :  { %3422 = vmatprep.subr.bf16.mxu1 %v3709_v45  ;;  %v3757_v44 = vld [vmem:[%s4617_s1 + $0x7d0] sm:$0xff]  }
  0xcb   :  { %v3758_v45 = vld [vmem:[%s4617_s1 + $0x710] sm:$0xff]  }
  0xcc   :  { %3401 = vmatpush3.bf16.msra.mxu0 %v3710_v46  ;;  %v3759_v46 = vld [vmem:[%s4617_s1 + $0x790] sm:$0xff]  }
  0xcd   :  { %3423 = vmatpush3.bf16.msra.mxu1 %v3711_v47  ;;  %3402 = vmatprep.subr.bf16.mxu0 %v3712_v48  ;;  %v3760_v47 = vld [vmem:[%s4617_s1 + $0x748] sm:$0xff]  }
  0xce   :  { %3424 = vmatprep.subr.bf16.mxu1 %v3713_v49  ;;  %v3761_v48 = vld [vmem:[%s4617_s1 + $0x7c8] sm:$0xff]  }
  0xcf   :  { %v3762_v49 = vld [vmem:[%s4617_s1 + $0x708] sm:$0xff]  }
  0xd0   :  { %3403 = vmatpush3.bf16.msra.mxu0 %v3714_v50  ;;  %v3763_v50 = vld [vmem:[%s4617_s1 + $0x788] sm:$0xff]  }
  0xd1   :  { %3425 = vmatpush3.bf16.msra.mxu1 %v3715_v51  ;;  %3404 = vmatprep.subr.bf16.mxu0 %v3716_v52  ;;  %v3764_v51 = vld [vmem:[%s4617_s1 + $0x740] sm:$0xff]  }
  0xd2   :  { %3426 = vmatprep.subr.bf16.mxu1 %v3717_v53  ;;  %v3765_v52 = vld [vmem:[%s4617_s1 + $0x7c0] sm:$0xff]  }
  0xd3   :  { %v3766_v53 = vld [vmem:[%s4617_s1 + $0x700] sm:$0xff]  }
  0xd4   :  { %3405 = vmatpush3.bf16.msra.mxu0 %v3718_v54  ;;  %v3767_v54 = vld [vmem:[%s4617_s1 + $0x780] sm:$0xff]  }
  0xd5   :  { %3427 = vmatpush3.bf16.msra.mxu1 %v3719_v55  ;;  %3406 = vmatprep.subr.bf16.mxu0 %v3720_v56  ;;  %v29_v55 = vld [vmem:[%s4618_s0 + $0x70] sm:$0xff]  ;;  %v30_v56 = vld [vmem:[%s4618_s0 + $0x78] sm:$0xff] }
  0xd6   :  { %3428 = vmatprep.subr.bf16.mxu1 %v3721_v57 }
  0xd8   :  { %3407 = vmatpush3.bf16.msra.mxu0 %v3722_v58 }
  0xd9   :  { %3429 = vmatpush3.bf16.msra.mxu1 %v3723_v59  ;;  %3408 = vmatprep.subr.bf16.mxu0 %v3724_v60  ;;  %v2872_v59 = vcombine.low %v29_v55, %v29_v55  ;;  %v2873_v60 = vcombine.high %v29_v55, %v29_v55 }
  0xda   :  { %3430 = vmatprep.subr.bf16.mxu1 %v3725_v61  ;;  %v2874_v61 = vcombine.low %v30_v56, %v30_v56 }
  0xdc   :  { %3409 = vmatpush3.bf16.msra.mxu0 %v3726_v62  ;;  %v2875_v62 = vcombine.high %v30_v56, %v30_v56 }
  0xdd   :  { %3431 = vmatpush3.bf16.msra.mxu1 %v3727_v63  ;;  %3410 = vmatprep.subr.bf16.mxu0 %v3728_v0 }
  0xde   :  { %3432 = vmatprep.subr.bf16.mxu1 %v3729_v1 }
  0xe0   :  { %3411 = vmatpush3.bf16.msra.mxu0 %v3730_v2 }
  0xe1   :  { %3433 = vmatpush3.bf16.msra.mxu1 %v3731_v3  ;;  %3440 = vmatprep.subr.bf16.mxu0 %v3736_v11 }
  0xe2   :  { %3462 = vmatprep.subr.bf16.mxu1 %v3737_v13 }
  0xe3   :  { %v3148_v6 = vpop.f32.mrf.mxu0  ;;  %2711 = vmatmul.mubr.bf16.vlgmr.msra.gmra.mxu0 %v2868_v8 }
  0xe4   :  { %v3170_v7 = vpop.f32.mrf.mxu1  ;;  %2751 = vmatmul.mubr.bf16.vlgmr.msra.gmra.mxu1 %v2870_v10  ;;  %3441 = vmatpush3.bf16.msra.mxu0 %v3738_v16 }
  0xe5   :  { %v3149_v14 = vpop.f32.mrf.mxu0  ;;  %3463 = vmatpush3.bf16.msra.mxu1 %v3739_v19  ;;  %3442 = vmatprep.subr.bf16.mxu0 %v3740_v24 }
  0xe6   :  { %v3171_v15 = vpop.f32.mrf.mxu1  ;;  %v3150_v17 = vadd.f32 %v3149_v14, %v3148_v6  ;;  %3464 = vmatprep.subr.bf16.mxu1 %v3741_v25  ;;  %2790 = vmatprep.mubr.bf16.mxu0 %v2873_v60 }
  0xe7   :  { %v3172_v18 = vadd.f32 %v3171_v15, %v3170_v7  ;;  %v3151_v21 = vpop.f32.mrf.mxu0  ;;  %2830 = vmatprep.mubr.bf16.mxu1 %v2875_v62 }
  0xe8   :  { %v3173_v22 = vpop.f32.mrf.mxu1  ;;  %v2233_v23 = vadd.f32 %v3150_v17, %v2843_v20  ;;  %3443 = vmatpush3.bf16.msra.mxu0 %v3742_v29 }
  0xe9   :  { %v3152_v26 = vpop.f32.mrf.mxu0  ;;  %3465 = vmatpush3.bf16.msra.mxu1 %v3743_v30  ;;  %3444 = vmatprep.subr.bf16.mxu0 %v3744_v31 }
  0xea   :  { %v3174_v27 = vpop.f32.mrf.mxu1  ;;  %v4527_v28 = vadd.f32 %v3172_v18, %v2233_v23  ;;  %3466 = vmatprep.subr.bf16.mxu1 %v3745_v32 }
  0xec   :  { %3445 = vmatpush3.bf16.msra.mxu0 %v3746_v33 }
  0xed   :  { %3467 = vmatpush3.bf16.msra.mxu1 %v3747_v34  ;;  %3446 = vmatprep.subr.bf16.mxu0 %v3748_v35 }
  0xee   :  { %3468 = vmatprep.subr.bf16.mxu1 %v3749_v36 }
  0xf0   :  { %3447 = vmatpush3.bf16.msra.mxu0 %v3750_v37 }
  0xf1   :  { %3469 = vmatpush3.bf16.msra.mxu1 %v3751_v38  ;;  %3448 = vmatprep.subr.bf16.mxu0 %v3752_v39 }
  0xf2   :  { %3470 = vmatprep.subr.bf16.mxu1 %v3753_v40 }
  0xf4   :  { %3449 = vmatpush3.bf16.msra.mxu0 %v3754_v41 }
  0xf5   :  { %3471 = vmatpush3.bf16.msra.mxu1 %v3755_v42  ;;  %3450 = vmatprep.subr.bf16.mxu0 %v3756_v43 }
  0xf6   :  { %3472 = vmatprep.subr.bf16.mxu1 %v3757_v44 }
  0xf8   :  { %3451 = vmatpush3.bf16.msra.mxu0 %v3758_v45 }
  0xf9   :  { %3473 = vmatpush3.bf16.msra.mxu1 %v3759_v46  ;;  %3452 = vmatprep.subr.bf16.mxu0 %v3760_v47 }
  0xfa   :  { %3474 = vmatprep.subr.bf16.mxu1 %v3761_v48 }
  0xfc   :  { %3453 = vmatpush3.bf16.msra.mxu0 %v3762_v49 }
  0xfd   :  { %3475 = vmatpush3.bf16.msra.mxu1 %v3763_v50  ;;  %3454 = vmatprep.subr.bf16.mxu0 %v3764_v51 }
  0xfe   :  { %3476 = vmatprep.subr.bf16.mxu1 %v3765_v52 }
 0x100   :  { %3455 = vmatpush3.bf16.msra.mxu0 %v3766_v53 }
 0x101   :  { %3477 = vmatpush3.bf16.msra.mxu1 %v3767_v54 }
 0x103   :  { %v3192_v57 = vpop.f32.mrf.mxu0  ;;  %2791 = vmatmul.mubr.bf16.vlgmr.msra.gmra.mxu0 %v2872_v59 }
 0x104   :  { %v3214_v58 = vpop.f32.mrf.mxu1  ;;  %2831 = vmatmul.mubr.bf16.vlgmr.msra.gmra.mxu1 %v2874_v61 }
 0x105   :  { %v3193_v63 = vpop.f32.mrf.mxu0 }
 0x106   :  { %v3215_v0 = vpop.f32.mrf.mxu1  ;;  %v3194_v1 = vadd.f32 %v3193_v63, %v3192_v57 }
 0x107   :  { %v3216_v2 = vadd.f32 %v3215_v0, %v3214_v58  ;;  %v3195_v3 = vpop.f32.mrf.mxu0 }
 0x108   :  { %v3217_v4 = vpop.f32.mrf.mxu1  ;;  %v2313_v5 = vadd.f32 %v3194_v1, %v4527_v28 }
 0x109   :  { %v3196_v6 = vpop.f32.mrf.mxu0 }
 0x10a   :  { %v3218_v7 = vpop.f32.mrf.mxu1  ;;  %v2353_v8 = vadd.f32 %v3216_v2, %v2313_v5 }
 0x123   :  { %v3236_v9 = vpop.f32.mrf.mxu0 }
 0x124   :  { %v3258_v10 = vpop.f32.mrf.mxu1 }
 0x125   :  { %v3237_v11 = vpop.f32.mrf.mxu0 }
 0x126   :  { %v3238_v12 = vadd.f32 %v3237_v11, %v3236_v9  ;;  %v3259_v13 = vpop.f32.mrf.mxu1 }
 0x127   :  { %v3260_v14 = vadd.f32 %v3259_v13, %v3258_v10  ;;  %v3239_v15 = vpop.f32.mrf.mxu0 }
 0x128   :  { %v2393_v16 = vadd.f32 %v3238_v12, %v2353_v8  ;;  %v3261_v17 = vpop.f32.mrf.mxu1 }
 0x129   :  { %v3240_v18 = vpop.f32.mrf.mxu0 }
 0x12a   :  { %v2433_v19 = vadd.f32 %v3260_v14, %v2393_v16  ;;  %v3262_v20 = vpop.f32.mrf.mxu1 }
 0x143   :  { %v3280_v21 = vpop.f32.mrf.mxu0 }
 0x144   :  { %v3302_v22 = vpop.f32.mrf.mxu1 }
 0x145   :  { %v3281_v23 = vpop.f32.mrf.mxu0 }
 0x146   :  { %v3282_v24 = vadd.f32 %v3281_v23, %v3280_v21  ;;  %v3303_v25 = vpop.f32.mrf.mxu1 }
 0x147   :  { %v3304_v26 = vadd.f32 %v3303_v25, %v3302_v22  ;;  %v3283_v27 = vpop.f32.mrf.mxu0 }
 0x148   :  { %v2473_v28 = vadd.f32 %v3282_v24, %v2433_v19  ;;  %v3305_v29 = vpop.f32.mrf.mxu1 }
 0x149   :  { %v3284_v30 = vpop.f32.mrf.mxu0 }
 0x14a   :  { %v2513_v31 = vadd.f32 %v3304_v26, %v2473_v28  ;;  %v3306_v32 = vpop.f32.mrf.mxu1 }
 0x163   :  { %v3324_v33 = vpop.f32.mrf.mxu0 }
 0x164   :  { %v3346_v34 = vpop.f32.mrf.mxu1 }
 0x165   :  { %v3325_v35 = vpop.f32.mrf.mxu0 }
 0x166   :  { %v3347_v36 = vpop.f32.mrf.mxu1  ;;  %v3326_v37 = vadd.f32 %v3325_v35, %v3324_v33 }
 0x167   :  { %v3348_v38 = vadd.f32 %v3347_v36, %v3346_v34  ;;  %v3327_v39 = vpop.f32.mrf.mxu0 }
 0x168   :  { %v3349_v40 = vpop.f32.mrf.mxu1  ;;  %v2553_v41 = vadd.f32 %v3326_v37, %v2513_v31 }
 0x169   :  { %v3328_v42 = vpop.f32.mrf.mxu0 }
 0x16a   :  { %v3350_v43 = vpop.f32.mrf.mxu1  ;;  %v2593_v44 = vadd.f32 %v3348_v38, %v2553_v41 }
 0x183   :  { %v3368_v45 = vpop.f32.mrf.mxu0 }
 0x184   :  { %v3390_v46 = vpop.f32.mrf.mxu1 }
 0x185   :  { %v3369_v47 = vpop.f32.mrf.mxu0 }
 0x186   :  { %v3391_v48 = vpop.f32.mrf.mxu1  ;;  %v3370_v61 = vadd.f32 %v3369_v47, %v3368_v45 }
 0x187   :  { %v3371_v49 = vpop.f32.mrf.mxu0  ;;  %v3392_v63 = vadd.f32 %v3391_v48, %v3390_v46 }
 0x188   :  { %v3393_v50 = vpop.f32.mrf.mxu1  ;;  %v2633_v62 = vadd.f32 %v3370_v61, %v2593_v44 }
 0x189   :  { %v3372_v51 = vpop.f32.mrf.mxu0 }
 0x18a   :  { %v3394_v52 = vpop.f32.mrf.mxu1  ;;  %v2673_v1 = vadd.f32 %v3392_v63, %v2633_v62 }
 0x1a3   :  { %v3412_v53 = vpop.f32.mrf.mxu0 }
 0x1a4   :  { %v3434_v54 = vpop.f32.mrf.mxu1 }
 0x1a5   :  { %v3413_v55 = vpop.f32.mrf.mxu0 }
 0x1a6   :  { %v3435_v56 = vpop.f32.mrf.mxu1  ;;  %v3414_v0 = vadd.f32 %v3413_v55, %v3412_v53 }
 0x1a7   :  { %v3415_v57 = vpop.f32.mrf.mxu0  ;;  %v3436_v3 = vadd.f32 %v3435_v56, %v3434_v54 }
 0x1a8   :  { %v3437_v58 = vpop.f32.mrf.mxu1  ;;  %v2713_v2 = vadd.f32 %v3414_v0, %v2673_v1 }
 0x1a9   :  { %v3416_v59 = vpop.f32.mrf.mxu0 }
 0x1aa   :  { %v3438_v60 = vpop.f32.mrf.mxu1  ;;  %v2753_v7 = vadd.f32 %v3436_v3, %v2713_v2 }
 0x1c3   :  { %v3456_v4 = vpop.f32.mrf.mxu0 }
 0x1c4   :  { %v3478_v5 = vpop.f32.mrf.mxu1 }
 0x1c5   :  { %v3457_v6 = vpop.f32.mrf.mxu0 }
 0x1c6   :  { %v3458_v8 = vadd.f32 %v3457_v6, %v3456_v4  ;;  %v3479_v9 = vpop.f32.mrf.mxu1 }
 0x1c7   :  { %v3459_v10 = vpop.f32.mrf.mxu0  ;;  %v3480_v12 = vadd.f32 %v3479_v9, %v3478_v5 }
 0x1c8   :  { %v2793_v11 = vadd.f32 %v3458_v8, %v2753_v7  ;;  %v3481_v13 = vpop.f32.mrf.mxu1 }
 0x1c9   :  { %v3460_v14 = vpop.f32.mrf.mxu0 }
 0x1ca   :  { %v2833_v15 = vadd.f32 %v3480_v12, %v2793_v11  ;;  %v3482_v16 = vpop.f32.mrf.mxu1 }
 0x1cc   :  { %2838 = vst [vmem:[%s4620_s3] sm:$0xff] %v2833_v15 }

</bundles_post_ra>
